<compile_context>
chip_gen: v6e
topology: v6e:2x2x1
jax: 0.10.0
libtpu: 0.0.40
codegen_flags: <defaults>
</compile_context>

<pallas_src>
import numpy as np
import jax
import jax.numpy as jnp
from jax.experimental import pallas as pl
from jax.experimental.pallas import tpu as pltpu


# ----------------------------------------------------------------------------
# Helpers mirroring the PyTorch reference code
# ----------------------------------------------------------------------------
def _squeeze_last_dim(x):
    if x.ndim == 3 and x.shape[-1] == 1:
        return x[..., 0]
    return x


def linear_space(backcast_length, forecast_length, is_forecast=True):
    horizon = forecast_length if is_forecast else backcast_length
    return np.arange(0, horizon) / horizon


def trend_basis(p, t):
    # rows i = t**i, shape (p, horizon)
    assert p <= 4, "thetas_dim is too big."
    return np.stack([t ** i for i in range(p)]).astype(np.float32)


def seasonality_basis(p, t):
    # rows = [cos(2*pi*i*t) for i<p1] ++ [sin(2*pi*i*t) for i<p2], shape (p, horizon)
    p1, p2 = (p // 2, p // 2) if p % 2 == 0 else (p // 2, p // 2 + 1)
    s1 = (np.stack([np.cos(2 * np.pi * i * t) for i in range(p1)])
          if p1 > 0 else np.zeros((0, len(t))))
    s2 = np.stack([np.sin(2 * np.pi * i * t) for i in range(p2)])
    return np.concatenate([s1, s2], axis=0).astype(np.float32)


# ----------------------------------------------------------------------------
# Pallas kernel: whole N-BEATS stack for one batch-lane tile
# ----------------------------------------------------------------------------
def nbeats_kernel(x_ref,
                  w1_ref, b1_ref, w2_ref, b2_ref, w3_ref, b3_ref, w4_ref, b4_ref,
                  wbc_ref, bbc_ref, wfc_ref, bfc_ref,
                  bc_ref, fc_ref):
    """x_ref: (L, TILE_B)  (batch on lanes).  Weights stacked: (n_blocks, out, in).
    Biases stacked: (n_blocks, out, 1).  Outputs: (L, TILE_B), (F, TILE_B)."""
    n_blocks = w1_ref.shape[0]
    cdt = w1_ref.dtype  # MXU operand dtype (f32, or bf16 on v6e/v7x)

    def mm(w, act):
        return jnp.dot(w, act.astype(cdt), preferred_element_type=jnp.float32)

    residual = x_ref[...].astype(jnp.float32)              # (L, TB)
    forecast = jnp.zeros(fc_ref.shape, jnp.float32)        # (F, TB)

    for blk in range(n_blocks):                            # unrolled: tiny matmuls
        h = jnp.maximum(mm(w1_ref[blk], residual) + b1_ref[blk], 0.0)
        h = jnp.maximum(mm(w2_ref[blk], h) + b2_ref[blk], 0.0)
        h = jnp.maximum(mm(w3_ref[blk], h) + b3_ref[blk], 0.0)
        h = jnp.maximum(mm(w4_ref[blk], h) + b4_ref[blk], 0.0)
        # theta projections are pre-folded into the heads (no nonlinearity between)
        residual = residual - (mm(wbc_ref[blk], h) + bbc_ref[blk])
        forecast = forecast + (mm(wfc_ref[blk], h) + bfc_ref[blk])

    bc_ref[...] = residual.astype(bc_ref.dtype)
    fc_ref[...] = forecast.astype(fc_ref.dtype)


# ----------------------------------------------------------------------------
# Wrapper: layout plumbing + pallas_call
# ----------------------------------------------------------------------------
def nbeats_forward(x, kparams, forecast_length, *, tile_b=128,
                   compute_dtype=jnp.float32):
    """x: (B, backcast_length) or (B, backcast_length, 1).
    Returns (backcast_residual (B, L), forecast (B, F)) — same semantics as
    NBeatsNet.forward."""
    x = _squeeze_last_dim(x)
    B, L = x.shape
    F_len = forecast_length

    # batch on lanes; zero-pad batch to a multiple of tile_b (padded columns are
    # independent per-column math and are sliced off below — no leakage)
    xT = jnp.asarray(x, jnp.float32).T                     # (L, B)
    num_tiles = pl.cdiv(B, tile_b)
    B_pad = num_tiles * tile_b
    if B_pad != B:
        xT = jnp.pad(xT, ((0, 0), (0, B_pad - B)))

    order = ("w1", "b1", "w2", "b2", "w3", "b3", "w4", "b4",
             "w_bc", "b_bc", "w_fc", "b_fc")
    weight_args = tuple(
        kparams[n].astype(compute_dtype) if n.startswith("w")
        else kparams[n].astype(jnp.float32)
        for n in order)

    n_blocks, U, _ = kparams["w1"].shape

    x_spec = pl.BlockSpec((L, tile_b), lambda i: (0, i))
    w_specs = [pl.BlockSpec(a.shape, lambda i: (0, 0, 0)) for a in weight_args]
    out_specs = [pl.BlockSpec((L, tile_b), lambda i: (0, i)),
                 pl.BlockSpec((F_len, tile_b), lambda i: (0, i))]
    out_shape = (jax.ShapeDtypeStruct((L, B_pad), jnp.float32),
                 jax.ShapeDtypeStruct((F_len, B_pad), jnp.float32))

    flops_per_sample = 2 * U * L + 3 * (2 * U * U) + 2 * L * U + 2 * F_len * U
    flops = int(n_blocks * flops_per_sample * B_pad)
    bytes_accessed = int(xT.size * xT.dtype.itemsize
                         + sum(int(a.size) * a.dtype.itemsize for a in weight_args)
                         + (L + F_len) * B_pad * 4)
    cost = pl.CostEstimate(flops=flops, transcendentals=0,
                           bytes_accessed=bytes_accessed)

    bcT, fcT = pl.pallas_call(
        nbeats_kernel,
        out_shape=out_shape,
        grid_spec=pltpu.PrefetchScalarGridSpec(
            num_scalar_prefetch=0,
            grid=(num_tiles,),
            in_specs=[x_spec] + w_specs,
            out_specs=out_specs),
        compiler_params=pltpu.CompilerParams(
            dimension_semantics=("parallel",),
            vmem_limit_bytes=32 * 1024 * 1024),
        cost_estimate=cost,
    )(xT, *weight_args)

    backcast = bcT[:, :B].T
    forecast = fcT[:, :B].T
    return backcast, forecast


# ----------------------------------------------------------------------------
# Parameter construction (torch.nn.Linear-style init, PyTorch (out, in) layout)
# ----------------------------------------------------------------------------
def _linear_init(key, out_f, in_f, bias=True):
    kw, kb = jax.random.split(key)
    bound = float(1.0 / np.sqrt(in_f))
    W = jax.random.uniform(kw, (out_f, in_f), jnp.float32, -bound, bound)
    if bias:
        b = jax.random.uniform(kb, (out_f,), jnp.float32, -bound, bound)
        return W, b
    return W


def make_block(key, block_type, units, thetas_dim, backcast_length,
               forecast_length, nb_harmonics=None):
    if block_type == "seasonality":
        td = nb_harmonics if nb_harmonics else forecast_length
        share = True
    elif block_type == "trend":
        td = thetas_dim
        share = True
    else:  # generic
        td = thetas_dim
        share = False

    keys = jax.random.split(key, 8)
    W1, b1 = _linear_init(keys[0], units, backcast_length)
    W2, b2 = _linear_init(keys[1], units, units)
    W3, b3 = _linear_init(keys[2], units, units)
    W4, b4 = _linear_init(keys[3], units, units)
    Wtb = _linear_init(keys[4], td, units, bias=False)
    Wtf = Wtb if share else _linear_init(keys[5], td, units, bias=False)

    blk = dict(type=block_type, W1=W1, b1=b1, W2=W2, b2=b2, W3=W3, b3=b3,
               W4=W4, b4=b4, Wtb=Wtb, Wtf=Wtf)
    if block_type == "generic":
        Wbcfc, b_bcfc = _linear_init(keys[6], backcast_length, td)
        Wfcfc, b_fcfc = _linear_init(keys[7], forecast_length, td)
        blk.update(Wbcfc=Wbcfc, b_bcfc=b_bcfc, Wfcfc=Wfcfc, b_fcfc=b_fcfc)
    return blk


def init_nbeats_blocks(key, stack_types, nb_blocks_per_stack, thetas_dim,
                       hidden_layer_units, backcast_length, forecast_length,
                       nb_harmonics=None):
    blocks = []
    for stack_id, stack_type in enumerate(stack_types):
        for _ in range(nb_blocks_per_stack):
            key, sub = jax.random.split(key)
            blocks.append(make_block(sub, stack_type, hidden_layer_units,
                                     thetas_dim[stack_id], backcast_length,
                                     forecast_length, nb_harmonics))
    return blocks


def build_kernel_params(blocks, backcast_length, forecast_length):
    """Fold theta projections (and trend/seasonality bases) into the heads and
    stack all per-block params along a leading block axis."""
    t_bc = linear_space(backcast_length, forecast_length, is_forecast=False)
    t_fc = linear_space(backcast_length, forecast_length, is_forecast=True)

    names = ("w1", "b1", "w2", "b2", "w3", "b3", "w4", "b4",
             "w_bc", "b_bc", "w_fc", "b_fc")
    acc = {n: [] for n in names}

    for blk in blocks:
        td = blk["Wtb"].shape[0]
        if blk["type"] == "generic":
            W_bc = blk["Wbcfc"] @ blk["Wtb"]          # (L, U)
            b_bc = blk["b_bcfc"]
            W_fc = blk["Wfcfc"] @ blk["Wtf"]          # (F, U)
            b_fc = blk["b_fcfc"]
        else:
            basis_fn = trend_basis if blk["type"] == "trend" else seasonality_basis
            B_bc = jnp.asarray(basis_fn(td, t_bc))    # (td, L)
            B_fc = jnp.asarray(basis_fn(td, t_fc))    # (td, F)
            W_bc = B_bc.T @ blk["Wtb"]
            b_bc = jnp.zeros((backcast_length,), jnp.float32)
            W_fc = B_fc.T @ blk["Wtf"]
            b_fc = jnp.zeros((forecast_length,), jnp.float32)

        acc["w1"].append(blk["W1"]); acc["b1"].append(blk["b1"][:, None])
        acc["w2"].append(blk["W2"]); acc["b2"].append(blk["b2"][:, None])
        acc["w3"].append(blk["W3"]); acc["b3"].append(blk["b3"][:, None])
        acc["w4"].append(blk["W4"]); acc["b4"].append(blk["b4"][:, None])
        acc["w_bc"].append(W_bc);    acc["b_bc"].append(b_bc[:, None])
        acc["w_fc"].append(W_fc);    acc["b_fc"].append(b_fc[:, None])

    return {n: jnp.stack(v) for n, v in acc.items()}


# ----------------------------------------------------------------------------
# Pure-JAX reference (unfolded, row-major — mirrors the PyTorch math exactly)
# ----------------------------------------------------------------------------
def reference_forward(x, blocks, backcast_length, forecast_length):
    x = _squeeze_last_dim(x).astype(jnp.float32)
    t_bc = linear_space(backcast_length, forecast_length, is_forecast=False)
    t_fc = linear_space(backcast_length, forecast_length, is_forecast=True)

    residual = x
    forecast = jnp.zeros((x.shape[0], forecast_length), jnp.float32)
    for blk in blocks:
        h = jax.nn.relu(residual @ blk["W1"].T + blk["b1"])
        h = jax.nn.relu(h @ blk["W2"].T + blk["b2"])
        h = jax.nn.relu(h @ blk["W3"].T + blk["b3"])
        h = jax.nn.relu(h @ blk["W4"].T + blk["b4"])
        theta_b = h @ blk["Wtb"].T
        theta_f = h @ blk["Wtf"].T
        td = blk["Wtb"].shape[0]
        if blk["type"] == "generic":
            b = theta_b @ blk["Wbcfc"].T + blk["b_bcfc"]
            f = theta_f @ blk["Wfcfc"].T + blk["b_fcfc"]
        else:
            basis_fn = trend_basis if blk["type"] == "trend" else seasonality_basis
            b = theta_b @ jnp.asarray(basis_fn(td, t_bc))
            f = theta_f @ jnp.asarray(basis_fn(td, t_fc))
        residual = residual - b
        forecast = forecast + f
    return residual, forecast


# ----------------------------------------------------------------------------
if __name__ == "__main__":
    # small NBeatsNet config exercising all three block types
    batch = 8
    backcast_length = 10
    forecast_length = 5
    hidden_layer_units = 32
    nb_blocks_per_stack = 2
    stack_types = ("trend", "seasonality", "generic")
    thetas_dim = (4, 8, 8)

    key = jax.random.PRNGKey(0)
    k_x, k_p = jax.random.split(key)
    x = jax.random.normal(k_x, (batch, backcast_length, 1), jnp.float32)

    blocks = init_nbeats_blocks(k_p, stack_types, nb_blocks_per_stack, thetas_dim,
                                hidden_layer_units, backcast_length, forecast_length)
    kparams = build_kernel_params(blocks, backcast_length, forecast_length)

    backcast, forecast = nbeats_forward(x, kparams, forecast_length)
    jax.block_until_ready((backcast, forecast))

    bc_ref, fc_ref = reference_forward(x, blocks, backcast_length, forecast_length)
    assert backcast.shape == (batch, backcast_length)
    assert forecast.shape == (batch, forecast_length)
    assert jnp.allclose(backcast, bc_ref, atol=1e-4, rtol=1e-4)
    assert jnp.allclose(forecast, fc_ref, atol=1e-4, rtol=1e-4)

    print("KERNEL_OK")
</pallas_src>

<mosaic_0001>
module attributes {stable_mosaic.version = 11 : i64} {
  func.func @nbeats_kernel(%arg0: i32, %arg1: memref<10x128xf32, #tpu.memory_space<vmem>>, %arg2: memref<6x32x10xf32, #tpu.memory_space<vmem>>, %arg3: memref<6x32x1xf32, #tpu.memory_space<vmem>>, %arg4: memref<6x32x32xf32, #tpu.memory_space<vmem>>, %arg5: memref<6x32x1xf32, #tpu.memory_space<vmem>>, %arg6: memref<6x32x32xf32, #tpu.memory_space<vmem>>, %arg7: memref<6x32x1xf32, #tpu.memory_space<vmem>>, %arg8: memref<6x32x32xf32, #tpu.memory_space<vmem>>, %arg9: memref<6x32x1xf32, #tpu.memory_space<vmem>>, %arg10: memref<6x10x32xf32, #tpu.memory_space<vmem>>, %arg11: memref<6x10x1xf32, #tpu.memory_space<vmem>>, %arg12: memref<6x5x32xf32, #tpu.memory_space<vmem>>, %arg13: memref<6x5x1xf32, #tpu.memory_space<vmem>>, %arg14: memref<10x128xf32, #tpu.memory_space<vmem>>, %arg15: memref<5x128xf32, #tpu.memory_space<vmem>>) attributes {dimension_semantics = [#tpu.dimension_semantics<parallel>], iteration_bounds = array<i64: 1>, scalar_prefetch = 0 : i64, scratch_operands = 0 : i64, tpu.core_type = #tpu.core_type<tc>, window_params = [{transform_indices = @transform_0, window_bounds = array<i64: 10, 128>}, {pipeline_mode = #tpu.pipeline_mode<synchronous>, transform_indices = @transform_1, window_bounds = array<i64: 6, 32, 10>}, {pipeline_mode = #tpu.pipeline_mode<synchronous>, transform_indices = @transform_2, window_bounds = array<i64: 6, 32, 1>}, {pipeline_mode = #tpu.pipeline_mode<synchronous>, transform_indices = @transform_3, window_bounds = array<i64: 6, 32, 32>}, {pipeline_mode = #tpu.pipeline_mode<synchronous>, transform_indices = @transform_4, window_bounds = array<i64: 6, 32, 1>}, {pipeline_mode = #tpu.pipeline_mode<synchronous>, transform_indices = @transform_5, window_bounds = array<i64: 6, 32, 32>}, {pipeline_mode = #tpu.pipeline_mode<synchronous>, transform_indices = @transform_6, window_bounds = array<i64: 6, 32, 1>}, {pipeline_mode = #tpu.pipeline_mode<synchronous>, transform_indices = @transform_7, window_bounds = array<i64: 6, 32, 32>}, {pipeline_mode = #tpu.pipeline_mode<synchronous>, transform_indices = @transform_8, window_bounds = array<i64: 6, 32, 1>}, {pipeline_mode = #tpu.pipeline_mode<synchronous>, transform_indices = @transform_9, window_bounds = array<i64: 6, 10, 32>}, {pipeline_mode = #tpu.pipeline_mode<synchronous>, transform_indices = @transform_10, window_bounds = array<i64: 6, 10, 1>}, {pipeline_mode = #tpu.pipeline_mode<synchronous>, transform_indices = @transform_11, window_bounds = array<i64: 6, 5, 32>}, {pipeline_mode = #tpu.pipeline_mode<synchronous>, transform_indices = @transform_12, window_bounds = array<i64: 6, 5, 1>}, {transform_indices = @transform_13, window_bounds = array<i64: 10, 128>}, {transform_indices = @transform_14, window_bounds = array<i64: 5, 128>}]} {
    %c0 = arith.constant 0 : index
    %c0_0 = arith.constant 0 : index
    %0 = vector.load %arg1[%c0, %c0_0] : memref<10x128xf32, #tpu.memory_space<vmem>>, vector<10x128xf32>
    %cst = arith.constant 0.000000e+00 : f32
    %1 = vector.broadcast %cst : f32 to vector<5x128xf32>
    %c0_1 = arith.constant 0 : index
    %c0_2 = arith.constant 0 : index
    %c0_3 = arith.constant 0 : index
    %2 = vector.load %arg2[%c0_1, %c0_2, %c0_3] : memref<6x32x10xf32, #tpu.memory_space<vmem>>, vector<1x32x10xf32>
    %3 = vector.shape_cast %2 : vector<1x32x10xf32> to vector<32x10xf32>
    %cst_4 = arith.constant dense<0.000000e+00> : vector<32x128xf32>
    %4 = tpu.matmul %3, %0, %cst_4 {dimension_numbers = #tpu.dot_dimension_numbers<[1], [0], [0], [1], [0, 0, 1, 1], [], []>} : vector<32x10xf32>, vector<10x128xf32>, vector<32x128xf32> -> vector<32x128xf32>
    %c0_5 = arith.constant 0 : index
    %c0_6 = arith.constant 0 : index
    %c0_7 = arith.constant 0 : index
    %5 = vector.load %arg3[%c0_5, %c0_6, %c0_7] : memref<6x32x1xf32, #tpu.memory_space<vmem>>, vector<1x32x1xf32>
    %6 = vector.shape_cast %5 : vector<1x32x1xf32> to vector<32x1xf32>
    %7 = vector.broadcast %6 : vector<32x1xf32> to vector<32x128xf32>
    %8 = arith.addf %4, %7 : vector<32x128xf32>
    %cst_8 = arith.constant 0.000000e+00 : f32
    %9 = vector.broadcast %cst_8 : f32 to vector<32x128xf32>
    %10 = arith.maximumf %8, %9 : vector<32x128xf32>
    %c0_9 = arith.constant 0 : index
    %c0_10 = arith.constant 0 : index
    %c0_11 = arith.constant 0 : index
    %11 = vector.load %arg4[%c0_9, %c0_10, %c0_11] : memref<6x32x32xf32, #tpu.memory_space<vmem>>, vector<1x32x32xf32>
    %12 = vector.shape_cast %11 : vector<1x32x32xf32> to vector<32x32xf32>
    %cst_12 = arith.constant dense<0.000000e+00> : vector<32x128xf32>
    %13 = tpu.matmul %12, %10, %cst_12 {dimension_numbers = #tpu.dot_dimension_numbers<[1], [0], [0], [1], [0, 0, 1, 1], [], []>} : vector<32x32xf32>, vector<32x128xf32>, vector<32x128xf32> -> vector<32x128xf32>
    %c0_13 = arith.constant 0 : index
    %c0_14 = arith.constant 0 : index
    %c0_15 = arith.constant 0 : index
    %14 = vector.load %arg5[%c0_13, %c0_14, %c0_15] : memref<6x32x1xf32, #tpu.memory_space<vmem>>, vector<1x32x1xf32>
    %15 = vector.shape_cast %14 : vector<1x32x1xf32> to vector<32x1xf32>
    %16 = vector.broadcast %15 : vector<32x1xf32> to vector<32x128xf32>
    %17 = arith.addf %13, %16 : vector<32x128xf32>
    %cst_16 = arith.constant 0.000000e+00 : f32
    %18 = vector.broadcast %cst_16 : f32 to vector<32x128xf32>
    %19 = arith.maximumf %17, %18 : vector<32x128xf32>
    %c0_17 = arith.constant 0 : index
    %c0_18 = arith.constant 0 : index
    %c0_19 = arith.constant 0 : index
    %20 = vector.load %arg6[%c0_17, %c0_18, %c0_19] : memref<6x32x32xf32, #tpu.memory_space<vmem>>, vector<1x32x32xf32>
    %21 = vector.shape_cast %20 : vector<1x32x32xf32> to vector<32x32xf32>
    %cst_20 = arith.constant dense<0.000000e+00> : vector<32x128xf32>
    %22 = tpu.matmul %21, %19, %cst_20 {dimension_numbers = #tpu.dot_dimension_numbers<[1], [0], [0], [1], [0, 0, 1, 1], [], []>} : vector<32x32xf32>, vector<32x128xf32>, vector<32x128xf32> -> vector<32x128xf32>
    %c0_21 = arith.constant 0 : index
    %c0_22 = arith.constant 0 : index
    %c0_23 = arith.constant 0 : index
    %23 = vector.load %arg7[%c0_21, %c0_22, %c0_23] : memref<6x32x1xf32, #tpu.memory_space<vmem>>, vector<1x32x1xf32>
    %24 = vector.shape_cast %23 : vector<1x32x1xf32> to vector<32x1xf32>
    %25 = vector.broadcast %24 : vector<32x1xf32> to vector<32x128xf32>
    %26 = arith.addf %22, %25 : vector<32x128xf32>
    %cst_24 = arith.constant 0.000000e+00 : f32
    %27 = vector.broadcast %cst_24 : f32 to vector<32x128xf32>
    %28 = arith.maximumf %26, %27 : vector<32x128xf32>
    %c0_25 = arith.constant 0 : index
    %c0_26 = arith.constant 0 : index
    %c0_27 = arith.constant 0 : index
    %29 = vector.load %arg8[%c0_25, %c0_26, %c0_27] : memref<6x32x32xf32, #tpu.memory_space<vmem>>, vector<1x32x32xf32>
    %30 = vector.shape_cast %29 : vector<1x32x32xf32> to vector<32x32xf32>
    %cst_28 = arith.constant dense<0.000000e+00> : vector<32x128xf32>
    %31 = tpu.matmul %30, %28, %cst_28 {dimension_numbers = #tpu.dot_dimension_numbers<[1], [0], [0], [1], [0, 0, 1, 1], [], []>} : vector<32x32xf32>, vector<32x128xf32>, vector<32x128xf32> -> vector<32x128xf32>
    %c0_29 = arith.constant 0 : index
    %c0_30 = arith.constant 0 : index
    %c0_31 = arith.constant 0 : index
    %32 = vector.load %arg9[%c0_29, %c0_30, %c0_31] : memref<6x32x1xf32, #tpu.memory_space<vmem>>, vector<1x32x1xf32>
    %33 = vector.shape_cast %32 : vector<1x32x1xf32> to vector<32x1xf32>
    %34 = vector.broadcast %33 : vector<32x1xf32> to vector<32x128xf32>
    %35 = arith.addf %31, %34 : vector<32x128xf32>
    %cst_32 = arith.constant 0.000000e+00 : f32
    %36 = vector.broadcast %cst_32 : f32 to vector<32x128xf32>
    %37 = arith.maximumf %35, %36 : vector<32x128xf32>
    %c0_33 = arith.constant 0 : index
    %c0_34 = arith.constant 0 : index
    %c0_35 = arith.constant 0 : index
    %38 = vector.load %arg10[%c0_33, %c0_34, %c0_35] : memref<6x10x32xf32, #tpu.memory_space<vmem>>, vector<1x10x32xf32>
    %39 = vector.shape_cast %38 : vector<1x10x32xf32> to vector<10x32xf32>
    %cst_36 = arith.constant dense<0.000000e+00> : vector<10x128xf32>
    %40 = tpu.matmul %39, %37, %cst_36 {dimension_numbers = #tpu.dot_dimension_numbers<[1], [0], [0], [1], [0, 0, 1, 1], [], []>} : vector<10x32xf32>, vector<32x128xf32>, vector<10x128xf32> -> vector<10x128xf32>
    %c0_37 = arith.constant 0 : index
    %c0_38 = arith.constant 0 : index
    %c0_39 = arith.constant 0 : index
    %41 = vector.load %arg11[%c0_37, %c0_38, %c0_39] : memref<6x10x1xf32, #tpu.memory_space<vmem>>, vector<1x10x1xf32>
    %42 = vector.shape_cast %41 : vector<1x10x1xf32> to vector<10x1xf32>
    %43 = vector.broadcast %42 : vector<10x1xf32> to vector<10x128xf32>
    %44 = arith.addf %40, %43 : vector<10x128xf32>
    %45 = arith.subf %0, %44 : vector<10x128xf32>
    %c0_40 = arith.constant 0 : index
    %c0_41 = arith.constant 0 : index
    %c0_42 = arith.constant 0 : index
    %46 = vector.load %arg12[%c0_40, %c0_41, %c0_42] : memref<6x5x32xf32, #tpu.memory_space<vmem>>, vector<1x5x32xf32>
    %47 = vector.shape_cast %46 : vector<1x5x32xf32> to vector<5x32xf32>
    %cst_43 = arith.constant dense<0.000000e+00> : vector<5x128xf32>
    %48 = tpu.matmul %47, %37, %cst_43 {dimension_numbers = #tpu.dot_dimension_numbers<[1], [0], [0], [1], [0, 0, 1, 1], [], []>} : vector<5x32xf32>, vector<32x128xf32>, vector<5x128xf32> -> vector<5x128xf32>
    %c0_44 = arith.constant 0 : index
    %c0_45 = arith.constant 0 : index
    %c0_46 = arith.constant 0 : index
    %49 = vector.load %arg13[%c0_44, %c0_45, %c0_46] : memref<6x5x1xf32, #tpu.memory_space<vmem>>, vector<1x5x1xf32>
    %50 = vector.shape_cast %49 : vector<1x5x1xf32> to vector<5x1xf32>
    %51 = vector.broadcast %50 : vector<5x1xf32> to vector<5x128xf32>
    %52 = arith.addf %48, %51 : vector<5x128xf32>
    %53 = arith.addf %1, %52 : vector<5x128xf32>
    %c1 = arith.constant 1 : index
    %c0_47 = arith.constant 0 : index
    %c0_48 = arith.constant 0 : index
    %54 = vector.load %arg2[%c1, %c0_47, %c0_48] : memref<6x32x10xf32, #tpu.memory_space<vmem>>, vector<1x32x10xf32>
    %55 = vector.shape_cast %54 : vector<1x32x10xf32> to vector<32x10xf32>
    %cst_49 = arith.constant dense<0.000000e+00> : vector<32x128xf32>
    %56 = tpu.matmul %55, %45, %cst_49 {dimension_numbers = #tpu.dot_dimension_numbers<[1], [0], [0], [1], [0, 0, 1, 1], [], []>} : vector<32x10xf32>, vector<10x128xf32>, vector<32x128xf32> -> vector<32x128xf32>
    %c1_50 = arith.constant 1 : index
    %c0_51 = arith.constant 0 : index
    %c0_52 = arith.constant 0 : index
    %57 = vector.load %arg3[%c1_50, %c0_51, %c0_52] : memref<6x32x1xf32, #tpu.memory_space<vmem>>, vector<1x32x1xf32>
    %58 = vector.shape_cast %57 : vector<1x32x1xf32> to vector<32x1xf32>
    %59 = vector.broadcast %58 : vector<32x1xf32> to vector<32x128xf32>
    %60 = arith.addf %56, %59 : vector<32x128xf32>
    %cst_53 = arith.constant 0.000000e+00 : f32
    %61 = vector.broadcast %cst_53 : f32 to vector<32x128xf32>
    %62 = arith.maximumf %60, %61 : vector<32x128xf32>
    %c1_54 = arith.constant 1 : index
    %c0_55 = arith.constant 0 : index
    %c0_56 = arith.constant 0 : index
    %63 = vector.load %arg4[%c1_54, %c0_55, %c0_56] : memref<6x32x32xf32, #tpu.memory_space<vmem>>, vector<1x32x32xf32>
    %64 = vector.shape_cast %63 : vector<1x32x32xf32> to vector<32x32xf32>
    %cst_57 = arith.constant dense<0.000000e+00> : vector<32x128xf32>
    %65 = tpu.matmul %64, %62, %cst_57 {dimension_numbers = #tpu.dot_dimension_numbers<[1], [0], [0], [1], [0, 0, 1, 1], [], []>} : vector<32x32xf32>, vector<32x128xf32>, vector<32x128xf32> -> vector<32x128xf32>
    %c1_58 = arith.constant 1 : index
    %c0_59 = arith.constant 0 : index
    %c0_60 = arith.constant 0 : index
    %66 = vector.load %arg5[%c1_58, %c0_59, %c0_60] : memref<6x32x1xf32, #tpu.memory_space<vmem>>, vector<1x32x1xf32>
    %67 = vector.shape_cast %66 : vector<1x32x1xf32> to vector<32x1xf32>
    %68 = vector.broadcast %67 : vector<32x1xf32> to vector<32x128xf32>
    %69 = arith.addf %65, %68 : vector<32x128xf32>
    %cst_61 = arith.constant 0.000000e+00 : f32
    %70 = vector.broadcast %cst_61 : f32 to vector<32x128xf32>
    %71 = arith.maximumf %69, %70 : vector<32x128xf32>
    %c1_62 = arith.constant 1 : index
    %c0_63 = arith.constant 0 : index
    %c0_64 = arith.constant 0 : index
    %72 = vector.load %arg6[%c1_62, %c0_63, %c0_64] : memref<6x32x32xf32, #tpu.memory_space<vmem>>, vector<1x32x32xf32>
    %73 = vector.shape_cast %72 : vector<1x32x32xf32> to vector<32x32xf32>
    %cst_65 = arith.constant dense<0.000000e+00> : vector<32x128xf32>
    %74 = tpu.matmul %73, %71, %cst_65 {dimension_numbers = #tpu.dot_dimension_numbers<[1], [0], [0], [1], [0, 0, 1, 1], [], []>} : vector<32x32xf32>, vector<32x128xf32>, vector<32x128xf32> -> vector<32x128xf32>
    %c1_66 = arith.constant 1 : index
    %c0_67 = arith.constant 0 : index
    %c0_68 = arith.constant 0 : index
    %75 = vector.load %arg7[%c1_66, %c0_67, %c0_68] : memref<6x32x1xf32, #tpu.memory_space<vmem>>, vector<1x32x1xf32>
    %76 = vector.shape_cast %75 : vector<1x32x1xf32> to vector<32x1xf32>
    %77 = vector.broadcast %76 : vector<32x1xf32> to vector<32x128xf32>
    %78 = arith.addf %74, %77 : vector<32x128xf32>
    %cst_69 = arith.constant 0.000000e+00 : f32
    %79 = vector.broadcast %cst_69 : f32 to vector<32x128xf32>
    %80 = arith.maximumf %78, %79 : vector<32x128xf32>
    %c1_70 = arith.constant 1 : index
    %c0_71 = arith.constant 0 : index
    %c0_72 = arith.constant 0 : index
    %81 = vector.load %arg8[%c1_70, %c0_71, %c0_72] : memref<6x32x32xf32, #tpu.memory_space<vmem>>, vector<1x32x32xf32>
    %82 = vector.shape_cast %81 : vector<1x32x32xf32> to vector<32x32xf32>
    %cst_73 = arith.constant dense<0.000000e+00> : vector<32x128xf32>
    %83 = tpu.matmul %82, %80, %cst_73 {dimension_numbers = #tpu.dot_dimension_numbers<[1], [0], [0], [1], [0, 0, 1, 1], [], []>} : vector<32x32xf32>, vector<32x128xf32>, vector<32x128xf32> -> vector<32x128xf32>
    %c1_74 = arith.constant 1 : index
    %c0_75 = arith.constant 0 : index
    %c0_76 = arith.constant 0 : index
    %84 = vector.load %arg9[%c1_74, %c0_75, %c0_76] : memref<6x32x1xf32, #tpu.memory_space<vmem>>, vector<1x32x1xf32>
    %85 = vector.shape_cast %84 : vector<1x32x1xf32> to vector<32x1xf32>
    %86 = vector.broadcast %85 : vector<32x1xf32> to vector<32x128xf32>
    %87 = arith.addf %83, %86 : vector<32x128xf32>
    %cst_77 = arith.constant 0.000000e+00 : f32
    %88 = vector.broadcast %cst_77 : f32 to vector<32x128xf32>
    %89 = arith.maximumf %87, %88 : vector<32x128xf32>
    %c1_78 = arith.constant 1 : index
    %c0_79 = arith.constant 0 : index
    %c0_80 = arith.constant 0 : index
    %90 = vector.load %arg10[%c1_78, %c0_79, %c0_80] : memref<6x10x32xf32, #tpu.memory_space<vmem>>, vector<1x10x32xf32>
    %91 = vector.shape_cast %90 : vector<1x10x32xf32> to vector<10x32xf32>
    %cst_81 = arith.constant dense<0.000000e+00> : vector<10x128xf32>
    %92 = tpu.matmul %91, %89, %cst_81 {dimension_numbers = #tpu.dot_dimension_numbers<[1], [0], [0], [1], [0, 0, 1, 1], [], []>} : vector<10x32xf32>, vector<32x128xf32>, vector<10x128xf32> -> vector<10x128xf32>
    %c1_82 = arith.constant 1 : index
    %c0_83 = arith.constant 0 : index
    %c0_84 = arith.constant 0 : index
    %93 = vector.load %arg11[%c1_82, %c0_83, %c0_84] : memref<6x10x1xf32, #tpu.memory_space<vmem>>, vector<1x10x1xf32>
    %94 = vector.shape_cast %93 : vector<1x10x1xf32> to vector<10x1xf32>
    %95 = vector.broadcast %94 : vector<10x1xf32> to vector<10x128xf32>
    %96 = arith.addf %92, %95 : vector<10x128xf32>
    %97 = arith.subf %45, %96 : vector<10x128xf32>
    %c1_85 = arith.constant 1 : index
    %c0_86 = arith.constant 0 : index
    %c0_87 = arith.constant 0 : index
    %98 = vector.load %arg12[%c1_85, %c0_86, %c0_87] : memref<6x5x32xf32, #tpu.memory_space<vmem>>, vector<1x5x32xf32>
    %99 = vector.shape_cast %98 : vector<1x5x32xf32> to vector<5x32xf32>
    %cst_88 = arith.constant dense<0.000000e+00> : vector<5x128xf32>
    %100 = tpu.matmul %99, %89, %cst_88 {dimension_numbers = #tpu.dot_dimension_numbers<[1], [0], [0], [1], [0, 0, 1, 1], [], []>} : vector<5x32xf32>, vector<32x128xf32>, vector<5x128xf32> -> vector<5x128xf32>
    %c1_89 = arith.constant 1 : index
    %c0_90 = arith.constant 0 : index
    %c0_91 = arith.constant 0 : index
    %101 = vector.load %arg13[%c1_89, %c0_90, %c0_91] : memref<6x5x1xf32, #tpu.memory_space<vmem>>, vector<1x5x1xf32>
    %102 = vector.shape_cast %101 : vector<1x5x1xf32> to vector<5x1xf32>
    %103 = vector.broadcast %102 : vector<5x1xf32> to vector<5x128xf32>
    %104 = arith.addf %100, %103 : vector<5x128xf32>
    %105 = arith.addf %53, %104 : vector<5x128xf32>
    %c2 = arith.constant 2 : index
    %c0_92 = arith.constant 0 : index
    %c0_93 = arith.constant 0 : index
    %106 = vector.load %arg2[%c2, %c0_92, %c0_93] : memref<6x32x10xf32, #tpu.memory_space<vmem>>, vector<1x32x10xf32>
    %107 = vector.shape_cast %106 : vector<1x32x10xf32> to vector<32x10xf32>
    %cst_94 = arith.constant dense<0.000000e+00> : vector<32x128xf32>
    %108 = tpu.matmul %107, %97, %cst_94 {dimension_numbers = #tpu.dot_dimension_numbers<[1], [0], [0], [1], [0, 0, 1, 1], [], []>} : vector<32x10xf32>, vector<10x128xf32>, vector<32x128xf32> -> vector<32x128xf32>
    %c2_95 = arith.constant 2 : index
    %c0_96 = arith.constant 0 : index
    %c0_97 = arith.constant 0 : index
    %109 = vector.load %arg3[%c2_95, %c0_96, %c0_97] : memref<6x32x1xf32, #tpu.memory_space<vmem>>, vector<1x32x1xf32>
    %110 = vector.shape_cast %109 : vector<1x32x1xf32> to vector<32x1xf32>
    %111 = vector.broadcast %110 : vector<32x1xf32> to vector<32x128xf32>
    %112 = arith.addf %108, %111 : vector<32x128xf32>
    %cst_98 = arith.constant 0.000000e+00 : f32
    %113 = vector.broadcast %cst_98 : f32 to vector<32x128xf32>
    %114 = arith.maximumf %112, %113 : vector<32x128xf32>
    %c2_99 = arith.constant 2 : index
    %c0_100 = arith.constant 0 : index
    %c0_101 = arith.constant 0 : index
    %115 = vector.load %arg4[%c2_99, %c0_100, %c0_101] : memref<6x32x32xf32, #tpu.memory_space<vmem>>, vector<1x32x32xf32>
    %116 = vector.shape_cast %115 : vector<1x32x32xf32> to vector<32x32xf32>
    %cst_102 = arith.constant dense<0.000000e+00> : vector<32x128xf32>
    %117 = tpu.matmul %116, %114, %cst_102 {dimension_numbers = #tpu.dot_dimension_numbers<[1], [0], [0], [1], [0, 0, 1, 1], [], []>} : vector<32x32xf32>, vector<32x128xf32>, vector<32x128xf32> -> vector<32x128xf32>
    %c2_103 = arith.constant 2 : index
    %c0_104 = arith.constant 0 : index
    %c0_105 = arith.constant 0 : index
    %118 = vector.load %arg5[%c2_103, %c0_104, %c0_105] : memref<6x32x1xf32, #tpu.memory_space<vmem>>, vector<1x32x1xf32>
    %119 = vector.shape_cast %118 : vector<1x32x1xf32> to vector<32x1xf32>
    %120 = vector.broadcast %119 : vector<32x1xf32> to vector<32x128xf32>
    %121 = arith.addf %117, %120 : vector<32x128xf32>
    %cst_106 = arith.constant 0.000000e+00 : f32
    %122 = vector.broadcast %cst_106 : f32 to vector<32x128xf32>
    %123 = arith.maximumf %121, %122 : vector<32x128xf32>
    %c2_107 = arith.constant 2 : index
    %c0_108 = arith.constant 0 : index
    %c0_109 = arith.constant 0 : index
    %124 = vector.load %arg6[%c2_107, %c0_108, %c0_109] : memref<6x32x32xf32, #tpu.memory_space<vmem>>, vector<1x32x32xf32>
    %125 = vector.shape_cast %124 : vector<1x32x32xf32> to vector<32x32xf32>
    %cst_110 = arith.constant dense<0.000000e+00> : vector<32x128xf32>
    %126 = tpu.matmul %125, %123, %cst_110 {dimension_numbers = #tpu.dot_dimension_numbers<[1], [0], [0], [1], [0, 0, 1, 1], [], []>} : vector<32x32xf32>, vector<32x128xf32>, vector<32x128xf32> -> vector<32x128xf32>
    %c2_111 = arith.constant 2 : index
    %c0_112 = arith.constant 0 : index
    %c0_113 = arith.constant 0 : index
    %127 = vector.load %arg7[%c2_111, %c0_112, %c0_113] : memref<6x32x1xf32, #tpu.memory_space<vmem>>, vector<1x32x1xf32>
    %128 = vector.shape_cast %127 : vector<1x32x1xf32> to vector<32x1xf32>
    %129 = vector.broadcast %128 : vector<32x1xf32> to vector<32x128xf32>
    %130 = arith.addf %126, %129 : vector<32x128xf32>
    %cst_114 = arith.constant 0.000000e+00 : f32
    %131 = vector.broadcast %cst_114 : f32 to vector<32x128xf32>
    %132 = arith.maximumf %130, %131 : vector<32x128xf32>
    %c2_115 = arith.constant 2 : index
    %c0_116 = arith.constant 0 : index
    %c0_117 = arith.constant 0 : index
    %133 = vector.load %arg8[%c2_115, %c0_116, %c0_117] : memref<6x32x32xf32, #tpu.memory_space<vmem>>, vector<1x32x32xf32>
    %134 = vector.shape_cast %133 : vector<1x32x32xf32> to vector<32x32xf32>
    %cst_118 = arith.constant dense<0.000000e+00> : vector<32x128xf32>
    %135 = tpu.matmul %134, %132, %cst_118 {dimension_numbers = #tpu.dot_dimension_numbers<[1], [0], [0], [1], [0, 0, 1, 1], [], []>} : vector<32x32xf32>, vector<32x128xf32>, vector<32x128xf32> -> vector<32x128xf32>
    %c2_119 = arith.constant 2 : index
    %c0_120 = arith.constant 0 : index
    %c0_121 = arith.constant 0 : index
    %136 = vector.load %arg9[%c2_119, %c0_120, %c0_121] : memref<6x32x1xf32, #tpu.memory_space<vmem>>, vector<1x32x1xf32>
    %137 = vector.shape_cast %136 : vector<1x32x1xf32> to vector<32x1xf32>
    %138 = vector.broadcast %137 : vector<32x1xf32> to vector<32x128xf32>
    %139 = arith.addf %135, %138 : vector<32x128xf32>
    %cst_122 = arith.constant 0.000000e+00 : f32
    %140 = vector.broadcast %cst_122 : f32 to vector<32x128xf32>
    %141 = arith.maximumf %139, %140 : vector<32x128xf32>
    %c2_123 = arith.constant 2 : index
    %c0_124 = arith.constant 0 : index
    %c0_125 = arith.constant 0 : index
    %142 = vector.load %arg10[%c2_123, %c0_124, %c0_125] : memref<6x10x32xf32, #tpu.memory_space<vmem>>, vector<1x10x32xf32>
    %143 = vector.shape_cast %142 : vector<1x10x32xf32> to vector<10x32xf32>
    %cst_126 = arith.constant dense<0.000000e+00> : vector<10x128xf32>
    %144 = tpu.matmul %143, %141, %cst_126 {dimension_numbers = #tpu.dot_dimension_numbers<[1], [0], [0], [1], [0, 0, 1, 1], [], []>} : vector<10x32xf32>, vector<32x128xf32>, vector<10x128xf32> -> vector<10x128xf32>
    %c2_127 = arith.constant 2 : index
    %c0_128 = arith.constant 0 : index
    %c0_129 = arith.constant 0 : index
    %145 = vector.load %arg11[%c2_127, %c0_128, %c0_129] : memref<6x10x1xf32, #tpu.memory_space<vmem>>, vector<1x10x1xf32>
    %146 = vector.shape_cast %145 : vector<1x10x1xf32> to vector<10x1xf32>
    %147 = vector.broadcast %146 : vector<10x1xf32> to vector<10x128xf32>
    %148 = arith.addf %144, %147 : vector<10x128xf32>
    %149 = arith.subf %97, %148 : vector<10x128xf32>
    %c2_130 = arith.constant 2 : index
    %c0_131 = arith.constant 0 : index
    %c0_132 = arith.constant 0 : index
    %150 = vector.load %arg12[%c2_130, %c0_131, %c0_132] : memref<6x5x32xf32, #tpu.memory_space<vmem>>, vector<1x5x32xf32>
    %151 = vector.shape_cast %150 : vector<1x5x32xf32> to vector<5x32xf32>
    %cst_133 = arith.constant dense<0.000000e+00> : vector<5x128xf32>
    %152 = tpu.matmul %151, %141, %cst_133 {dimension_numbers = #tpu.dot_dimension_numbers<[1], [0], [0], [1], [0, 0, 1, 1], [], []>} : vector<5x32xf32>, vector<32x128xf32>, vector<5x128xf32> -> vector<5x128xf32>
    %c2_134 = arith.constant 2 : index
    %c0_135 = arith.constant 0 : index
    %c0_136 = arith.constant 0 : index
    %153 = vector.load %arg13[%c2_134, %c0_135, %c0_136] : memref<6x5x1xf32, #tpu.memory_space<vmem>>, vector<1x5x1xf32>
    %154 = vector.shape_cast %153 : vector<1x5x1xf32> to vector<5x1xf32>
    %155 = vector.broadcast %154 : vector<5x1xf32> to vector<5x128xf32>
    %156 = arith.addf %152, %155 : vector<5x128xf32>
    %157 = arith.addf %105, %156 : vector<5x128xf32>
    %c3 = arith.constant 3 : index
    %c0_137 = arith.constant 0 : index
    %c0_138 = arith.constant 0 : index
    %158 = vector.load %arg2[%c3, %c0_137, %c0_138] : memref<6x32x10xf32, #tpu.memory_space<vmem>>, vector<1x32x10xf32>
    %159 = vector.shape_cast %158 : vector<1x32x10xf32> to vector<32x10xf32>
    %cst_139 = arith.constant dense<0.000000e+00> : vector<32x128xf32>
    %160 = tpu.matmul %159, %149, %cst_139 {dimension_numbers = #tpu.dot_dimension_numbers<[1], [0], [0], [1], [0, 0, 1, 1], [], []>} : vector<32x10xf32>, vector<10x128xf32>, vector<32x128xf32> -> vector<32x128xf32>
    %c3_140 = arith.constant 3 : index
    %c0_141 = arith.constant 0 : index
    %c0_142 = arith.constant 0 : index
    %161 = vector.load %arg3[%c3_140, %c0_141, %c0_142] : memref<6x32x1xf32, #tpu.memory_space<vmem>>, vector<1x32x1xf32>
    %162 = vector.shape_cast %161 : vector<1x32x1xf32> to vector<32x1xf32>
    %163 = vector.broadcast %162 : vector<32x1xf32> to vector<32x128xf32>
    %164 = arith.addf %160, %163 : vector<32x128xf32>
    %cst_143 = arith.constant 0.000000e+00 : f32
    %165 = vector.broadcast %cst_143 : f32 to vector<32x128xf32>
    %166 = arith.maximumf %164, %165 : vector<32x128xf32>
    %c3_144 = arith.constant 3 : index
    %c0_145 = arith.constant 0 : index
    %c0_146 = arith.constant 0 : index
    %167 = vector.load %arg4[%c3_144, %c0_145, %c0_146] : memref<6x32x32xf32, #tpu.memory_space<vmem>>, vector<1x32x32xf32>
    %168 = vector.shape_cast %167 : vector<1x32x32xf32> to vector<32x32xf32>
    %cst_147 = arith.constant dense<0.000000e+00> : vector<32x128xf32>
    %169 = tpu.matmul %168, %166, %cst_147 {dimension_numbers = #tpu.dot_dimension_numbers<[1], [0], [0], [1], [0, 0, 1, 1], [], []>} : vector<32x32xf32>, vector<32x128xf32>, vector<32x128xf32> -> vector<32x128xf32>
    %c3_148 = arith.constant 3 : index
    %c0_149 = arith.constant 0 : index
    %c0_150 = arith.constant 0 : index
    %170 = vector.load %arg5[%c3_148, %c0_149, %c0_150] : memref<6x32x1xf32, #tpu.memory_space<vmem>>, vector<1x32x1xf32>
    %171 = vector.shape_cast %170 : vector<1x32x1xf32> to vector<32x1xf32>
    %172 = vector.broadcast %171 : vector<32x1xf32> to vector<32x128xf32>
    %173 = arith.addf %169, %172 : vector<32x128xf32>
    %cst_151 = arith.constant 0.000000e+00 : f32
    %174 = vector.broadcast %cst_151 : f32 to vector<32x128xf32>
    %175 = arith.maximumf %173, %174 : vector<32x128xf32>
    %c3_152 = arith.constant 3 : index
    %c0_153 = arith.constant 0 : index
    %c0_154 = arith.constant 0 : index
    %176 = vector.load %arg6[%c3_152, %c0_153, %c0_154] : memref<6x32x32xf32, #tpu.memory_space<vmem>>, vector<1x32x32xf32>
    %177 = vector.shape_cast %176 : vector<1x32x32xf32> to vector<32x32xf32>
    %cst_155 = arith.constant dense<0.000000e+00> : vector<32x128xf32>
    %178 = tpu.matmul %177, %175, %cst_155 {dimension_numbers = #tpu.dot_dimension_numbers<[1], [0], [0], [1], [0, 0, 1, 1], [], []>} : vector<32x32xf32>, vector<32x128xf32>, vector<32x128xf32> -> vector<32x128xf32>
    %c3_156 = arith.constant 3 : index
    %c0_157 = arith.constant 0 : index
    %c0_158 = arith.constant 0 : index
    %179 = vector.load %arg7[%c3_156, %c0_157, %c0_158] : memref<6x32x1xf32, #tpu.memory_space<vmem>>, vector<1x32x1xf32>
    %180 = vector.shape_cast %179 : vector<1x32x1xf32> to vector<32x1xf32>
    %181 = vector.broadcast %180 : vector<32x1xf32> to vector<32x128xf32>
    %182 = arith.addf %178, %181 : vector<32x128xf32>
    %cst_159 = arith.constant 0.000000e+00 : f32
    %183 = vector.broadcast %cst_159 : f32 to vector<32x128xf32>
    %184 = arith.maximumf %182, %183 : vector<32x128xf32>
    %c3_160 = arith.constant 3 : index
    %c0_161 = arith.constant 0 : index
    %c0_162 = arith.constant 0 : index
    %185 = vector.load %arg8[%c3_160, %c0_161, %c0_162] : memref<6x32x32xf32, #tpu.memory_space<vmem>>, vector<1x32x32xf32>
    %186 = vector.shape_cast %185 : vector<1x32x32xf32> to vector<32x32xf32>
    %cst_163 = arith.constant dense<0.000000e+00> : vector<32x128xf32>
    %187 = tpu.matmul %186, %184, %cst_163 {dimension_numbers = #tpu.dot_dimension_numbers<[1], [0], [0], [1], [0, 0, 1, 1], [], []>} : vector<32x32xf32>, vector<32x128xf32>, vector<32x128xf32> -> vector<32x128xf32>
    %c3_164 = arith.constant 3 : index
    %c0_165 = arith.constant 0 : index
    %c0_166 = arith.constant 0 : index
    %188 = vector.load %arg9[%c3_164, %c0_165, %c0_166] : memref<6x32x1xf32, #tpu.memory_space<vmem>>, vector<1x32x1xf32>
    %189 = vector.shape_cast %188 : vector<1x32x1xf32> to vector<32x1xf32>
    %190 = vector.broadcast %189 : vector<32x1xf32> to vector<32x128xf32>
    %191 = arith.addf %187, %190 : vector<32x128xf32>
    %cst_167 = arith.constant 0.000000e+00 : f32
    %192 = vector.broadcast %cst_167 : f32 to vector<32x128xf32>
    %193 = arith.maximumf %191, %192 : vector<32x128xf32>
    %c3_168 = arith.constant 3 : index
    %c0_169 = arith.constant 0 : index
    %c0_170 = arith.constant 0 : index
    %194 = vector.load %arg10[%c3_168, %c0_169, %c0_170] : memref<6x10x32xf32, #tpu.memory_space<vmem>>, vector<1x10x32xf32>
    %195 = vector.shape_cast %194 : vector<1x10x32xf32> to vector<10x32xf32>
    %cst_171 = arith.constant dense<0.000000e+00> : vector<10x128xf32>
    %196 = tpu.matmul %195, %193, %cst_171 {dimension_numbers = #tpu.dot_dimension_numbers<[1], [0], [0], [1], [0, 0, 1, 1], [], []>} : vector<10x32xf32>, vector<32x128xf32>, vector<10x128xf32> -> vector<10x128xf32>
    %c3_172 = arith.constant 3 : index
    %c0_173 = arith.constant 0 : index
    %c0_174 = arith.constant 0 : index
    %197 = vector.load %arg11[%c3_172, %c0_173, %c0_174] : memref<6x10x1xf32, #tpu.memory_space<vmem>>, vector<1x10x1xf32>
    %198 = vector.shape_cast %197 : vector<1x10x1xf32> to vector<10x1xf32>
    %199 = vector.broadcast %198 : vector<10x1xf32> to vector<10x128xf32>
    %200 = arith.addf %196, %199 : vector<10x128xf32>
    %201 = arith.subf %149, %200 : vector<10x128xf32>
    %c3_175 = arith.constant 3 : index
    %c0_176 = arith.constant 0 : index
    %c0_177 = arith.constant 0 : index
    %202 = vector.load %arg12[%c3_175, %c0_176, %c0_177] : memref<6x5x32xf32, #tpu.memory_space<vmem>>, vector<1x5x32xf32>
    %203 = vector.shape_cast %202 : vector<1x5x32xf32> to vector<5x32xf32>
    %cst_178 = arith.constant dense<0.000000e+00> : vector<5x128xf32>
    %204 = tpu.matmul %203, %193, %cst_178 {dimension_numbers = #tpu.dot_dimension_numbers<[1], [0], [0], [1], [0, 0, 1, 1], [], []>} : vector<5x32xf32>, vector<32x128xf32>, vector<5x128xf32> -> vector<5x128xf32>
    %c3_179 = arith.constant 3 : index
    %c0_180 = arith.constant 0 : index
    %c0_181 = arith.constant 0 : index
    %205 = vector.load %arg13[%c3_179, %c0_180, %c0_181] : memref<6x5x1xf32, #tpu.memory_space<vmem>>, vector<1x5x1xf32>
    %206 = vector.shape_cast %205 : vector<1x5x1xf32> to vector<5x1xf32>
    %207 = vector.broadcast %206 : vector<5x1xf32> to vector<5x128xf32>
    %208 = arith.addf %204, %207 : vector<5x128xf32>
    %209 = arith.addf %157, %208 : vector<5x128xf32>
    %c4 = arith.constant 4 : index
    %c0_182 = arith.constant 0 : index
    %c0_183 = arith.constant 0 : index
    %210 = vector.load %arg2[%c4, %c0_182, %c0_183] : memref<6x32x10xf32, #tpu.memory_space<vmem>>, vector<1x32x10xf32>
    %211 = vector.shape_cast %210 : vector<1x32x10xf32> to vector<32x10xf32>
    %cst_184 = arith.constant dense<0.000000e+00> : vector<32x128xf32>
    %212 = tpu.matmul %211, %201, %cst_184 {dimension_numbers = #tpu.dot_dimension_numbers<[1], [0], [0], [1], [0, 0, 1, 1], [], []>} : vector<32x10xf32>, vector<10x128xf32>, vector<32x128xf32> -> vector<32x128xf32>
    %c4_185 = arith.constant 4 : index
    %c0_186 = arith.constant 0 : index
    %c0_187 = arith.constant 0 : index
    %213 = vector.load %arg3[%c4_185, %c0_186, %c0_187] : memref<6x32x1xf32, #tpu.memory_space<vmem>>, vector<1x32x1xf32>
    %214 = vector.shape_cast %213 : vector<1x32x1xf32> to vector<32x1xf32>
    %215 = vector.broadcast %214 : vector<32x1xf32> to vector<32x128xf32>
    %216 = arith.addf %212, %215 : vector<32x128xf32>
    %cst_188 = arith.constant 0.000000e+00 : f32
    %217 = vector.broadcast %cst_188 : f32 to vector<32x128xf32>
    %218 = arith.maximumf %216, %217 : vector<32x128xf32>
    %c4_189 = arith.constant 4 : index
    %c0_190 = arith.constant 0 : index
    %c0_191 = arith.constant 0 : index
    %219 = vector.load %arg4[%c4_189, %c0_190, %c0_191] : memref<6x32x32xf32, #tpu.memory_space<vmem>>, vector<1x32x32xf32>
    %220 = vector.shape_cast %219 : vector<1x32x32xf32> to vector<32x32xf32>
    %cst_192 = arith.constant dense<0.000000e+00> : vector<32x128xf32>
    %221 = tpu.matmul %220, %218, %cst_192 {dimension_numbers = #tpu.dot_dimension_numbers<[1], [0], [0], [1], [0, 0, 1, 1], [], []>} : vector<32x32xf32>, vector<32x128xf32>, vector<32x128xf32> -> vector<32x128xf32>
    %c4_193 = arith.constant 4 : index
    %c0_194 = arith.constant 0 : index
    %c0_195 = arith.constant 0 : index
    %222 = vector.load %arg5[%c4_193, %c0_194, %c0_195] : memref<6x32x1xf32, #tpu.memory_space<vmem>>, vector<1x32x1xf32>
    %223 = vector.shape_cast %222 : vector<1x32x1xf32> to vector<32x1xf32>
    %224 = vector.broadcast %223 : vector<32x1xf32> to vector<32x128xf32>
    %225 = arith.addf %221, %224 : vector<32x128xf32>
    %cst_196 = arith.constant 0.000000e+00 : f32
    %226 = vector.broadcast %cst_196 : f32 to vector<32x128xf32>
    %227 = arith.maximumf %225, %226 : vector<32x128xf32>
    %c4_197 = arith.constant 4 : index
    %c0_198 = arith.constant 0 : index
    %c0_199 = arith.constant 0 : index
    %228 = vector.load %arg6[%c4_197, %c0_198, %c0_199] : memref<6x32x32xf32, #tpu.memory_space<vmem>>, vector<1x32x32xf32>
    %229 = vector.shape_cast %228 : vector<1x32x32xf32> to vector<32x32xf32>
    %cst_200 = arith.constant dense<0.000000e+00> : vector<32x128xf32>
    %230 = tpu.matmul %229, %227, %cst_200 {dimension_numbers = #tpu.dot_dimension_numbers<[1], [0], [0], [1], [0, 0, 1, 1], [], []>} : vector<32x32xf32>, vector<32x128xf32>, vector<32x128xf32> -> vector<32x128xf32>
    %c4_201 = arith.constant 4 : index
    %c0_202 = arith.constant 0 : index
    %c0_203 = arith.constant 0 : index
    %231 = vector.load %arg7[%c4_201, %c0_202, %c0_203] : memref<6x32x1xf32, #tpu.memory_space<vmem>>, vector<1x32x1xf32>
    %232 = vector.shape_cast %231 : vector<1x32x1xf32> to vector<32x1xf32>
    %233 = vector.broadcast %232 : vector<32x1xf32> to vector<32x128xf32>
    %234 = arith.addf %230, %233 : vector<32x128xf32>
    %cst_204 = arith.constant 0.000000e+00 : f32
    %235 = vector.broadcast %cst_204 : f32 to vector<32x128xf32>
    %236 = arith.maximumf %234, %235 : vector<32x128xf32>
    %c4_205 = arith.constant 4 : index
    %c0_206 = arith.constant 0 : index
    %c0_207 = arith.constant 0 : index
    %237 = vector.load %arg8[%c4_205, %c0_206, %c0_207] : memref<6x32x32xf32, #tpu.memory_space<vmem>>, vector<1x32x32xf32>
    %238 = vector.shape_cast %237 : vector<1x32x32xf32> to vector<32x32xf32>
    %cst_208 = arith.constant dense<0.000000e+00> : vector<32x128xf32>
    %239 = tpu.matmul %238, %236, %cst_208 {dimension_numbers = #tpu.dot_dimension_numbers<[1], [0], [0], [1], [0, 0, 1, 1], [], []>} : vector<32x32xf32>, vector<32x128xf32>, vector<32x128xf32> -> vector<32x128xf32>
    %c4_209 = arith.constant 4 : index
    %c0_210 = arith.constant 0 : index
    %c0_211 = arith.constant 0 : index
    %240 = vector.load %arg9[%c4_209, %c0_210, %c0_211] : memref<6x32x1xf32, #tpu.memory_space<vmem>>, vector<1x32x1xf32>
    %241 = vector.shape_cast %240 : vector<1x32x1xf32> to vector<32x1xf32>
    %242 = vector.broadcast %241 : vector<32x1xf32> to vector<32x128xf32>
    %243 = arith.addf %239, %242 : vector<32x128xf32>
    %cst_212 = arith.constant 0.000000e+00 : f32
    %244 = vector.broadcast %cst_212 : f32 to vector<32x128xf32>
    %245 = arith.maximumf %243, %244 : vector<32x128xf32>
    %c4_213 = arith.constant 4 : index
    %c0_214 = arith.constant 0 : index
    %c0_215 = arith.constant 0 : index
    %246 = vector.load %arg10[%c4_213, %c0_214, %c0_215] : memref<6x10x32xf32, #tpu.memory_space<vmem>>, vector<1x10x32xf32>
    %247 = vector.shape_cast %246 : vector<1x10x32xf32> to vector<10x32xf32>
    %cst_216 = arith.constant dense<0.000000e+00> : vector<10x128xf32>
    %248 = tpu.matmul %247, %245, %cst_216 {dimension_numbers = #tpu.dot_dimension_numbers<[1], [0], [0], [1], [0, 0, 1, 1], [], []>} : vector<10x32xf32>, vector<32x128xf32>, vector<10x128xf32> -> vector<10x128xf32>
    %c4_217 = arith.constant 4 : index
    %c0_218 = arith.constant 0 : index
    %c0_219 = arith.constant 0 : index
    %249 = vector.load %arg11[%c4_217, %c0_218, %c0_219] : memref<6x10x1xf32, #tpu.memory_space<vmem>>, vector<1x10x1xf32>
    %250 = vector.shape_cast %249 : vector<1x10x1xf32> to vector<10x1xf32>
    %251 = vector.broadcast %250 : vector<10x1xf32> to vector<10x128xf32>
    %252 = arith.addf %248, %251 : vector<10x128xf32>
    %253 = arith.subf %201, %252 : vector<10x128xf32>
    %c4_220 = arith.constant 4 : index
    %c0_221 = arith.constant 0 : index
    %c0_222 = arith.constant 0 : index
    %254 = vector.load %arg12[%c4_220, %c0_221, %c0_222] : memref<6x5x32xf32, #tpu.memory_space<vmem>>, vector<1x5x32xf32>
    %255 = vector.shape_cast %254 : vector<1x5x32xf32> to vector<5x32xf32>
    %cst_223 = arith.constant dense<0.000000e+00> : vector<5x128xf32>
    %256 = tpu.matmul %255, %245, %cst_223 {dimension_numbers = #tpu.dot_dimension_numbers<[1], [0], [0], [1], [0, 0, 1, 1], [], []>} : vector<5x32xf32>, vector<32x128xf32>, vector<5x128xf32> -> vector<5x128xf32>
    %c4_224 = arith.constant 4 : index
    %c0_225 = arith.constant 0 : index
    %c0_226 = arith.constant 0 : index
    %257 = vector.load %arg13[%c4_224, %c0_225, %c0_226] : memref<6x5x1xf32, #tpu.memory_space<vmem>>, vector<1x5x1xf32>
    %258 = vector.shape_cast %257 : vector<1x5x1xf32> to vector<5x1xf32>
    %259 = vector.broadcast %258 : vector<5x1xf32> to vector<5x128xf32>
    %260 = arith.addf %256, %259 : vector<5x128xf32>
    %261 = arith.addf %209, %260 : vector<5x128xf32>
    %c5 = arith.constant 5 : index
    %c0_227 = arith.constant 0 : index
    %c0_228 = arith.constant 0 : index
    %262 = vector.load %arg2[%c5, %c0_227, %c0_228] : memref<6x32x10xf32, #tpu.memory_space<vmem>>, vector<1x32x10xf32>
    %263 = vector.shape_cast %262 : vector<1x32x10xf32> to vector<32x10xf32>
    %cst_229 = arith.constant dense<0.000000e+00> : vector<32x128xf32>
    %264 = tpu.matmul %263, %253, %cst_229 {dimension_numbers = #tpu.dot_dimension_numbers<[1], [0], [0], [1], [0, 0, 1, 1], [], []>} : vector<32x10xf32>, vector<10x128xf32>, vector<32x128xf32> -> vector<32x128xf32>
    %c5_230 = arith.constant 5 : index
    %c0_231 = arith.constant 0 : index
    %c0_232 = arith.constant 0 : index
    %265 = vector.load %arg3[%c5_230, %c0_231, %c0_232] : memref<6x32x1xf32, #tpu.memory_space<vmem>>, vector<1x32x1xf32>
    %266 = vector.shape_cast %265 : vector<1x32x1xf32> to vector<32x1xf32>
    %267 = vector.broadcast %266 : vector<32x1xf32> to vector<32x128xf32>
    %268 = arith.addf %264, %267 : vector<32x128xf32>
    %cst_233 = arith.constant 0.000000e+00 : f32
    %269 = vector.broadcast %cst_233 : f32 to vector<32x128xf32>
    %270 = arith.maximumf %268, %269 : vector<32x128xf32>
    %c5_234 = arith.constant 5 : index
    %c0_235 = arith.constant 0 : index
    %c0_236 = arith.constant 0 : index
    %271 = vector.load %arg4[%c5_234, %c0_235, %c0_236] : memref<6x32x32xf32, #tpu.memory_space<vmem>>, vector<1x32x32xf32>
    %272 = vector.shape_cast %271 : vector<1x32x32xf32> to vector<32x32xf32>
    %cst_237 = arith.constant dense<0.000000e+00> : vector<32x128xf32>
    %273 = tpu.matmul %272, %270, %cst_237 {dimension_numbers = #tpu.dot_dimension_numbers<[1], [0], [0], [1], [0, 0, 1, 1], [], []>} : vector<32x32xf32>, vector<32x128xf32>, vector<32x128xf32> -> vector<32x128xf32>
    %c5_238 = arith.constant 5 : index
    %c0_239 = arith.constant 0 : index
    %c0_240 = arith.constant 0 : index
    %274 = vector.load %arg5[%c5_238, %c0_239, %c0_240] : memref<6x32x1xf32, #tpu.memory_space<vmem>>, vector<1x32x1xf32>
    %275 = vector.shape_cast %274 : vector<1x32x1xf32> to vector<32x1xf32>
    %276 = vector.broadcast %275 : vector<32x1xf32> to vector<32x128xf32>
    %277 = arith.addf %273, %276 : vector<32x128xf32>
    %cst_241 = arith.constant 0.000000e+00 : f32
    %278 = vector.broadcast %cst_241 : f32 to vector<32x128xf32>
    %279 = arith.maximumf %277, %278 : vector<32x128xf32>
    %c5_242 = arith.constant 5 : index
    %c0_243 = arith.constant 0 : index
    %c0_244 = arith.constant 0 : index
    %280 = vector.load %arg6[%c5_242, %c0_243, %c0_244] : memref<6x32x32xf32, #tpu.memory_space<vmem>>, vector<1x32x32xf32>
    %281 = vector.shape_cast %280 : vector<1x32x32xf32> to vector<32x32xf32>
    %cst_245 = arith.constant dense<0.000000e+00> : vector<32x128xf32>
    %282 = tpu.matmul %281, %279, %cst_245 {dimension_numbers = #tpu.dot_dimension_numbers<[1], [0], [0], [1], [0, 0, 1, 1], [], []>} : vector<32x32xf32>, vector<32x128xf32>, vector<32x128xf32> -> vector<32x128xf32>
    %c5_246 = arith.constant 5 : index
    %c0_247 = arith.constant 0 : index
    %c0_248 = arith.constant 0 : index
    %283 = vector.load %arg7[%c5_246, %c0_247, %c0_248] : memref<6x32x1xf32, #tpu.memory_space<vmem>>, vector<1x32x1xf32>
    %284 = vector.shape_cast %283 : vector<1x32x1xf32> to vector<32x1xf32>
    %285 = vector.broadcast %284 : vector<32x1xf32> to vector<32x128xf32>
    %286 = arith.addf %282, %285 : vector<32x128xf32>
    %cst_249 = arith.constant 0.000000e+00 : f32
    %287 = vector.broadcast %cst_249 : f32 to vector<32x128xf32>
    %288 = arith.maximumf %286, %287 : vector<32x128xf32>
    %c5_250 = arith.constant 5 : index
    %c0_251 = arith.constant 0 : index
    %c0_252 = arith.constant 0 : index
    %289 = vector.load %arg8[%c5_250, %c0_251, %c0_252] : memref<6x32x32xf32, #tpu.memory_space<vmem>>, vector<1x32x32xf32>
    %290 = vector.shape_cast %289 : vector<1x32x32xf32> to vector<32x32xf32>
    %cst_253 = arith.constant dense<0.000000e+00> : vector<32x128xf32>
    %291 = tpu.matmul %290, %288, %cst_253 {dimension_numbers = #tpu.dot_dimension_numbers<[1], [0], [0], [1], [0, 0, 1, 1], [], []>} : vector<32x32xf32>, vector<32x128xf32>, vector<32x128xf32> -> vector<32x128xf32>
    %c5_254 = arith.constant 5 : index
    %c0_255 = arith.constant 0 : index
    %c0_256 = arith.constant 0 : index
    %292 = vector.load %arg9[%c5_254, %c0_255, %c0_256] : memref<6x32x1xf32, #tpu.memory_space<vmem>>, vector<1x32x1xf32>
    %293 = vector.shape_cast %292 : vector<1x32x1xf32> to vector<32x1xf32>
    %294 = vector.broadcast %293 : vector<32x1xf32> to vector<32x128xf32>
    %295 = arith.addf %291, %294 : vector<32x128xf32>
    %cst_257 = arith.constant 0.000000e+00 : f32
    %296 = vector.broadcast %cst_257 : f32 to vector<32x128xf32>
    %297 = arith.maximumf %295, %296 : vector<32x128xf32>
    %c5_258 = arith.constant 5 : index
    %c0_259 = arith.constant 0 : index
    %c0_260 = arith.constant 0 : index
    %298 = vector.load %arg10[%c5_258, %c0_259, %c0_260] : memref<6x10x32xf32, #tpu.memory_space<vmem>>, vector<1x10x32xf32>
    %299 = vector.shape_cast %298 : vector<1x10x32xf32> to vector<10x32xf32>
    %cst_261 = arith.constant dense<0.000000e+00> : vector<10x128xf32>
    %300 = tpu.matmul %299, %297, %cst_261 {dimension_numbers = #tpu.dot_dimension_numbers<[1], [0], [0], [1], [0, 0, 1, 1], [], []>} : vector<10x32xf32>, vector<32x128xf32>, vector<10x128xf32> -> vector<10x128xf32>
    %c5_262 = arith.constant 5 : index
    %c0_263 = arith.constant 0 : index
    %c0_264 = arith.constant 0 : index
    %301 = vector.load %arg11[%c5_262, %c0_263, %c0_264] : memref<6x10x1xf32, #tpu.memory_space<vmem>>, vector<1x10x1xf32>
    %302 = vector.shape_cast %301 : vector<1x10x1xf32> to vector<10x1xf32>
    %303 = vector.broadcast %302 : vector<10x1xf32> to vector<10x128xf32>
    %304 = arith.addf %300, %303 : vector<10x128xf32>
    %305 = arith.subf %253, %304 : vector<10x128xf32>
    %c5_265 = arith.constant 5 : index
    %c0_266 = arith.constant 0 : index
    %c0_267 = arith.constant 0 : index
    %306 = vector.load %arg12[%c5_265, %c0_266, %c0_267] : memref<6x5x32xf32, #tpu.memory_space<vmem>>, vector<1x5x32xf32>
    %307 = vector.shape_cast %306 : vector<1x5x32xf32> to vector<5x32xf32>
    %cst_268 = arith.constant dense<0.000000e+00> : vector<5x128xf32>
    %308 = tpu.matmul %307, %297, %cst_268 {dimension_numbers = #tpu.dot_dimension_numbers<[1], [0], [0], [1], [0, 0, 1, 1], [], []>} : vector<5x32xf32>, vector<32x128xf32>, vector<5x128xf32> -> vector<5x128xf32>
    %c5_269 = arith.constant 5 : index
    %c0_270 = arith.constant 0 : index
    %c0_271 = arith.constant 0 : index
    %309 = vector.load %arg13[%c5_269, %c0_270, %c0_271] : memref<6x5x1xf32, #tpu.memory_space<vmem>>, vector<1x5x1xf32>
    %310 = vector.shape_cast %309 : vector<1x5x1xf32> to vector<5x1xf32>
    %311 = vector.broadcast %310 : vector<5x1xf32> to vector<5x128xf32>
    %312 = arith.addf %308, %311 : vector<5x128xf32>
    %313 = arith.addf %261, %312 : vector<5x128xf32>
    %c0_272 = arith.constant 0 : index
    %c0_273 = arith.constant 0 : index
    %314 = vector.load %arg14[%c0_272, %c0_273] : memref<10x128xf32, #tpu.memory_space<vmem>>, vector<10x128xf32>
    tpu.vector_store %arg14[%c0_272, %c0_273], %305 {strides = array<i32>} : memref<10x128xf32, #tpu.memory_space<vmem>>, vector<10x128xf32>,
    %c0_274 = arith.constant 0 : index
    %c0_275 = arith.constant 0 : index
    %315 = vector.load %arg15[%c0_274, %c0_275] : memref<5x128xf32, #tpu.memory_space<vmem>>, vector<5x128xf32>
    tpu.vector_store %arg15[%c0_274, %c0_275], %313 {strides = array<i32>} : memref<5x128xf32, #tpu.memory_space<vmem>>, vector<5x128xf32>,
    return
  }
  func.func @transform_0(%arg0: i32) -> (i32, i32) {
    %c0_i32 = arith.constant 0 : i32
    %c0_i32_0 = arith.constant 0 : i32
    return %c0_i32, %arg0 : i32, i32
  }
  func.func @transform_1(%arg0: i32) -> (i32, i32, i32) {
    %c0_i32 = arith.constant 0 : i32
    %c0_i32_0 = arith.constant 0 : i32
    %c0_i32_1 = arith.constant 0 : i32
    %c0_i32_2 = arith.constant 0 : i32
    return %c0_i32, %c0_i32_0, %c0_i32_1 : i32, i32, i32
  }
  func.func @transform_2(%arg0: i32) -> (i32, i32, i32) {
    %c0_i32 = arith.constant 0 : i32
    %c0_i32_0 = arith.constant 0 : i32
    %c0_i32_1 = arith.constant 0 : i32
    %c0_i32_2 = arith.constant 0 : i32
    return %c0_i32, %c0_i32_0, %c0_i32_1 : i32, i32, i32
  }
  func.func @transform_3(%arg0: i32) -> (i32, i32, i32) {
    %c0_i32 = arith.constant 0 : i32
    %c0_i32_0 = arith.constant 0 : i32
    %c0_i32_1 = arith.constant 0 : i32
    %c0_i32_2 = arith.constant 0 : i32
    return %c0_i32, %c0_i32_0, %c0_i32_1 : i32, i32, i32
  }
  func.func @transform_4(%arg0: i32) -> (i32, i32, i32) {
    %c0_i32 = arith.constant 0 : i32
    %c0_i32_0 = arith.constant 0 : i32
    %c0_i32_1 = arith.constant 0 : i32
    %c0_i32_2 = arith.constant 0 : i32
    return %c0_i32, %c0_i32_0, %c0_i32_1 : i32, i32, i32
  }
  func.func @transform_5(%arg0: i32) -> (i32, i32, i32) {
    %c0_i32 = arith.constant 0 : i32
    %c0_i32_0 = arith.constant 0 : i32
    %c0_i32_1 = arith.constant 0 : i32
    %c0_i32_2 = arith.constant 0 : i32
    return %c0_i32, %c0_i32_0, %c0_i32_1 : i32, i32, i32
  }
  func.func @transform_6(%arg0: i32) -> (i32, i32, i32) {
    %c0_i32 = arith.constant 0 : i32
    %c0_i32_0 = arith.constant 0 : i32
    %c0_i32_1 = arith.constant 0 : i32
    %c0_i32_2 = arith.constant 0 : i32
    return %c0_i32, %c0_i32_0, %c0_i32_1 : i32, i32, i32
  }
  func.func @transform_7(%arg0: i32) -> (i32, i32, i32) {
    %c0_i32 = arith.constant 0 : i32
    %c0_i32_0 = arith.constant 0 : i32
    %c0_i32_1 = arith.constant 0 : i32
    %c0_i32_2 = arith.constant 0 : i32
    return %c0_i32, %c0_i32_0, %c0_i32_1 : i32, i32, i32
  }
  func.func @transform_8(%arg0: i32) -> (i32, i32, i32) {
    %c0_i32 = arith.constant 0 : i32
    %c0_i32_0 = arith.constant 0 : i32
    %c0_i32_1 = arith.constant 0 : i32
    %c0_i32_2 = arith.constant 0 : i32
    return %c0_i32, %c0_i32_0, %c0_i32_1 : i32, i32, i32
  }
  func.func @transform_9(%arg0: i32) -> (i32, i32, i32) {
    %c0_i32 = arith.constant 0 : i32
    %c0_i32_0 = arith.constant 0 : i32
    %c0_i32_1 = arith.constant 0 : i32
    %c0_i32_2 = arith.constant 0 : i32
    return %c0_i32, %c0_i32_0, %c0_i32_1 : i32, i32, i32
  }
  func.func @transform_10(%arg0: i32) -> (i32, i32, i32) {
    %c0_i32 = arith.constant 0 : i32
    %c0_i32_0 = arith.constant 0 : i32
    %c0_i32_1 = arith.constant 0 : i32
    %c0_i32_2 = arith.constant 0 : i32
    return %c0_i32, %c0_i32_0, %c0_i32_1 : i32, i32, i32
  }
  func.func @transform_11(%arg0: i32) -> (i32, i32, i32) {
    %c0_i32 = arith.constant 0 : i32
    %c0_i32_0 = arith.constant 0 : i32
    %c0_i32_1 = arith.constant 0 : i32
    %c0_i32_2 = arith.constant 0 : i32
    return %c0_i32, %c0_i32_0, %c0_i32_1 : i32, i32, i32
  }
  func.func @transform_12(%arg0: i32) -> (i32, i32, i32) {
    %c0_i32 = arith.constant 0 : i32
    %c0_i32_0 = arith.constant 0 : i32
    %c0_i32_1 = arith.constant 0 : i32
    %c0_i32_2 = arith.constant 0 : i32
    return %c0_i32, %c0_i32_0, %c0_i32_1 : i32, i32, i32
  }
  func.func @transform_13(%arg0: i32) -> (i32, i32) {
    %c0_i32 = arith.constant 0 : i32
    %c0_i32_0 = arith.constant 0 : i32
    return %c0_i32, %arg0 : i32, i32
  }
  func.func @transform_14(%arg0: i32) -> (i32, i32) {
    %c0_i32 = arith.constant 0 : i32
    %c0_i32_0 = arith.constant 0 : i32
    return %c0_i32, %arg0 : i32, i32
  }
}

</mosaic_0001>

<bundles_post_ra>
// kernel: tpu_custom_call.1
= control target key start
LH: loop header
LB: loop body
LE: loop exit
PB: predicated region body
PF: predicated region fallthrough
CT: control target
= control target key end

     0   :  { %20 = vsyncpa [#allocation3], 0  ;;  %vm91_vm0 = vcmask 1041408   ;;  %v5381_v3 = vmov 0   ;;  %vm78_vm1 = vcmask 80896   ;;  %s6642_s0 = inlined_call_operand.vmem [shape: f32[10,128], index: 0, kind: input, shape index: {}]   ;;  %s6643_s1 = inlined_call_operand.vmem [shape: f32[6,32,10], index: 1, kind: input, shape index: {}]   ;;  %s6644_s2 = inlined_call_operand.vmem [shape: f32[6,32,1], index: 2, kind: input, shape index: {}]   ;;  %s6645_s3 = inlined_call_operand.vmem [shape: f32[6,32,32], index: 3, kind: input, shape index: {}]   ;;  %s6646_s4 = inlined_call_operand.vmem [shape: f32[6,32,1], index: 4, kind: input, shape index: {}]   ;;  %s6647_s5 = inlined_call_operand.vmem [shape: f32[6,32,32], index: 5, kind: input, shape index: {}]   ;;  %s6648_s6 = inlined_call_operand.vmem [shape: f32[6,32,1], index: 6, kind: input, shape index: {}]   ;;  %s6649_s7 = inlined_call_operand.vmem [shape: f32[6,32,32], index: 7, kind: input, shape index: {}]   ;;  %s6650_s8 = inlined_call_operand.vmem [shape: f32[6,32,1], index: 8, kind: input, shape index: {}]   ;;  %s6651_s9 = inlined_call_operand.vmem [shape: f32[6,10,32], index: 9, kind: input, shape index: {}]   ;;  %s6652_s10 = inlined_call_operand.vmem [shape: f32[6,10,1], index: 10, kind: input, shape index: {}]   ;;  %s6653_s11 = inlined_call_operand.vmem [shape: f32[6,5,32], index: 11, kind: input, shape index: {}]   ;;  %s6654_s12 = inlined_call_operand.vmem [shape: f32[6,5,1], index: 12, kind: input, shape index: {}]   ;;  %s6655_s13 = inlined_call_operand.hbm [shape: f32[10,128], index: 13, kind: output, shape index: {0}]   ;;  %s6656_s14 = inlined_call_operand.hbm [shape: f32[5,128], index: 14, kind: output, shape index: {1}]  }
   0x1   :  { %v5466_v0 = vld [vmem:[%s6642_s0 + $0x8] sm:$0x3]  ;;  %v57_v1 = vld [vmem:[%s6644_s2 + $0x18] sm:$0xff]  ;;  %5336 = vset.pattern.permute.xlu1 %v5381_v3  ;;  %5335 = vset.pattern.permute.xlu0 %v5381_v3  ;;  %v5477_v4 = vld [vmem:[%s6642_s0] sm:$0xff] }
   0x2   :  { %v55_v2 = vld [vmem:[%s6644_s2 + $0x8] sm:$0xff]  ;;  %v50_v5 = vld [vmem:[%s6643_s1] sm:$0xff]  ;;  %4884 = vmatprep.subr.msk.mxu1 %vm91_vm0, %v5466_v0  ;;  %75 = vperm.xlu0 %5335, %v57_v1   ;;  %v56_v7 = vld [vmem:[%s6644_s2 + $0x10] sm:$0xff] }
   0x3   :  { %65 = vperm.xlu1 %5336, %v55_v2   ;;  %4885 = vmatpush3.msk.msra.mxu1 %vm91_vm0, %v5466_v0  ;;  %v51_v6 = vld [vmem:[%s6643_s1 + $0x8] sm:$0xff]  ;;  %v54_v8 = vld [vmem:[%s6644_s2] sm:$0xff]  ;;  %v52_v9 = vld [vmem:[%s6643_s1 + $0x10] sm:$0xff] }
   0x4   :  { %4886 = vmatprep.subr.mxu1 %v5477_v4  ;;  %4888 = vmatprep.mubr.msk.f32.mxu1 %vm78_vm1, %v50_v5  ;;  %v53_v10 = vld [vmem:[%s6643_s1 + $0x18] sm:$0xff]  ;;  %v190_v12 = vld [vmem:[%s6646_s4 + $0x10] sm:$0xff]  ;;  %v189_v13 = vld [vmem:[%s6646_s4 + $0x8] sm:$0xff] }
   0x5   :  { %4887 = vmatpush3.msra.mxu1 %v5477_v4  ;;  %v191_v11 = vld [vmem:[%s6646_s4 + $0x18] sm:$0xff]  ;;  %v188_v14 = vld [vmem:[%s6646_s4] sm:$0xff]  ;;  %v320_v16 = vld [vmem:[%s6648_s6 + $0x10] sm:$0xff] }
   0x6   :  { %4889 = vmatmul.mubr.msk.f32.vlgmr.msra.gmra.mxu1 %vm78_vm1, %v51_v6  ;;  %70 = vperm.xlu0 %5335, %v56_v7   ;;  %v321_v15 = vld [vmem:[%s6648_s6 + $0x18] sm:$0xff]  ;;  %v319_v17 = vld [vmem:[%s6648_s6 + $0x8] sm:$0xff]  ;;  %v318_v18 = vld [vmem:[%s6648_s6] sm:$0xff] }
   0x7   :  { %60 = vperm.xlu1 %5336, %v54_v8   ;;  %4891 = vmatprep.mubr.msk.f32.mxu1 %vm78_vm1, %v52_v9  ;;  %v450_v19 = vld [vmem:[%s6650_s8 + $0x18] sm:$0xff]  ;;  %v449_v20 = vld [vmem:[%s6650_s8 + $0x10] sm:$0xff]  ;;  %v448_v21 = vld [vmem:[%s6650_s8 + $0x8] sm:$0xff] }
   0x8   :  { %v447_v22 = vld [vmem:[%s6650_s8] sm:$0xff] }
   0xa   :  { %4892 = vmatmul.mubr.msk.f32.gmra.mxu1 %vm78_vm1, %v53_v10  ;;  %209 = vperm.xlu0 %5335, %v191_v11  }
   0xb   :  { %204 = vperm.xlu1 %5336, %v190_v12  }
   0xe   :  { %199 = vperm.xlu0 %5335, %v189_v13  }
   0xf   :  { %194 = vperm.xlu1 %5336, %v188_v14  }
  0x12   :  { %339 = vperm.xlu0 %5335, %v321_v15  }
  0x13   :  { %334 = vperm.xlu1 %5336, %v320_v16  }
  0x16   :  { %329 = vperm.xlu0 %5335, %v319_v17  }
  0x17   :  { %324 = vperm.xlu1 %5336, %v318_v18  }
  0x1a   :  { %468 = vperm.xlu0 %5335, %v450_v19  }
  0x1b   :  { %463 = vperm.xlu1 %5336, %v449_v20  }
  0x1c   :  { %21 = vsyncpa [#allocation5], 0  ;;  %v575_v23 = vld [vmem:[%s6652_s10 + $0x8] sm:$0x3]  ;;  %v574_v24 = vld [vmem:[%s6652_s10] sm:$0xff]  ;;  %vm212_vm2 = vcmask 261120  }
  0x1d   :  { %v4355_v25 = vld [vmem:[%s6644_s2 + $0x38] sm:$0xff]  ;;  %v4354_v26 = vld [vmem:[%s6644_s2 + $0x30] sm:$0xff]  ;;  %v4353_v27 = vld [vmem:[%s6644_s2 + $0x28] sm:$0xff]  ;;  %vm5383_vm3 = vmmov 0   ;;  %s5384_s16 = smov [#allocation4]  }
  0x1e   :  { %458 = vperm.xlu0 %5335, %v448_v21   ;;  %v4352_v28 = vld [vmem:[%s6644_s2 + $0x20] sm:$0xff]  ;;  %v4368_v29 = vld [vmem:[%s6646_s4 + $0x38] sm:$0xff]  ;;  %v4367_v30 = vld [vmem:[%s6646_s4 + $0x30] sm:$0xff] }
  0x1f   :  { %453 = vperm.xlu1 %5336, %v447_v22   ;;  %v4366_v31 = vld [vmem:[%s6646_s4 + $0x28] sm:$0xff]  ;;  %v4365_v32 = vld [vmem:[%s6646_s4 + $0x20] sm:$0xff]  ;;  %v4380_v33 = vld [vmem:[%s6648_s6 + $0x38] sm:$0xff] }
  0x20   :  { %v4379_v34 = vld [vmem:[%s6648_s6 + $0x30] sm:$0xff]  ;;  %v4378_v35 = vld [vmem:[%s6648_s6 + $0x28] sm:$0xff]  ;;  %v4377_v36 = vld [vmem:[%s6648_s6 + $0x20] sm:$0xff] }
  0x21   :  { %v4392_v37 = vld [vmem:[%s6650_s8 + $0x38] sm:$0xff]  ;;  %v4391_v38 = vld [vmem:[%s6650_s8 + $0x30] sm:$0xff]  ;;  %v4390_v39 = vld [vmem:[%s6650_s8 + $0x28] sm:$0xff] }
  0x22   :  { %583 = vperm.xlu0 %5335, %v575_v23   ;;  %v4389_v40 = vld [vmem:[%s6650_s8 + $0x20] sm:$0xff]  ;;  %v4400_v41 = vld [vmem:[%s6652_s10 + $0x18] sm:$0x3]  ;;  %v4399_v42 = vld [vmem:[%s6652_s10 + $0x10] sm:$0xff] }
  0x23   :  { %578 = vperm.xlu1 %5336, %v574_v24   ;;  %v4413_v43 = vld [vmem:[%s6644_s2 + $0x58] sm:$0xff]  ;;  %v4412_v44 = vld [vmem:[%s6644_s2 + $0x50] sm:$0xff]  ;;  %v4411_v45 = vld [vmem:[%s6644_s2 + $0x48] sm:$0xff] }
  0x24   :  { %v4410_v46 = vld [vmem:[%s6644_s2 + $0x40] sm:$0xff]  ;;  %v4426_v47 = vld [vmem:[%s6646_s4 + $0x58] sm:$0xff]  ;;  %v4425_v48 = vld [vmem:[%s6646_s4 + $0x50] sm:$0xff] }
  0x25   :  { %v4424_v49 = vld [vmem:[%s6646_s4 + $0x48] sm:$0xff]  ;;  %v4423_v50 = vld [vmem:[%s6646_s4 + $0x40] sm:$0xff]  ;;  %v4438_v52 = vld [vmem:[%s6648_s6 + $0x58] sm:$0xff] }
  0x26   :  { %777 = vperm.xlu0 %5335, %v4355_v25   ;;  %v184_v51 = vld [vmem:[%s6645_s3] sm:$0xff]  ;;  %v4437_v53 = vld [vmem:[%s6648_s6 + $0x50] sm:$0xff]  ;;  %v4436_v54 = vld [vmem:[%s6648_s6 + $0x48] sm:$0xff] }
  0x27   :  { %772 = vperm.xlu1 %5336, %v4354_v26   ;;  %4902 = vmatprep.mubr.msk.f32.mxu1 %vm212_vm2, %v184_v51  ;;  %v4435_v55 = vld [vmem:[%s6648_s6 + $0x40] sm:$0xff]  ;;  %v4450_v56 = vld [vmem:[%s6650_s8 + $0x58] sm:$0xff]  ;;  %v4449_v57 = vld [vmem:[%s6650_s8 + $0x50] sm:$0xff] }
  0x28   :  { %v4448_v58 = vld [vmem:[%s6650_s8 + $0x48] sm:$0xff]  ;;  %v4447_v59 = vld [vmem:[%s6650_s8 + $0x40] sm:$0xff]  ;;  %v4471_v62 = vld [vmem:[%s6644_s2 + $0x78] sm:$0xff] }
  0x29   :  { %v4458_v60 = vld [vmem:[%s6652_s10 + $0x28] sm:$0x3]  ;;  %v4457_v61 = vld [vmem:[%s6652_s10 + $0x20] sm:$0xff]  ;;  %v4470_v63 = vld [vmem:[%s6644_s2 + $0x70] sm:$0xff] }
  0x2a   :  { %767 = vperm.xlu0 %5335, %v4353_v27   ;;  %v4469_v1 = vld [vmem:[%s6644_s2 + $0x68] sm:$0xff]  ;;  %v4468_v2 = vld [vmem:[%s6644_s2 + $0x60] sm:$0xff]  ;;  %v4484_v3 = vld [vmem:[%s6646_s4 + $0x78] sm:$0xff] }
  0x2b   :  { %762 = vperm.xlu1 %5336, %v4352_v28   ;;  %v4483_v5 = vld [vmem:[%s6646_s4 + $0x70] sm:$0xff]  ;;  %v4482_v6 = vld [vmem:[%s6646_s4 + $0x68] sm:$0xff]  ;;  %v4481_v7 = vld [vmem:[%s6646_s4 + $0x60] sm:$0xff] }
  0x2c   :  { %v4496_v8 = vld [vmem:[%s6648_s6 + $0x78] sm:$0xff]  ;;  %v4495_v9 = vld [vmem:[%s6648_s6 + $0x70] sm:$0xff]  ;;  %v4494_v10 = vld [vmem:[%s6648_s6 + $0x68] sm:$0xff] }
  0x2d   :  { %v4493_v11 = vld [vmem:[%s6648_s6 + $0x60] sm:$0xff]  ;;  %v4508_v12 = vld [vmem:[%s6650_s8 + $0x78] sm:$0xff]  ;;  %v4507_v13 = vld [vmem:[%s6650_s8 + $0x70] sm:$0xff] }
  0x2e   :  { %911 = vperm.xlu0 %5335, %v4368_v29   ;;  %v4506_v14 = vld [vmem:[%s6650_s8 + $0x68] sm:$0xff]  ;;  %v4505_v15 = vld [vmem:[%s6650_s8 + $0x60] sm:$0xff]  ;;  %v4516_v16 = vld [vmem:[%s6652_s10 + $0x38] sm:$0x3] }
  0x2f   :  { %906 = vperm.xlu1 %5336, %v4367_v30   ;;  %v4515_v17 = vld [vmem:[%s6652_s10 + $0x30] sm:$0xff]  ;;  %v4529_v18 = vld [vmem:[%s6644_s2 + $0x98] sm:$0xff]  ;;  %v4527_v20 = vld [vmem:[%s6644_s2 + $0x88] sm:$0xff] }
  0x30   :  { %v4528_v19 = vld [vmem:[%s6644_s2 + $0x90] sm:$0xff]  ;;  %v4526_v21 = vld [vmem:[%s6644_s2 + $0x80] sm:$0xff]  ;;  %v4542_v22 = vld [vmem:[%s6646_s4 + $0x98] sm:$0xff] }
  0x31   :  { %v4541_v23 = vld [vmem:[%s6646_s4 + $0x90] sm:$0xff]  ;;  %v4540_v24 = vld [vmem:[%s6646_s4 + $0x88] sm:$0xff]  ;;  %v4539_v25 = vld [vmem:[%s6646_s4 + $0x80] sm:$0xff] }
  0x32   :  { %901 = vperm.xlu0 %5335, %v4366_v31   ;;  %v4554_v26 = vld [vmem:[%s6648_s6 + $0x98] sm:$0xff]  ;;  %v4553_v27 = vld [vmem:[%s6648_s6 + $0x90] sm:$0xff]  ;;  %v4552_v28 = vld [vmem:[%s6648_s6 + $0x88] sm:$0xff] }
  0x33   :  { %896 = vperm.xlu1 %5336, %v4365_v32   ;;  %v4551_v29 = vld [vmem:[%s6648_s6 + $0x80] sm:$0xff]  ;;  %v4566_v30 = vld [vmem:[%s6650_s8 + $0x98] sm:$0xff]  ;;  %v4565_v31 = vld [vmem:[%s6650_s8 + $0x90] sm:$0xff] }
  0x34   :  { %v4564_v32 = vld [vmem:[%s6650_s8 + $0x88] sm:$0xff] }
  0x36   :  { %1042 = vperm.xlu0 %5335, %v4380_v33   ;;  %v4563_v33 = vld [vmem:[%s6650_s8 + $0x80] sm:$0xff] }
  0x37   :  { %1037 = vperm.xlu1 %5336, %v4379_v34   ;;  %v4574_v34 = vld [vmem:[%s6652_s10 + $0x48] sm:$0x3] }
  0x3a   :  { %1032 = vperm.xlu0 %5335, %v4378_v35   ;;  %v4573_v35 = vld [vmem:[%s6652_s10 + $0x40] sm:$0xff] }
  0x3b   :  { %1027 = vperm.xlu1 %5336, %v4377_v36   ;;  %v4587_v36 = vld [vmem:[%s6644_s2 + $0xb8] sm:$0xff] }
  0x3e   :  { %1173 = vperm.xlu0 %5335, %v4392_v37   ;;  %v4586_v37 = vld [vmem:[%s6644_s2 + $0xb0] sm:$0xff] }
  0x3f   :  { %1168 = vperm.xlu1 %5336, %v4391_v38   ;;  %v4585_v38 = vld [vmem:[%s6644_s2 + $0xa8] sm:$0xff] }
  0x42   :  { %1163 = vperm.xlu0 %5335, %v4390_v39  }
  0x43   :  { %1158 = vperm.xlu1 %5336, %v4389_v40   ;;  %v4584_v40 = vld [vmem:[%s6644_s2 + $0xa0] sm:$0xff]  ;;  %s4316_s2 = sshll.u32 %s5384_s16, 4  ;;  %s4317_s2 = int_to_ptr.vmem [resolvable:$true] %s4316_s2 }
  0x44   :  { %p5342_p1 = scmp.lt.s32.totalorder %s4317_s2, %s4317_s2 }
  0x46   :  { %1290 = vperm.xlu0 %5335, %v4400_v41  }
  0x47   :  { %1285 = vperm.xlu1 %5336, %v4399_v42   ;;  %v4600_v42 = vld [vmem:[%s6646_s4 + $0xb8] sm:$0xff] }
  0x4a   :  { %1486 = vperm.xlu0 %5335, %v4413_v43   ;;  %v4599_v43 = vld [vmem:[%s6646_s4 + $0xb0] sm:$0xff] }
  0x4b   :  { %1481 = vperm.xlu1 %5336, %v4412_v44  }
  0x4e   :  { %1476 = vperm.xlu0 %5335, %v4411_v45  }
  0x4f   :  { %1471 = vperm.xlu1 %5336, %v4410_v46   ;;  %v4598_v46 = vld [vmem:[%s6646_s4 + $0xa8] sm:$0xff] }
  0x52   :  { %1620 = vperm.xlu0 %5335, %v4426_v47   ;;  %v4597_v47 = vld [vmem:[%s6646_s4 + $0xa0] sm:$0xff] }
  0x53   :  { %1615 = vperm.xlu1 %5336, %v4425_v48   ;;  %v4612_v48 = vld [vmem:[%s6648_s6 + $0xb8] sm:$0xff] }
  0x56   :  { %1610 = vperm.xlu0 %5335, %v4424_v49  }
  0x57   :  { %1605 = vperm.xlu1 %5336, %v4423_v50   ;;  %v4611_v50 = vld [vmem:[%s6648_s6 + $0xb0] sm:$0xff] }
  0x5a   :  { %1751 = vperm.xlu0 %5335, %v4438_v52  }
  0x5b   :  { %1746 = vperm.xlu1 %5336, %v4437_v53   ;;  %v4610_v53 = vld [vmem:[%s6648_s6 + $0xa8] sm:$0xff] }
  0x5e   :  { %1741 = vperm.xlu0 %5335, %v4436_v54  }
  0x5f   :  { %1736 = vperm.xlu1 %5336, %v4435_v55   ;;  %v4609_v55 = vld [vmem:[%s6648_s6 + $0xa0] sm:$0xff] }
  0x62   :  { %1882 = vperm.xlu0 %5335, %v4450_v56  }
  0x63   :  { %1877 = vperm.xlu1 %5336, %v4449_v57  }
  0x66   :  { %1872 = vperm.xlu0 %5335, %v4448_v58  }
  0x67   :  { %1867 = vperm.xlu1 %5336, %v4447_v59  }
  0x6a   :  { %1999 = vperm.xlu0 %5335, %v4458_v60   ;;  %v4624_v60 = vld [vmem:[%s6650_s8 + $0xb8] sm:$0xff] }
  0x6b   :  { %1994 = vperm.xlu1 %5336, %v4457_v61  }
  0x6e   :  { %2195 = vperm.xlu0 %5335, %v4471_v62   ;;  %v4623_v62 = vld [vmem:[%s6650_s8 + $0xb0] sm:$0xff] }
  0x6f   :  { %2190 = vperm.xlu1 %5336, %v4470_v63  }
  0x72   :  { %2185 = vperm.xlu0 %5335, %v4469_v1  }
  0x73   :  { %2180 = vperm.xlu1 %5336, %v4468_v2  }
  0x76   :  { %2329 = vperm.xlu0 %5335, %v4484_v3  }
  0x77   :  { %2324 = vperm.xlu1 %5336, %v4483_v5  }
  0x7a   :  { %2319 = vperm.xlu0 %5335, %v4482_v6   ;;  %v4622_v6 = vld [vmem:[%s6650_s8 + $0xa8] sm:$0xff] }
  0x7b   :  { %2314 = vperm.xlu1 %5336, %v4481_v7  }
  0x7d   :  { %v76_v39 = vpop.permute.xlu0 %75 }
  0x7e   :  { %2460 = vperm.xlu0 %5335, %v4496_v8   ;;  %v66_v41 = vpop.permute.xlu1 %65  ;;  %v4621_v8 = vld [vmem:[%s6650_s8 + $0xa0] sm:$0xff] }
  0x7f   :  { %2455 = vperm.xlu1 %5336, %v4495_v9  }
  0x81   :  { %v71_v44 = vpop.permute.xlu0 %70 }
  0x82   :  { %2450 = vperm.xlu0 %5335, %v4494_v10   ;;  %v61_v45 = vpop.permute.xlu1 %60 }
  0x83   :  { %2445 = vperm.xlu1 %5336, %v4493_v11  }
  0x85   :  { %v5796_v49 = vpop.permute.xlu0 %209 }
  0x86   :  { %2591 = vperm.xlu0 %5335, %v4508_v12   ;;  %v5801_v51 = vpop.permute.xlu1 %204  ;;  %v670_v12 = vld [vmem:[%s6654_s12] sm:$0x1f] }
  0x87   :  { %2586 = vperm.xlu1 %5336, %v4507_v13   ;;  %v4404_v13 = vld [vmem:[%s6654_s12 + $0x8] sm:$0x1f] }
  0x89   :  { %v5809_v56 = vpop.permute.xlu0 %199 }
  0x8a   :  { %2581 = vperm.xlu0 %5335, %v4506_v14   ;;  %v5811_v58 = vpop.permute.xlu1 %194  ;;  %v185_v14 = vld [vmem:[%s6645_s3 + $0x8] sm:$0xff] }
  0x8b   :  { %2576 = vperm.xlu1 %5336, %v4505_v15   ;;  %v186_v15 = vld [vmem:[%s6645_s3 + $0x10] sm:$0xff] }
  0x8d   :  { %v5822_v7 = vpop.permute.xlu0 %339 }
  0x8e   :  { %2708 = vperm.xlu0 %5335, %v4516_v16   ;;  %v5827_v9 = vpop.permute.xlu1 %334 }
  0x8f   :  { %2703 = vperm.xlu1 %5336, %v4515_v17  }
  0x91   :  { %v330_v16 = vpop.permute.xlu0 %329 }
  0x92   :  { %2904 = vperm.xlu0 %5335, %v4529_v18   ;;  %v325_v17 = vpop.permute.xlu1 %324  ;;  %v4462_v18 = vld [vmem:[%s6654_s12 + $0x10] sm:$0x1f] }
  0x93   :  { %2899 = vperm.xlu1 %5336, %v4528_v19   ;;  %v4520_v19 = vld [vmem:[%s6654_s12 + $0x18] sm:$0x1f] }
  0x96   :  { %2894 = vperm.xlu0 %5335, %v4527_v20   ;;  %v187_v20 = vld [vmem:[%s6645_s3 + $0x18] sm:$0xff] }
  0x97   :  { %2889 = vperm.xlu1 %5336, %v4526_v21   ;;  %v4578_v21 = vld [vmem:[%s6654_s12 + $0x20] sm:$0x1f] }
  0x9a   :  { %3038 = vperm.xlu0 %5335, %v4542_v22   ;;  %v5856_v22 = vpop.permute.xlu0 %468 }
  0x9b   :  { %3033 = vperm.xlu1 %5336, %v4541_v23   ;;  %v4631_v23 = vld [vmem:[%s6652_s10 + $0x50] sm:$0xff] }
  0x9e   :  { %3028 = vperm.xlu0 %5335, %v4540_v24   ;;  %v5861_v24 = vpop.permute.xlu1 %463 }
  0x9f   :  { %3023 = vperm.xlu1 %5336, %v4539_v25   ;;  %v4632_v25 = vld [vmem:[%s6652_s10 + $0x58] sm:$0x3] }
  0xa2   :  { %3169 = vperm.xlu0 %5335, %v4554_v26   ;;  %v4636_v26 = vld [vmem:[%s6654_s12 + $0x28] sm:$0x1f] }
  0xa3   :  { %3164 = vperm.xlu1 %5336, %v4553_v27   ;;  %v5869_v27 = vpop.permute.xlu0 %458 }
  0xa6   :  { %3159 = vperm.xlu0 %5335, %v4552_v28   ;;  %v5871_v28 = vpop.permute.xlu1 %453 }
  0xa7   :  { %3154 = vperm.xlu1 %5336, %v4551_v29   ;;  %v314_v29 = vld [vmem:[%s6647_s5] sm:$0xff] }
  0xa8   :  { %4916 = vmatprep.mubr.msk.f32.mxu0 %vm212_vm2, %v314_v29 }
  0xaa   :  { %3300 = vperm.xlu0 %5335, %v4566_v30  }
  0xab   :  { %3295 = vperm.xlu1 %5336, %v4565_v31  }
  0xae   :  { %3290 = vperm.xlu0 %5335, %v4564_v32  }
  0xaf   :  { %3285 = vperm.xlu1 %5336, %v4563_v33  }
  0xb2   :  { %3417 = vperm.xlu0 %5335, %v4574_v34  }
  0xb3   :  { %3412 = vperm.xlu1 %5336, %v4573_v35  }
  0xb6   :  { %3613 = vperm.xlu0 %5335, %v4587_v36  }
  0xb7   :  { %3608 = vperm.xlu1 %5336, %v4586_v37  }
  0xba   :  { %3603 = vperm.xlu0 %5335, %v4585_v38  }
  0xbb   :  { %3598 = vperm.xlu1 %5336, %v4584_v40  }
  0xbe   :  { %3747 = vperm.xlu0 %5335, %v4600_v42   ;;  %v315_v42 = vld [vmem:[%s6647_s5 + $0x8] sm:$0xff] }
  0xbf   :  { %3742 = vperm.xlu1 %5336, %v4599_v43   ;;  %v316_v43 = vld [vmem:[%s6647_s5 + $0x10] sm:$0xff] }
  0xc2   :  { %3737 = vperm.xlu0 %5335, %v4598_v46  }
  0xc3   :  { %3732 = vperm.xlu1 %5336, %v4597_v47  }
  0xc6   :  { %v4890_v52 = vpop.f32.mrf.mxu1  ;;  %3878 = vperm.xlu0 %5335, %v4612_v48  }
  0xc7   :  { %3873 = vperm.xlu1 %5336, %v4611_v50   ;;  %v167_v63 = vadd.f32 %v4890_v52, %v66_v41 }
  0xc8   :  { %v161_v54 = vpop.f32.mrf.mxu1 }
  0xc9   :  { %v162_v3 = vadd.f32 %v161_v54, %v61_v45  ;;  %v181_v10 = vmax.f32 %v167_v63, 0.0  ;;  %v443_v45 = vld [vmem:[%s6649_s7] sm:$0xff] }
  0xca   :  { %v4893_v57 = vpop.f32.mrf.mxu1  ;;  %3868 = vperm.xlu0 %5335, %v4610_v53  }
  0xcb   :  { %v177_v59 = vadd.f32 %v4893_v57, %v76_v39  ;;  %3863 = vperm.xlu1 %5336, %v4609_v55   ;;  %v180_v11 = vmax.f32 %v162_v3, 0.0 }
  0xcc   :  { %v171_v61 = vpop.f32.mrf.mxu1 }
  0xcd   :  { %v183_v1 = vmax.f32 %v177_v59, 0.0  ;;  %v172_v2 = vadd.f32 %v171_v61, %v71_v44  ;;  %v317_v44 = vld [vmem:[%s6647_s5 + $0x18] sm:$0xff]  ;;  %v445_v59 = vld [vmem:[%s6649_s7 + $0x10] sm:$0xff]  ;;  %v6657_v61 = vmov 0.0  }
  0xce   :  { %4009 = vperm.xlu0 %5335, %v4624_v60   ;;  %v446_v60 = vld [vmem:[%s6649_s7 + $0x18] sm:$0xff] }
  0xcf   :  { %v182_v5 = vmax.f32 %v172_v2, 0.0  ;;  %4004 = vperm.xlu1 %5336, %v4623_v62   ;;  %4894 = vmatprep.subr.mxu1 %v183_v1  ;;  %v572_v62 = vld [vmem:[%s6651_s9] sm:$0xff] }
  0xd0   :  { %4895 = vmatpush3.msra.mxu1 %v183_v1 }
  0xd1   :  { %4896 = vmatprep.subr.mxu1 %v182_v5 }
  0xd2   :  { %4897 = vmatpush3.msra.mxu1 %v182_v5  ;;  %3999 = vperm.xlu0 %5335, %v4622_v6  }
  0xd3   :  { %3994 = vperm.xlu1 %5336, %v4621_v8   ;;  %4898 = vmatprep.subr.mxu1 %v181_v10 }
  0xd4   :  { %4899 = vmatpush3.msra.mxu1 %v181_v10 }
  0xd5   :  { %4900 = vmatprep.subr.mxu1 %v180_v11 }
  0xd6   :  { %4901 = vmatpush3.msra.mxu1 %v180_v11  ;;  %673 = vperm.xlu0 %5335, %v670_v12  }
  0xd7   :  { %1382 = vperm.xlu1 %5336, %v4404_v13   ;;  %4903 = vmatmul.mubr.msk.f32.vlgmr.msra.gmra.mxu1 %vm212_vm2, %v185_v14  ;;  %v669_v13 = vld [vmem:[%s6653_s11] sm:$0x1f]  ;;  %v573_v14 = vld [vmem:[%s6651_s9 + $0x8] sm:$0x3] }
  0xd8   :  { %4905 = vmatprep.mubr.msk.f32.mxu1 %vm212_vm2, %v186_v15  ;;  %v4348_v15 = vld [vmem:[%s6643_s1 + $0x20] sm:$0xff] }
  0xda   :  { %2091 = vperm.xlu0 %5335, %v4462_v18  }
  0xdb   :  { %2800 = vperm.xlu1 %5336, %v4520_v19   ;;  %4906 = vmatmul.mubr.msk.f32.gmra.mxu1 %vm212_vm2, %v187_v20 }
  0xdc   :  { %4930 = vmatprep.mubr.msk.f32.mxu1 %vm212_vm2, %v443_v45  ;;  %v4363_v45 = vld [vmem:[%s6645_s3 + $0x30] sm:$0xff] }
  0xde   :  { %3509 = vperm.xlu0 %5335, %v4578_v21   ;;  %v579_v21 = vpop.permute.xlu1 %578 }
  0xdf   :  { %4121 = vperm.xlu1 %5336, %v4631_v23  }
  0xe2   :  { %4126 = vperm.xlu0 %5335, %v4632_v25  }
  0xe3   :  { %4218 = vperm.xlu1 %5336, %v4636_v26   ;;  %v4349_v26 = vld [vmem:[%s6643_s1 + $0x28] sm:$0xff] }
 0x197   :  { %v4904_v30 = vpop.f32.mrf.mxu1 }
 0x198   :  { %v297_v35 = vadd.f32 %v4904_v30, %v5809_v56  ;;  %v773_v30 = vpop.permute.xlu1 %772 }
 0x199   :  { %v291_v31 = vpop.f32.mrf.mxu1 }
 0x19a   :  { %v292_v38 = vadd.f32 %v291_v31, %v5811_v58  ;;  %v311_v40 = vmax.f32 %v297_v35, 0.0  ;;  %v444_v58 = vld [vmem:[%s6649_s7 + $0x8] sm:$0xff] }
 0x19b   :  { %v4907_v32 = vpop.f32.mrf.mxu1 }
 0x19c   :  { %v307_v33 = vadd.f32 %v4907_v32, %v5796_v49  ;;  %v310_v41 = vmax.f32 %v292_v38, 0.0 }
 0x19d   :  { %v301_v34 = vpop.f32.mrf.mxu1 }
 0x19e   :  { %v313_v36 = vmax.f32 %v307_v33, 0.0  ;;  %v302_v37 = vadd.f32 %v301_v34, %v5801_v51 }
 0x1a0   :  { %v312_v39 = vmax.f32 %v302_v37, 0.0  ;;  %4908 = vmatprep.subr.mxu0 %v313_v36 }
 0x1a1   :  { %4909 = vmatpush3.msra.mxu0 %v313_v36 }
 0x1a2   :  { %4910 = vmatprep.subr.mxu0 %v312_v39 }
 0x1a3   :  { %4911 = vmatpush3.msra.mxu0 %v312_v39  ;;  %v763_v39 = vpop.permute.xlu1 %762 }
 0x1a4   :  { %4912 = vmatprep.subr.mxu0 %v311_v40 }
 0x1a5   :  { %4913 = vmatpush3.msra.mxu0 %v311_v40 }
 0x1a6   :  { %4914 = vmatprep.subr.mxu0 %v310_v41 }
 0x1a7   :  { %4915 = vmatpush3.msra.mxu0 %v310_v41 }
 0x1a8   :  { %4917 = vmatmul.mubr.msk.f32.vlgmr.msra.gmra.mxu0 %vm212_vm2, %v315_v42 }
 0x1a9   :  { %4919 = vmatprep.mubr.msk.f32.mxu0 %vm212_vm2, %v316_v43 }
 0x1ac   :  { %4920 = vmatmul.mubr.msk.f32.gmra.mxu0 %vm212_vm2, %v317_v44  ;;  %v4362_v44 = vld [vmem:[%s6645_s3 + $0x28] sm:$0xff] }
 0x1ad   :  { %4944 = vmatprep.mubr.msk.f32.mxu0 %vm212_vm2, %v572_v62 }
 0x268   :  { %v4918_v46 = vpop.f32.mrf.mxu0 }
 0x269   :  { %v426_v51 = vadd.f32 %v4918_v46, %v330_v16  ;;  %v4364_v46 = vld [vmem:[%s6645_s3 + $0x38] sm:$0xff] }
 0x26a   :  { %v420_v47 = vpop.f32.mrf.mxu0 }
 0x26b   :  { %v421_v54 = vadd.f32 %v420_v47, %v325_v17  ;;  %v440_v56 = vmax.f32 %v426_v51, 0.0  ;;  %v584_v17 = vpop.permute.xlu0 %583  ;;  %v4373_v47 = vld [vmem:[%s6647_s5 + $0x20] sm:$0xff] }
 0x26c   :  { %v4921_v48 = vpop.f32.mrf.mxu0 }
 0x26d   :  { %v436_v49 = vadd.f32 %v4921_v48, %v5822_v7  ;;  %v439_v57 = vmax.f32 %v421_v54, 0.0 }
 0x26e   :  { %v430_v50 = vpop.f32.mrf.mxu0 }
 0x26f   :  { %v442_v52 = vmax.f32 %v436_v49, 0.0  ;;  %v431_v53 = vadd.f32 %v430_v50, %v5827_v9  ;;  %v907_v50 = vpop.permute.xlu1 %906 }
 0x271   :  { %v441_v55 = vmax.f32 %v431_v53, 0.0  ;;  %4922 = vmatprep.subr.mxu1 %v442_v52 }
 0x272   :  { %4923 = vmatpush3.msra.mxu1 %v442_v52 }
 0x273   :  { %4924 = vmatprep.subr.mxu1 %v441_v55 }
 0x274   :  { %4925 = vmatpush3.msra.mxu1 %v441_v55 }
 0x275   :  { %4926 = vmatprep.subr.mxu1 %v440_v56 }
 0x276   :  { %4927 = vmatpush3.msra.mxu1 %v440_v56 }
 0x277   :  { %4928 = vmatprep.subr.mxu1 %v439_v57 }
 0x278   :  { %4929 = vmatpush3.msra.mxu1 %v439_v57 }
 0x279   :  { %4931 = vmatmul.mubr.msk.f32.vlgmr.msra.gmra.mxu1 %vm212_vm2, %v444_v58  ;;  %4947 = vmatprep.subr.mxu1 %v6657_v61 }
 0x27a   :  { %4933 = vmatprep.mubr.msk.f32.mxu1 %vm212_vm2, %v445_v59  ;;  %v897_v59 = vpop.permute.xlu1 %896 }
 0x27d   :  { %4934 = vmatmul.mubr.msk.f32.gmra.mxu1 %vm212_vm2, %v446_v60 }
 0x27e   :  { %4955 = vmatprep.mubr.msk.f32.mxu1 %vm5383_vm3, %v6657_v61 }
 0x339   :  { %v4932_v63 = vpop.f32.mrf.mxu1 }
 0x33a   :  { %v555_v6 = vadd.f32 %v4932_v63, %v5869_v27  ;;  %v4361_v27 = vld [vmem:[%s6645_s3 + $0x20] sm:$0xff] }
 0x33b   :  { %v549_v1 = vpop.f32.mrf.mxu1 }
 0x33c   :  { %v550_v9 = vadd.f32 %v549_v1, %v5871_v28  ;;  %v569_v11 = vmax.f32 %v555_v6, 0.0  ;;  %v778_v28 = vpop.permute.xlu0 %777  ;;  %v4385_v6 = vld [vmem:[%s6649_s7 + $0x20] sm:$0xff] }
 0x33d   :  { %v4935_v2 = vpop.f32.mrf.mxu1 }
 0x33e   :  { %v565_v3 = vadd.f32 %v4935_v2, %v5856_v22  ;;  %v568_v12 = vmax.f32 %v550_v9, 0.0  ;;  %v4374_v2 = vld [vmem:[%s6647_s5 + $0x28] sm:$0xff]  ;;  %v1038_v9 = vpop.permute.xlu1 %1037 }
 0x33f   :  { %v559_v5 = vpop.f32.mrf.mxu1 }
 0x340   :  { %v571_v7 = vmax.f32 %v565_v3, 0.0  ;;  %v560_v8 = vadd.f32 %v559_v5, %v5861_v24  ;;  %v768_v34 = vpop.permute.xlu0 %767  ;;  %v4375_v3 = vld [vmem:[%s6647_s5 + $0x30] sm:$0xff]  ;;  %v4376_v5 = vld [vmem:[%s6647_s5 + $0x38] sm:$0xff] }
 0x342   :  { %v570_v10 = vmax.f32 %v560_v8, 0.0  ;;  %4936 = vmatprep.subr.mxu0 %v571_v7  ;;  %4948 = vmatpush3.msra.mxu1 %v571_v7 }
 0x343   :  { %4937 = vmatpush3.msra.mxu0 %v571_v7  ;;  %4949 = vmatprep.subr.mxu1 %v6657_v61 }
 0x344   :  { %4938 = vmatprep.subr.mxu0 %v570_v10  ;;  %4950 = vmatpush3.msra.mxu1 %v570_v10  ;;  %v912_v48 = vpop.permute.xlu0 %911 }
 0x345   :  { %4939 = vmatpush3.msra.mxu0 %v570_v10  ;;  %4951 = vmatprep.subr.mxu1 %v6657_v61 }
 0x346   :  { %4940 = vmatprep.subr.mxu0 %v569_v11  ;;  %4952 = vmatpush3.msra.mxu1 %v569_v11 }
 0x347   :  { %4941 = vmatpush3.msra.mxu0 %v569_v11  ;;  %4953 = vmatprep.subr.mxu1 %v6657_v61 }
 0x348   :  { %4942 = vmatprep.subr.mxu0 %v568_v12  ;;  %4954 = vmatpush3.msra.mxu1 %v568_v12  ;;  %v902_v54 = vpop.permute.xlu0 %901 }
 0x349   :  { %4943 = vmatpush3.msra.mxu0 %v568_v12  ;;  %4956 = vmatmul.mubr.msk.f32.vlgmr.msra.gmra.mxu1 %vm212_vm2, %v669_v13 }
 0x34a   :  { %4945 = vmatmul.mubr.msk.f32.vlgmr.msra.gmra.mxu0 %vm212_vm2, %v573_v14  ;;  %4990 = vmatprep.mubr.msk.f32.mxu1 %vm212_vm2, %v4373_v47 }
 0x34b   :  { %4962 = vmatprep.mubr.msk.f32.mxu0 %vm78_vm1, %v4348_v15 }
 0x34c   :  { %v1043_v7 = vpop.permute.xlu0 %1042 }
 0x350   :  { %v1033_v13 = vpop.permute.xlu0 %1032 }
 0x409   :  { %v5937_v16 = vpop.f32.mrf.mxu1 }
 0x40a   :  { %v4946_v18 = vpop.f32.mrf.mxu0 }
 0x40b   :  { %v664_v19 = vadd.f32 %v4946_v18, %v584_v17  ;;  %v4957_v20 = vpop.f32.mrf.mxu1 }
 0x40c   :  { %v658_v22 = vpop.f32.mrf.mxu0 }
 0x40d   :  { %v5940_v23 = vsub.f32 %v5466_v0, %v664_v19  ;;  %v659_v24 = vadd.f32 %v658_v22, %v579_v21  ;;  %v4350_v0 = vld [vmem:[%s6643_s1 + $0x30] sm:$0xff]  ;;  %v1028_v19 = vpop.permute.xlu1 %1027 }
 0x40f   :  { %v5943_v25 = vsub.f32 %v5477_v4, %v659_v24  ;;  %4958 = vmatprep.subr.msk.mxu0 %vm91_vm0, %v5940_v23  ;;  %v4351_v4 = vld [vmem:[%s6643_s1 + $0x38] sm:$0xff] }
 0x410   :  { %4959 = vmatpush3.msk.msra.mxu0 %vm91_vm0, %v5940_v23 }
 0x411   :  { %4960 = vmatprep.subr.mxu0 %v5943_v25 }
 0x412   :  { %4961 = vmatpush3.msra.mxu0 %v5943_v25 }
 0x413   :  { %4963 = vmatmul.mubr.msk.f32.vlgmr.msra.gmra.mxu0 %vm78_vm1, %v4349_v26  ;;  %v4386_v26 = vld [vmem:[%s6649_s7 + $0x28] sm:$0xff] }
 0x414   :  { %4965 = vmatprep.mubr.msk.f32.mxu0 %vm78_vm1, %v4350_v0  ;;  %v4387_v0 = vld [vmem:[%s6649_s7 + $0x30] sm:$0xff] }
 0x417   :  { %4966 = vmatmul.mubr.msk.f32.gmra.mxu0 %vm78_vm1, %v4351_v4  ;;  %v4388_v4 = vld [vmem:[%s6649_s7 + $0x38] sm:$0xff] }
 0x418   :  { %4976 = vmatprep.mubr.msk.f32.mxu0 %vm212_vm2, %v4361_v27  ;;  %v4397_v27 = vld [vmem:[%s6651_s9 + $0x10] sm:$0xff] }
 0x4d3   :  { %v4964_v29 = vpop.f32.mrf.mxu0 }
 0x4d4   :  { %v867_v36 = vadd.f32 %v4964_v29, %v768_v34  ;;  %v1169_v29 = vpop.permute.xlu1 %1168 }
 0x4d5   :  { %v861_v31 = vpop.f32.mrf.mxu0 }
 0x4d6   :  { %v862_v40 = vadd.f32 %v861_v31, %v763_v39  ;;  %v881_v42 = vmax.f32 %v867_v36, 0.0 }
 0x4d7   :  { %v4967_v32 = vpop.f32.mrf.mxu0 }
 0x4d8   :  { %v877_v33 = vadd.f32 %v4967_v32, %v778_v28  ;;  %v880_v43 = vmax.f32 %v862_v40, 0.0  ;;  %v1174_v28 = vpop.permute.xlu0 %1173  ;;  %v1159_v31 = vpop.permute.xlu1 %1158 }
 0x4d9   :  { %v871_v35 = vpop.f32.mrf.mxu0 }
 0x4da   :  { %v883_v37 = vmax.f32 %v877_v33, 0.0  ;;  %v872_v38 = vadd.f32 %v871_v35, %v773_v30 }
 0x4dc   :  { %v882_v41 = vmax.f32 %v872_v38, 0.0  ;;  %4968 = vmatprep.subr.mxu0 %v883_v37  ;;  %v1164_v30 = vpop.permute.xlu0 %1163  ;;  %v6020_v33 = vpop.permute.xlu1 %1285 }
 0x4dd   :  { %4969 = vmatpush3.msra.mxu0 %v883_v37 }
 0x4de   :  { %4970 = vmatprep.subr.mxu0 %v882_v41 }
 0x4df   :  { %4971 = vmatpush3.msra.mxu0 %v882_v41 }
 0x4e0   :  { %4972 = vmatprep.subr.mxu0 %v881_v42  ;;  %v6018_v32 = vpop.permute.xlu0 %1290  ;;  %v6024_v35 = vpop.permute.xlu1 %1481 }
 0x4e1   :  { %4973 = vmatpush3.msra.mxu0 %v881_v42 }
 0x4e2   :  { %4974 = vmatprep.subr.mxu0 %v880_v43 }
 0x4e3   :  { %4975 = vmatpush3.msra.mxu0 %v880_v43 }
 0x4e4   :  { %4977 = vmatmul.mubr.msk.f32.vlgmr.msra.gmra.mxu0 %vm212_vm2, %v4362_v44  ;;  %v6022_v34 = vpop.permute.xlu0 %1486  ;;  %v6028_v39 = vpop.permute.xlu1 %1471 }
 0x4e5   :  { %4979 = vmatprep.mubr.msk.f32.mxu0 %vm212_vm2, %v4363_v45 }
 0x4e8   :  { %4980 = vmatmul.mubr.msk.f32.gmra.mxu0 %vm212_vm2, %v4364_v46  ;;  %v6026_v38 = vpop.permute.xlu0 %1476 }
 0x4e9   :  { %5004 = vmatprep.mubr.msk.f32.mxu0 %vm212_vm2, %v4385_v6 }
 0x4ec   :  { %v6030_v46 = vpop.permute.xlu0 %1620 }
 0x5a4   :  { %v4978_v49 = vpop.f32.mrf.mxu0 }
 0x5a5   :  { %v998_v56 = vadd.f32 %v4978_v49, %v902_v54  ;;  %v6032_v49 = vpop.permute.xlu1 %1615  ;;  %v6043_v54 = vpop.permute.xlu0 %1610 }
 0x5a6   :  { %v992_v51 = vpop.f32.mrf.mxu0 }
 0x5a7   :  { %v993_v60 = vadd.f32 %v992_v51, %v897_v59  ;;  %v1012_v63 = vmax.f32 %v998_v56, 0.0 }
 0x5a8   :  { %v4981_v52 = vpop.f32.mrf.mxu0 }
 0x5a9   :  { %v1008_v53 = vadd.f32 %v4981_v52, %v912_v48  ;;  %v1011_v1 = vmax.f32 %v993_v60, 0.0  ;;  %v4403_v52 = vld [vmem:[%s6653_s11 + $0x8] sm:$0x1f]  ;;  %v6049_v56 = vpop.permute.xlu0 %1751 }
 0x5aa   :  { %v1002_v55 = vpop.f32.mrf.mxu0 }
 0x5ab   :  { %v1014_v57 = vmax.f32 %v1008_v53, 0.0  ;;  %v1003_v58 = vadd.f32 %v1002_v55, %v907_v50  ;;  %v4398_v53 = vld [vmem:[%s6651_s9 + $0x18] sm:$0x3]  ;;  %v6045_v55 = vpop.permute.xlu1 %1605 }
 0x5ad   :  { %v1013_v62 = vmax.f32 %v1003_v58, 0.0  ;;  %4982 = vmatprep.subr.mxu1 %v1014_v57  ;;  %v6053_v58 = vpop.permute.xlu0 %1741 }
 0x5ae   :  { %4983 = vmatpush3.msra.mxu1 %v1014_v57 }
 0x5af   :  { %4984 = vmatprep.subr.mxu1 %v1013_v62  ;;  %v6051_v57 = vpop.permute.xlu1 %1746 }
 0x5b0   :  { %4985 = vmatpush3.msra.mxu1 %v1013_v62 }
 0x5b1   :  { %4986 = vmatprep.subr.mxu1 %v1012_v63  ;;  %v6057_v60 = vpop.permute.xlu0 %1882 }
 0x5b2   :  { %4987 = vmatpush3.msra.mxu1 %v1012_v63 }
 0x5b3   :  { %4988 = vmatprep.subr.mxu1 %v1011_v1  ;;  %v6055_v59 = vpop.permute.xlu1 %1736 }
 0x5b4   :  { %4989 = vmatpush3.msra.mxu1 %v1011_v1 }
 0x5b5   :  { %4991 = vmatmul.mubr.msk.f32.vlgmr.msra.gmra.mxu1 %vm212_vm2, %v4374_v2  ;;  %v6061_v63 = vpop.permute.xlu0 %1872 }
 0x5b6   :  { %4993 = vmatprep.mubr.msk.f32.mxu1 %vm212_vm2, %v4375_v3 }
 0x5b7   :  { %v6059_v62 = vpop.permute.xlu1 %1877 }
 0x5b9   :  { %4994 = vmatmul.mubr.msk.f32.gmra.mxu1 %vm212_vm2, %v4376_v5  ;;  %v6065_v2 = vpop.permute.xlu0 %1999 }
 0x5ba   :  { %5018 = vmatprep.mubr.msk.f32.mxu1 %vm212_vm2, %v4397_v27 }
 0x5bb   :  { %v6063_v1 = vpop.permute.xlu1 %1867 }
 0x5bd   :  { %v6069_v5 = vpop.permute.xlu0 %2195 }
 0x5bf   :  { %v6067_v3 = vpop.permute.xlu1 %1994 }
 0x5c3   :  { %v6071_v6 = vpop.permute.xlu1 %2190 }
 0x675   :  { %v4992_v8 = vpop.f32.mrf.mxu1 }
 0x676   :  { %v1129_v15 = vadd.f32 %v4992_v8, %v1033_v13  ;;  %v6075_v8 = vpop.permute.xlu1 %2180 }
 0x677   :  { %v1123_v10 = vpop.f32.mrf.mxu1 }
 0x678   :  { %v1124_v20 = vadd.f32 %v1123_v10, %v1028_v19  ;;  %v1143_v22 = vmax.f32 %v1129_v15, 0.0 }
 0x679   :  { %v4995_v11 = vpop.f32.mrf.mxu1 }
 0x67a   :  { %v1139_v12 = vadd.f32 %v4995_v11, %v1043_v7  ;;  %v1142_v24 = vmax.f32 %v1124_v20, 0.0  ;;  %v6073_v7 = vpop.permute.xlu0 %2185  ;;  %v6079_v10 = vpop.permute.xlu1 %2324  ;;  %v4406_v20 = vld [vmem:[%s6643_s1 + $0x40] sm:$0xff] }
 0x67b   :  { %v1133_v14 = vpop.f32.mrf.mxu1 }
 0x67c   :  { %v1145_v17 = vmax.f32 %v1139_v12, 0.0  ;;  %v1134_v18 = vadd.f32 %v1133_v14, %v1038_v9 }
 0x67e   :  { %v1144_v21 = vmax.f32 %v1134_v18, 0.0  ;;  %4996 = vmatprep.subr.mxu0 %v1145_v17  ;;  %v6077_v9 = vpop.permute.xlu0 %2329  ;;  %v6083_v12 = vpop.permute.xlu1 %2314 }
 0x67f   :  { %4997 = vmatpush3.msra.mxu0 %v1145_v17 }
 0x680   :  { %4998 = vmatprep.subr.mxu0 %v1144_v21 }
 0x681   :  { %4999 = vmatpush3.msra.mxu0 %v1144_v21 }
 0x682   :  { %5000 = vmatprep.subr.mxu0 %v1143_v22  ;;  %v6081_v11 = vpop.permute.xlu0 %2319  ;;  %v6087_v14 = vpop.permute.xlu1 %2455 }
 0x683   :  { %5001 = vmatpush3.msra.mxu0 %v1143_v22 }
 0x684   :  { %5002 = vmatprep.subr.mxu0 %v1142_v24 }
 0x685   :  { %5003 = vmatpush3.msra.mxu0 %v1142_v24 }
 0x686   :  { %5005 = vmatmul.mubr.msk.f32.vlgmr.msra.gmra.mxu0 %vm212_vm2, %v4386_v26  ;;  %5021 = vmatprep.subr.mxu0 %v6657_v61  ;;  %v6085_v13 = vpop.permute.xlu0 %2460  ;;  %v6091_v17 = vpop.permute.xlu1 %2445 }
 0x687   :  { %5007 = vmatprep.mubr.msk.f32.mxu0 %vm212_vm2, %v4387_v0 }
 0x68a   :  { %5008 = vmatmul.mubr.msk.f32.gmra.mxu0 %vm212_vm2, %v4388_v4  ;;  %v6089_v15 = vpop.permute.xlu0 %2450  ;;  %v6095_v19 = vpop.permute.xlu1 %2586 }
 0x68b   :  { %5029 = vmatprep.mubr.msk.f32.mxu0 %vm5383_vm3, %v6657_v61 }
 0x68e   :  { %v6093_v18 = vpop.permute.xlu0 %2591  ;;  %v6103_v22 = vpop.permute.xlu1 %2576 }
 0x692   :  { %v6101_v21 = vpop.permute.xlu0 %2581  ;;  %v6107_v26 = vpop.permute.xlu1 %2703 }
 0x696   :  { %v6105_v24 = vpop.permute.xlu0 %2708  ;;  %v6111_v4 = vpop.permute.xlu1 %2899 }
 0x69a   :  { %v6109_v0 = vpop.permute.xlu0 %2904 }
 0x69e   :  { %v6113_v27 = vpop.permute.xlu0 %2894 }
 0x746   :  { %v5006_v36 = vpop.f32.mrf.mxu0 }
 0x747   :  { %v1260_v43 = vadd.f32 %v5006_v36, %v1164_v30 }
 0x748   :  { %v1254_v37 = vpop.f32.mrf.mxu0 }
 0x749   :  { %v1255_v47 = vadd.f32 %v1254_v37, %v1159_v31  ;;  %v1274_v50 = vmax.f32 %v1260_v43, 0.0 }
 0x74a   :  { %v5009_v40 = vpop.f32.mrf.mxu0 }
 0x74b   :  { %v1270_v41 = vadd.f32 %v5009_v40, %v1174_v28  ;;  %v1273_v51 = vmax.f32 %v1255_v47, 0.0  ;;  %v6115_v28 = vpop.permute.xlu1 %2889 }
 0x74c   :  { %v1264_v42 = vpop.f32.mrf.mxu0 }
 0x74d   :  { %v1276_v44 = vmax.f32 %v1270_v41, 0.0  ;;  %v1265_v45 = vadd.f32 %v1264_v42, %v1169_v29  ;;  %v6117_v29 = vpop.permute.xlu0 %3038 }
 0x74f   :  { %v1275_v48 = vmax.f32 %v1265_v45, 0.0  ;;  %5010 = vmatprep.subr.mxu1 %v1276_v44  ;;  %5022 = vmatpush3.msra.mxu0 %v1276_v44  ;;  %v6119_v30 = vpop.permute.xlu1 %3033 }
 0x750   :  { %5011 = vmatpush3.msra.mxu1 %v1276_v44  ;;  %5023 = vmatprep.subr.mxu0 %v6657_v61 }
 0x751   :  { %5012 = vmatprep.subr.mxu1 %v1275_v48  ;;  %5024 = vmatpush3.msra.mxu0 %v1275_v48  ;;  %v6121_v31 = vpop.permute.xlu0 %3028 }
 0x752   :  { %5013 = vmatpush3.msra.mxu1 %v1275_v48  ;;  %5025 = vmatprep.subr.mxu0 %v6657_v61 }
 0x753   :  { %5014 = vmatprep.subr.mxu1 %v1274_v50  ;;  %5026 = vmatpush3.msra.mxu0 %v1274_v50  ;;  %v6123_v36 = vpop.permute.xlu1 %3023 }
 0x754   :  { %5015 = vmatpush3.msra.mxu1 %v1274_v50  ;;  %5027 = vmatprep.subr.mxu0 %v6657_v61 }
 0x755   :  { %5016 = vmatprep.subr.mxu1 %v1273_v51  ;;  %5028 = vmatpush3.msra.mxu0 %v1273_v51  ;;  %v6125_v37 = vpop.permute.xlu0 %3169 }
 0x756   :  { %5017 = vmatpush3.msra.mxu1 %v1273_v51  ;;  %5030 = vmatmul.mubr.msk.f32.vlgmr.msra.gmra.mxu0 %vm212_vm2, %v4403_v52 }
 0x757   :  { %5019 = vmatmul.mubr.msk.f32.vlgmr.msra.gmra.mxu1 %vm212_vm2, %v4398_v53  ;;  %v6127_v40 = vpop.permute.xlu1 %3164 }
 0x758   :  { %5036 = vmatprep.mubr.msk.f32.mxu1 %vm78_vm1, %v4406_v20  ;;  %6659 = vst [vmem:[#allocation8_spill] sm:$0xff] %v6127_v40 }
 0x759   :  { %v6129_v41 = vpop.permute.xlu0 %3159 }
 0x75a   :  { %6660 = vst [vmem:[#allocation9_spill] sm:$0xff] %v6129_v41 }
 0x75b   :  { %v6131_v42 = vpop.permute.xlu1 %3154 }
 0x75c   :  { %6661 = vst [vmem:[#allocation10_spill] sm:$0xff] %v6131_v42 }
 0x75d   :  { %v6133_v43 = vpop.permute.xlu0 %3300 }
 0x75e   :  { %6662 = vst [vmem:[#allocation11_spill] sm:$0xff] %v6133_v43 }
 0x75f   :  { %v6135_v44 = vpop.permute.xlu1 %3295 }
 0x760   :  { %6663 = vst [vmem:[#allocation12_spill] sm:$0xff] %v6135_v44 }
 0x761   :  { %v6137_v45 = vpop.permute.xlu0 %3290 }
 0x762   :  { %6664 = vst [vmem:[#allocation13_spill] sm:$0xff] %v6137_v45 }
 0x763   :  { %v6139_v47 = vpop.permute.xlu1 %3285 }
 0x764   :  { %6665 = vst [vmem:[#allocation14_spill] sm:$0xff] %v6139_v47 }
 0x765   :  { %v6141_v48 = vpop.permute.xlu0 %3417 }
 0x766   :  { %6666 = vst [vmem:[#allocation15_spill] sm:$0xff] %v6141_v48 }
 0x767   :  { %v6143_v50 = vpop.permute.xlu1 %3412 }
 0x768   :  { %6667 = vst [vmem:[#allocation16_spill] sm:$0xff] %v6143_v50 }
 0x769   :  { %v6145_v51 = vpop.permute.xlu0 %3613 }
 0x76a   :  { %6668 = vst [vmem:[#allocation17_spill] sm:$0xff] %v6145_v51 }
 0x76b   :  { %v6147_v52 = vpop.permute.xlu1 %3608 }
 0x76c   :  { %6669 = vst [vmem:[#allocation18_spill] sm:$0xff] %v6147_v52 }
 0x76d   :  { %v6149_v53 = vpop.permute.xlu0 %3603 }
 0x76e   :  { %6670 = vst [vmem:[#allocation19_spill] sm:$0xff] %v6149_v53 }
 0x76f   :  { %v6151_v20 = vpop.permute.xlu1 %3598 }
 0x770   :  { %6671 = vst [vmem:[#allocation20_spill] sm:$0xff] %v6151_v20 }
 0x771   :  { %v6153_v61 = vpop.permute.xlu0 %3747 }
 0x772   :  { %6672 = vst [vmem:[#allocation21_spill] sm:$0xff] %v6153_v61 }
 0x773   :  { %v6155_v43 = vpop.permute.xlu1 %3742 }
 0x774   :  { %6673 = vst [vmem:[#allocation22_spill] sm:$0xff] %v6155_v43 }
 0x775   :  { %v6157_v44 = vpop.permute.xlu0 %3737 }
 0x776   :  { %6674 = vst [vmem:[#allocation23_spill] sm:$0xff] %v6157_v44 }
 0x777   :  { %v6159_v45 = vpop.permute.xlu1 %3732 }
 0x778   :  { %6675 = vst [vmem:[#allocation24_spill] sm:$0xff] %v6159_v45 }
 0x779   :  { %v6161_v47 = vpop.permute.xlu0 %3878 }
 0x77a   :  { %6676 = vst [vmem:[#allocation25_spill] sm:$0xff] %v6161_v47 }
 0x77b   :  { %v6163_v48 = vpop.permute.xlu1 %3873 }
 0x77c   :  { %6677 = vst [vmem:[#allocation26_spill] sm:$0xff] %v6163_v48 }
 0x77d   :  { %v6165_v50 = vpop.permute.xlu0 %3868 }
 0x77e   :  { %6678 = vst [vmem:[#allocation27_spill] sm:$0xff] %v6165_v50 }
 0x77f   :  { %v6167_v51 = vpop.permute.xlu1 %3863 }
 0x780   :  { %6679 = vst [vmem:[#allocation28_spill] sm:$0xff] %v6167_v51 }
 0x781   :  { %v6169_v52 = vpop.permute.xlu0 %4009 }
 0x782   :  { %6680 = vst [vmem:[#allocation29_spill] sm:$0xff] %v6169_v52 }
 0x783   :  { %v6171_v53 = vpop.permute.xlu1 %4004 }
 0x784   :  { %6681 = vst [vmem:[#allocation30_spill] sm:$0xff] %v6171_v53 }
 0x785   :  { %v6173_v20 = vpop.permute.xlu0 %3999 }
 0x787   :  { %v6175_v61 = vpop.permute.xlu1 %3994 }
 0x788   :  { %6682 = vst [vmem:[#allocation31_spill] sm:$0xff] %v6175_v61 }
 0x789   :  { %v674_v43 = vpop.permute.xlu0 %673 }
 0x78a   :  { %v746_v45 = vadd.f32 %v5937_v16, %v674_v43  ;;  %v4407_v16 = vld [vmem:[%s6643_s1 + $0x48] sm:$0xff] }
 0x78b   :  { %v1383_v44 = vpop.permute.xlu1 %1382 }
 0x816   :  { %v1454_v42 = vpop.f32.mrf.mxu0 }
 0x817   :  { %v1455_v47 = vadd.f32 %v1454_v42, %v1383_v44  ;;  %v5020_v40 = vpop.f32.mrf.mxu1 }
 0x818   :  { %v1371_v48 = vadd.f32 %v5020_v40, %v6018_v32  ;;  %v5031_v50 = vpop.f32.mrf.mxu0  ;;  %v4419_v32 = vld [vmem:[%s6645_s3 + $0x40] sm:$0xff] }
 0x819   :  { %v6179_v41 = vadd.f32 %v1455_v47, %v746_v45  ;;  %v1365_v51 = vpop.f32.mrf.mxu1 }
 0x81a   :  { %v6182_v52 = vsub.f32 %v5940_v23, %v1371_v48  ;;  %v1366_v53 = vadd.f32 %v1365_v51, %v6020_v33  ;;  %v4408_v23 = vld [vmem:[%s6643_s1 + $0x50] sm:$0xff] }
 0x81c   :  { %v6186_v61 = vsub.f32 %v5943_v25, %v1366_v53  ;;  %5032 = vmatprep.subr.msk.mxu1 %vm91_vm0, %v6182_v52  ;;  %v4409_v25 = vld [vmem:[%s6643_s1 + $0x58] sm:$0xff] }
 0x81d   :  { %5033 = vmatpush3.msk.msra.mxu1 %vm91_vm0, %v6182_v52 }
 0x81e   :  { %5034 = vmatprep.subr.mxu1 %v6186_v61 }
 0x81f   :  { %5035 = vmatpush3.msra.mxu1 %v6186_v61 }
 0x820   :  { %5037 = vmatmul.mubr.msk.f32.vlgmr.msra.gmra.mxu1 %vm78_vm1, %v4407_v16 }
 0x821   :  { %5039 = vmatprep.mubr.msk.f32.mxu1 %vm78_vm1, %v4408_v23 }
 0x824   :  { %5040 = vmatmul.mubr.msk.f32.gmra.mxu1 %vm78_vm1, %v4409_v25 }
 0x825   :  { %5050 = vmatprep.mubr.msk.f32.mxu1 %vm212_vm2, %v4419_v32 }
 0x8e0   :  { %v5038_v33 = vpop.f32.mrf.mxu1 }
 0x8e1   :  { %v1576_v45 = vadd.f32 %v5038_v33, %v6026_v38  ;;  %v4422_v38 = vld [vmem:[%s6645_s3 + $0x58] sm:$0xff] }
 0x8e2   :  { %v1570_v40 = vpop.f32.mrf.mxu1 }
 0x8e3   :  { %v1571_v50 = vadd.f32 %v1570_v40, %v6028_v39  ;;  %v1590_v53 = vmax.f32 %v1576_v45, 0.0  ;;  %v4431_v39 = vld [vmem:[%s6647_s5 + $0x40] sm:$0xff] }
 0x8e4   :  { %v5041_v42 = vpop.f32.mrf.mxu1  ;;  %5064 = vmatprep.mubr.msk.f32.mxu0 %vm212_vm2, %v4431_v39 }
 0x8e5   :  { %v1586_v43 = vadd.f32 %v5041_v42, %v6022_v34  ;;  %v1589_v16 = vmax.f32 %v1571_v50, 0.0  ;;  %v4420_v34 = vld [vmem:[%s6645_s3 + $0x48] sm:$0xff] }
 0x8e6   :  { %v1580_v44 = vpop.f32.mrf.mxu1 }
 0x8e7   :  { %v1592_v47 = vmax.f32 %v1586_v43, 0.0  ;;  %v1581_v48 = vadd.f32 %v1580_v44, %v6024_v35  ;;  %v4421_v35 = vld [vmem:[%s6645_s3 + $0x50] sm:$0xff] }
 0x8e9   :  { %v1591_v51 = vmax.f32 %v1581_v48, 0.0  ;;  %5042 = vmatprep.subr.mxu1 %v1592_v47 }
 0x8ea   :  { %5043 = vmatpush3.msra.mxu1 %v1592_v47 }
 0x8eb   :  { %5044 = vmatprep.subr.mxu1 %v1591_v51 }
 0x8ec   :  { %5045 = vmatpush3.msra.mxu1 %v1591_v51 }
 0x8ed   :  { %5046 = vmatprep.subr.mxu1 %v1590_v53 }
 0x8ee   :  { %5047 = vmatpush3.msra.mxu1 %v1590_v53 }
 0x8ef   :  { %5048 = vmatprep.subr.mxu1 %v1589_v16 }
 0x8f0   :  { %5049 = vmatpush3.msra.mxu1 %v1589_v16 }
 0x8f1   :  { %5051 = vmatmul.mubr.msk.f32.vlgmr.msra.gmra.mxu1 %vm212_vm2, %v4420_v34 }
 0x8f2   :  { %5053 = vmatprep.mubr.msk.f32.mxu1 %vm212_vm2, %v4421_v35 }
 0x8f5   :  { %5054 = vmatmul.mubr.msk.f32.gmra.mxu1 %vm212_vm2, %v4422_v38 }
 0x9b1   :  { %v5052_v23 = vpop.f32.mrf.mxu1 }
 0x9b2   :  { %v1707_v42 = vadd.f32 %v5052_v23, %v6043_v54  ;;  %v4434_v54 = vld [vmem:[%s6647_s5 + $0x58] sm:$0xff] }
 0x9b3   :  { %v1701_v25 = vpop.f32.mrf.mxu1 }
 0x9b4   :  { %v1702_v45 = vadd.f32 %v1701_v25, %v6045_v55  ;;  %v1721_v48 = vmax.f32 %v1707_v42, 0.0  ;;  %v4443_v55 = vld [vmem:[%s6649_s7 + $0x40] sm:$0xff] }
 0x9b5   :  { %v5055_v32 = vpop.f32.mrf.mxu1  ;;  %5078 = vmatprep.mubr.msk.f32.mxu1 %vm212_vm2, %v4443_v55  ;;  %v4455_v42 = vld [vmem:[%s6651_s9 + $0x20] sm:$0xff] }
 0x9b6   :  { %v1717_v33 = vadd.f32 %v5055_v32, %v6030_v46  ;;  %v1720_v50 = vmax.f32 %v1702_v45, 0.0  ;;  %v4432_v46 = vld [vmem:[%s6647_s5 + $0x48] sm:$0xff] }
 0x9b7   :  { %v1711_v40 = vpop.f32.mrf.mxu1 }
 0x9b8   :  { %v1723_v43 = vmax.f32 %v1717_v33, 0.0  ;;  %v1712_v44 = vadd.f32 %v1711_v40, %v6032_v49  ;;  %v4433_v49 = vld [vmem:[%s6647_s5 + $0x50] sm:$0xff] }
 0x9ba   :  { %v1722_v47 = vmax.f32 %v1712_v44, 0.0  ;;  %5056 = vmatprep.subr.mxu0 %v1723_v43 }
 0x9bb   :  { %5057 = vmatpush3.msra.mxu0 %v1723_v43 }
 0x9bc   :  { %5058 = vmatprep.subr.mxu0 %v1722_v47 }
 0x9bd   :  { %5059 = vmatpush3.msra.mxu0 %v1722_v47 }
 0x9be   :  { %5060 = vmatprep.subr.mxu0 %v1721_v48 }
 0x9bf   :  { %5061 = vmatpush3.msra.mxu0 %v1721_v48 }
 0x9c0   :  { %5062 = vmatprep.subr.mxu0 %v1720_v50 }
 0x9c1   :  { %5063 = vmatpush3.msra.mxu0 %v1720_v50 }
 0x9c2   :  { %5065 = vmatmul.mubr.msk.f32.vlgmr.msra.gmra.mxu0 %vm212_vm2, %v4432_v46 }
 0x9c3   :  { %5067 = vmatprep.mubr.msk.f32.mxu0 %vm212_vm2, %v4433_v49 }
 0x9c6   :  { %5068 = vmatmul.mubr.msk.f32.gmra.mxu0 %vm212_vm2, %v4434_v54 }
 0x9c7   :  { %5092 = vmatprep.mubr.msk.f32.mxu0 %vm212_vm2, %v4455_v42 }
 0xa82   :  { %v5066_v51 = vpop.f32.mrf.mxu0 }
 0xa83   :  { %v1838_v38 = vadd.f32 %v5066_v51, %v6053_v58  ;;  %v6683_v58 = vmov 0.0  }
 0xa84   :  { %v1832_v53 = vpop.f32.mrf.mxu0 }
 0xa85   :  { %v1833_v25 = vadd.f32 %v1832_v53, %v6055_v59  ;;  %v1852_v33 = vmax.f32 %v1838_v38, 0.0  ;;  %v4446_v59 = vld [vmem:[%s6649_s7 + $0x58] sm:$0xff]  ;;  %v2092_v53 = vpop.permute.xlu0 %2091 }
 0xa86   :  { %v5069_v16 = vpop.f32.mrf.mxu0 }
 0xa87   :  { %v1848_v34 = vadd.f32 %v5069_v16, %v6049_v56  ;;  %v1851_v40 = vmax.f32 %v1833_v25, 0.0  ;;  %v4444_v56 = vld [vmem:[%s6649_s7 + $0x48] sm:$0xff] }
 0xa88   :  { %v1842_v35 = vpop.f32.mrf.mxu0 }
 0xa89   :  { %v1854_v39 = vmax.f32 %v1848_v34, 0.0  ;;  %v1843_v23 = vadd.f32 %v1842_v35, %v6051_v57  ;;  %v4445_v57 = vld [vmem:[%s6649_s7 + $0x50] sm:$0xff] }
 0xa8b   :  { %v1853_v32 = vmax.f32 %v1843_v23, 0.0  ;;  %5070 = vmatprep.subr.mxu1 %v1854_v39 }
 0xa8c   :  { %5071 = vmatpush3.msra.mxu1 %v1854_v39 }
 0xa8d   :  { %5072 = vmatprep.subr.mxu1 %v1853_v32 }
 0xa8e   :  { %5073 = vmatpush3.msra.mxu1 %v1853_v32 }
 0xa8f   :  { %5074 = vmatprep.subr.mxu1 %v1852_v33 }
 0xa90   :  { %5075 = vmatpush3.msra.mxu1 %v1852_v33 }
 0xa91   :  { %5076 = vmatprep.subr.mxu1 %v1851_v40 }
 0xa92   :  { %5077 = vmatpush3.msra.mxu1 %v1851_v40 }
 0xa93   :  { %5079 = vmatmul.mubr.msk.f32.vlgmr.msra.gmra.mxu1 %vm212_vm2, %v4444_v56  ;;  %5095 = vmatprep.subr.mxu1 %v6683_v58 }
 0xa94   :  { %5081 = vmatprep.mubr.msk.f32.mxu1 %vm212_vm2, %v4445_v57 }
 0xa97   :  { %5082 = vmatmul.mubr.msk.f32.gmra.mxu1 %vm212_vm2, %v4446_v59 }
 0xa98   :  { %5103 = vmatprep.mubr.msk.f32.mxu1 %vm5383_vm3, %v6683_v58 }
 0xb53   :  { %v5080_v43 = vpop.f32.mrf.mxu1 }
 0xb54   :  { %v1969_v50 = vadd.f32 %v5080_v43, %v6061_v63  ;;  %v4456_v63 = vld [vmem:[%s6651_s9 + $0x28] sm:$0x3] }
 0xb55   :  { %v1963_v44 = vpop.f32.mrf.mxu1 }
 0xb56   :  { %v1964_v54 = vadd.f32 %v1963_v44, %v6063_v1  ;;  %v1983_v51 = vmax.f32 %v1969_v50, 0.0  ;;  %v4464_v1 = vld [vmem:[%s6643_s1 + $0x60] sm:$0xff] }
 0xb57   :  { %v5083_v45 = vpop.f32.mrf.mxu1 }
 0xb58   :  { %v1979_v47 = vadd.f32 %v5083_v45, %v6057_v60  ;;  %v1982_v60 = vmax.f32 %v1964_v54, 0.0 }
 0xb59   :  { %v1973_v48 = vpop.f32.mrf.mxu1 }
 0xb5a   :  { %v1985_v46 = vmax.f32 %v1979_v47, 0.0  ;;  %v1974_v49 = vadd.f32 %v1973_v48, %v6059_v62  ;;  %v4461_v62 = vld [vmem:[%s6653_s11 + $0x10] sm:$0x1f] }
 0xb5c   :  { %v1984_v55 = vmax.f32 %v1974_v49, 0.0  ;;  %5084 = vmatprep.subr.mxu0 %v1985_v46  ;;  %5096 = vmatpush3.msra.mxu1 %v1985_v46 }
 0xb5d   :  { %5085 = vmatpush3.msra.mxu0 %v1985_v46  ;;  %5097 = vmatprep.subr.mxu1 %v6683_v58 }
 0xb5e   :  { %5086 = vmatprep.subr.mxu0 %v1984_v55  ;;  %5098 = vmatpush3.msra.mxu1 %v1984_v55 }
 0xb5f   :  { %5087 = vmatpush3.msra.mxu0 %v1984_v55  ;;  %5099 = vmatprep.subr.mxu1 %v6683_v58 }
 0xb60   :  { %5088 = vmatprep.subr.mxu0 %v1983_v51  ;;  %5100 = vmatpush3.msra.mxu1 %v1983_v51 }
 0xb61   :  { %5089 = vmatpush3.msra.mxu0 %v1983_v51  ;;  %5101 = vmatprep.subr.mxu1 %v6683_v58 }
 0xb62   :  { %5090 = vmatprep.subr.mxu0 %v1982_v60  ;;  %5102 = vmatpush3.msra.mxu1 %v1982_v60 }
 0xb63   :  { %5091 = vmatpush3.msra.mxu0 %v1982_v60  ;;  %5104 = vmatmul.mubr.msk.f32.vlgmr.msra.gmra.mxu1 %vm212_vm2, %v4461_v62 }
 0xb64   :  { %5093 = vmatmul.mubr.msk.f32.vlgmr.msra.gmra.mxu0 %vm212_vm2, %v4456_v63 }
 0xb65   :  { %5110 = vmatprep.mubr.msk.f32.mxu0 %vm78_vm1, %v4464_v1 }
 0xc23   :  { %v2163_v16 = vpop.f32.mrf.mxu1 }
 0xc24   :  { %v2164_v34 = vadd.f32 %v2163_v16, %v2092_v53  ;;  %v5094_v35 = vpop.f32.mrf.mxu0 }
 0xc25   :  { %v2080_v38 = vadd.f32 %v5094_v35, %v6065_v2  ;;  %v5105_v39 = vpop.f32.mrf.mxu1  ;;  %v4465_v2 = vld [vmem:[%s6643_s1 + $0x68] sm:$0xff] }
 0xc26   :  { %v6294_v23 = vadd.f32 %v2164_v34, %v6179_v41  ;;  %v2074_v25 = vpop.f32.mrf.mxu0  ;;  %v4466_v41 = vld [vmem:[%s6643_s1 + $0x70] sm:$0xff] }
 0xc27   :  { %v6297_v32 = vsub.f32 %v6182_v52, %v2080_v38  ;;  %v2075_v33 = vadd.f32 %v2074_v25, %v6067_v3  ;;  %v4477_v3 = vld [vmem:[%s6645_s3 + $0x60] sm:$0xff] }
 0xc29   :  { %v6301_v40 = vsub.f32 %v6186_v61, %v2075_v33  ;;  %5106 = vmatprep.subr.msk.mxu0 %vm91_vm0, %v6297_v32  ;;  %v4467_v61 = vld [vmem:[%s6643_s1 + $0x78] sm:$0xff] }
 0xc2a   :  { %5107 = vmatpush3.msk.msra.mxu0 %vm91_vm0, %v6297_v32 }
 0xc2b   :  { %5108 = vmatprep.subr.mxu0 %v6301_v40 }
 0xc2c   :  { %5109 = vmatpush3.msra.mxu0 %v6301_v40 }
 0xc2d   :  { %5111 = vmatmul.mubr.msk.f32.vlgmr.msra.gmra.mxu0 %vm78_vm1, %v4465_v2 }
 0xc2e   :  { %5113 = vmatprep.mubr.msk.f32.mxu0 %vm78_vm1, %v4466_v41 }
 0xc31   :  { %5114 = vmatmul.mubr.msk.f32.gmra.mxu0 %vm78_vm1, %v4467_v61 }
 0xc32   :  { %5124 = vmatprep.mubr.msk.f32.mxu0 %vm212_vm2, %v4477_v3 }
 0xced   :  { %v5112_v52 = vpop.f32.mrf.mxu0 }
 0xcee   :  { %v2285_v43 = vadd.f32 %v5112_v52, %v6073_v7  ;;  %v4480_v7 = vld [vmem:[%s6645_s3 + $0x78] sm:$0xff] }
 0xcef   :  { %v2279_v56 = vpop.f32.mrf.mxu0 }
 0xcf0   :  { %v2280_v47 = vadd.f32 %v2279_v56, %v6075_v8  ;;  %v2299_v50 = vmax.f32 %v2285_v43, 0.0  ;;  %v4489_v8 = vld [vmem:[%s6647_s5 + $0x60] sm:$0xff] }
 0xcf1   :  { %v5115_v57 = vpop.f32.mrf.mxu0  ;;  %5138 = vmatprep.mubr.msk.f32.mxu1 %vm212_vm2, %v4489_v8  ;;  %v2801_v8 = vpop.permute.xlu1 %2800 }
 0xcf2   :  { %v2295_v59 = vadd.f32 %v5115_v57, %v6069_v5  ;;  %v2298_v46 = vmax.f32 %v2280_v47, 0.0  ;;  %v4478_v5 = vld [vmem:[%s6645_s3 + $0x68] sm:$0xff] }
 0xcf3   :  { %v2289_v42 = vpop.f32.mrf.mxu0 }
 0xcf4   :  { %v2301_v44 = vmax.f32 %v2295_v59, 0.0  ;;  %v2290_v45 = vadd.f32 %v2289_v42, %v6071_v6  ;;  %v4479_v6 = vld [vmem:[%s6645_s3 + $0x70] sm:$0xff] }
 0xcf6   :  { %v2300_v48 = vmax.f32 %v2290_v45, 0.0  ;;  %5116 = vmatprep.subr.mxu0 %v2301_v44 }
 0xcf7   :  { %5117 = vmatpush3.msra.mxu0 %v2301_v44 }
 0xcf8   :  { %5118 = vmatprep.subr.mxu0 %v2300_v48 }
 0xcf9   :  { %5119 = vmatpush3.msra.mxu0 %v2300_v48 }
 0xcfa   :  { %5120 = vmatprep.subr.mxu0 %v2299_v50 }
 0xcfb   :  { %5121 = vmatpush3.msra.mxu0 %v2299_v50 }
 0xcfc   :  { %5122 = vmatprep.subr.mxu0 %v2298_v46 }
 0xcfd   :  { %5123 = vmatpush3.msra.mxu0 %v2298_v46 }
 0xcfe   :  { %5125 = vmatmul.mubr.msk.f32.vlgmr.msra.gmra.mxu0 %vm212_vm2, %v4478_v5 }
 0xcff   :  { %5127 = vmatprep.mubr.msk.f32.mxu0 %vm212_vm2, %v4479_v6 }
 0xd02   :  { %5128 = vmatmul.mubr.msk.f32.gmra.mxu0 %vm212_vm2, %v4480_v7 }
 0xdbe   :  { %v5126_v49 = vpop.f32.mrf.mxu0 }
 0xdbf   :  { %v2416_v62 = vadd.f32 %v5126_v49, %v6081_v11  ;;  %v4492_v11 = vld [vmem:[%s6647_s5 + $0x78] sm:$0xff] }
 0xdc0   :  { %v2410_v54 = vpop.f32.mrf.mxu0 }
 0xdc1   :  { %v2411_v53 = vadd.f32 %v2410_v54, %v6083_v12  ;;  %v2430_v34 = vmax.f32 %v2416_v62, 0.0  ;;  %v4501_v12 = vld [vmem:[%s6649_s7 + $0x60] sm:$0xff] }
 0xdc2   :  { %v5129_v55 = vpop.f32.mrf.mxu0  ;;  %5152 = vmatprep.mubr.msk.f32.mxu0 %vm212_vm2, %v4501_v12 }
 0xdc3   :  { %v2426_v51 = vadd.f32 %v5129_v55, %v6077_v9  ;;  %v2429_v35 = vmax.f32 %v2411_v53, 0.0  ;;  %v4490_v9 = vld [vmem:[%s6647_s5 + $0x68] sm:$0xff] }
 0xdc4   :  { %v2420_v60 = vpop.f32.mrf.mxu0 }
 0xdc5   :  { %v2432_v63 = vmax.f32 %v2426_v51, 0.0  ;;  %v2421_v1 = vadd.f32 %v2420_v60, %v6079_v10  ;;  %v4491_v10 = vld [vmem:[%s6647_s5 + $0x70] sm:$0xff] }
 0xdc7   :  { %v2431_v16 = vmax.f32 %v2421_v1, 0.0  ;;  %5130 = vmatprep.subr.mxu1 %v2432_v63 }
 0xdc8   :  { %5131 = vmatpush3.msra.mxu1 %v2432_v63 }
 0xdc9   :  { %5132 = vmatprep.subr.mxu1 %v2431_v16 }
 0xdca   :  { %5133 = vmatpush3.msra.mxu1 %v2431_v16 }
 0xdcb   :  { %5134 = vmatprep.subr.mxu1 %v2430_v34 }
 0xdcc   :  { %5135 = vmatpush3.msra.mxu1 %v2430_v34 }
 0xdcd   :  { %5136 = vmatprep.subr.mxu1 %v2429_v35 }
 0xdce   :  { %5137 = vmatpush3.msra.mxu1 %v2429_v35 }
 0xdcf   :  { %5139 = vmatmul.mubr.msk.f32.vlgmr.msra.gmra.mxu1 %vm212_vm2, %v4490_v9 }
 0xdd0   :  { %5141 = vmatprep.mubr.msk.f32.mxu1 %vm212_vm2, %v4491_v10 }
 0xdd3   :  { %5142 = vmatmul.mubr.msk.f32.gmra.mxu1 %vm212_vm2, %v4492_v11 }
 0xe8f   :  { %v5140_v38 = vpop.f32.mrf.mxu1 }
 0xe90   :  { %v2547_v41 = vadd.f32 %v5140_v38, %v6089_v15  ;;  %v4504_v15 = vld [vmem:[%s6649_s7 + $0x78] sm:$0xff] }
 0xe91   :  { %v2541_v39 = vpop.f32.mrf.mxu1 }
 0xe92   :  { %v2542_v52 = vadd.f32 %v2541_v39, %v6091_v17  ;;  %v2561_v57 = vmax.f32 %v2547_v41, 0.0  ;;  %v4513_v17 = vld [vmem:[%s6651_s9 + $0x30] sm:$0xff] }
 0xe93   :  { %v5143_v25 = vpop.f32.mrf.mxu1  ;;  %5166 = vmatprep.mubr.msk.f32.mxu1 %vm212_vm2, %v4513_v17 }
 0xe94   :  { %v2557_v33 = vadd.f32 %v5143_v25, %v6085_v13  ;;  %v2560_v59 = vmax.f32 %v2542_v52, 0.0  ;;  %v4502_v13 = vld [vmem:[%s6649_s7 + $0x68] sm:$0xff] }
 0xe95   :  { %v2551_v2 = vpop.f32.mrf.mxu1 }
 0xe96   :  { %v2563_v61 = vmax.f32 %v2557_v33, 0.0  ;;  %v2552_v3 = vadd.f32 %v2551_v2, %v6087_v14  ;;  %v4503_v14 = vld [vmem:[%s6649_s7 + $0x70] sm:$0xff] }
 0xe98   :  { %v2562_v56 = vmax.f32 %v2552_v3, 0.0  ;;  %5144 = vmatprep.subr.mxu0 %v2563_v61 }
 0xe99   :  { %5145 = vmatpush3.msra.mxu0 %v2563_v61 }
 0xe9a   :  { %5146 = vmatprep.subr.mxu0 %v2562_v56 }
 0xe9b   :  { %5147 = vmatpush3.msra.mxu0 %v2562_v56 }
 0xe9c   :  { %5148 = vmatprep.subr.mxu0 %v2561_v57 }
 0xe9d   :  { %5149 = vmatpush3.msra.mxu0 %v2561_v57 }
 0xe9e   :  { %5150 = vmatprep.subr.mxu0 %v2560_v59 }
 0xe9f   :  { %5151 = vmatpush3.msra.mxu0 %v2560_v59 }
 0xea0   :  { %5153 = vmatmul.mubr.msk.f32.vlgmr.msra.gmra.mxu0 %vm212_vm2, %v4502_v13  ;;  %5169 = vmatprep.subr.mxu0 %v6683_v58 }
 0xea1   :  { %5155 = vmatprep.mubr.msk.f32.mxu0 %vm212_vm2, %v4503_v14 }
 0xea4   :  { %5156 = vmatmul.mubr.msk.f32.gmra.mxu0 %vm212_vm2, %v4504_v15 }
 0xea5   :  { %5177 = vmatprep.mubr.msk.f32.mxu0 %vm5383_vm3, %v6683_v58 }
 0xf60   :  { %v5154_v42 = vpop.f32.mrf.mxu0 }
 0xf61   :  { %v2678_v48 = vadd.f32 %v5154_v42, %v6101_v21  ;;  %v4514_v21 = vld [vmem:[%s6651_s9 + $0x38] sm:$0x3] }
 0xf62   :  { %v2672_v43 = vpop.f32.mrf.mxu0 }
 0xf63   :  { %v2673_v5 = vadd.f32 %v2672_v43, %v6103_v22  ;;  %v2692_v7 = vmax.f32 %v2678_v48, 0.0  ;;  %v4522_v22 = vld [vmem:[%s6643_s1 + $0x80] sm:$0xff] }
 0xf64   :  { %v5157_v44 = vpop.f32.mrf.mxu0 }
 0xf65   :  { %v2688_v45 = vadd.f32 %v5157_v44, %v6093_v18  ;;  %v2691_v18 = vmax.f32 %v2673_v5, 0.0 }
 0xf66   :  { %v2682_v47 = vpop.f32.mrf.mxu0 }
 0xf67   :  { %v2694_v50 = vmax.f32 %v2688_v45, 0.0  ;;  %v2683_v46 = vadd.f32 %v2682_v47, %v6095_v19  ;;  %v4519_v19 = vld [vmem:[%s6653_s11 + $0x18] sm:$0x1f] }
 0xf69   :  { %v2693_v6 = vmax.f32 %v2683_v46, 0.0  ;;  %5158 = vmatprep.subr.mxu1 %v2694_v50  ;;  %5170 = vmatpush3.msra.mxu0 %v2694_v50 }
 0xf6a   :  { %5159 = vmatpush3.msra.mxu1 %v2694_v50  ;;  %5171 = vmatprep.subr.mxu0 %v6683_v58  ;;  %v6684_v50 = vld [vmem:[#allocation9_spill] sm:$0xff] }
 0xf6b   :  { %5160 = vmatprep.subr.mxu1 %v2693_v6  ;;  %5172 = vmatpush3.msra.mxu0 %v2693_v6 }
 0xf6c   :  { %5161 = vmatpush3.msra.mxu1 %v2693_v6  ;;  %5173 = vmatprep.subr.mxu0 %v6683_v58  ;;  %v6685_v6 = vld [vmem:[#allocation8_spill] sm:$0xff] }
 0xf6d   :  { %5162 = vmatprep.subr.mxu1 %v2692_v7  ;;  %5174 = vmatpush3.msra.mxu0 %v2692_v7 }
 0xf6e   :  { %5163 = vmatpush3.msra.mxu1 %v2692_v7  ;;  %5175 = vmatprep.subr.mxu0 %v6683_v58 }
 0xf6f   :  { %5164 = vmatprep.subr.mxu1 %v2691_v18  ;;  %5176 = vmatpush3.msra.mxu0 %v2691_v18 }
 0xf70   :  { %5165 = vmatpush3.msra.mxu1 %v2691_v18  ;;  %5178 = vmatmul.mubr.msk.f32.vlgmr.msra.gmra.mxu0 %vm212_vm2, %v4519_v19  ;;  %v6686_v18 = vld [vmem:[#allocation10_spill] sm:$0xff] }
 0xf71   :  { %5167 = vmatmul.mubr.msk.f32.vlgmr.msra.gmra.mxu1 %vm212_vm2, %v4514_v21 }
 0xf72   :  { %5184 = vmatprep.mubr.msk.f32.mxu1 %vm78_vm1, %v4522_v22 }
0x1030   :  { %v2872_v49 = vpop.f32.mrf.mxu0 }
0x1031   :  { %v2873_v54 = vadd.f32 %v2872_v49, %v2801_v8  ;;  %v5168_v55 = vpop.f32.mrf.mxu1  ;;  %v4561_v49 = vld [vmem:[%s6649_s7 + $0x90] sm:$0xff] }
0x1032   :  { %v2789_v51 = vadd.f32 %v5168_v55, %v6105_v24  ;;  %v5179_v60 = vpop.f32.mrf.mxu0  ;;  %v4523_v24 = vld [vmem:[%s6643_s1 + $0x88] sm:$0xff]  ;;  %v4571_v55 = vld [vmem:[%s6651_s9 + $0x40] sm:$0xff] }
0x1033   :  { %v6409_v62 = vadd.f32 %v2873_v54, %v6294_v23  ;;  %v2783_v63 = vpop.f32.mrf.mxu1  ;;  %v4524_v23 = vld [vmem:[%s6643_s1 + $0x90] sm:$0xff]  ;;  %v4562_v54 = vld [vmem:[%s6649_s7 + $0x98] sm:$0xff] }
0x1034   :  { %v6412_v1 = vsub.f32 %v6297_v32, %v2789_v51  ;;  %v2784_v53 = vadd.f32 %v2783_v63, %v6107_v26  ;;  %v4525_v26 = vld [vmem:[%s6643_s1 + $0x98] sm:$0xff]  ;;  %v4535_v32 = vld [vmem:[%s6645_s3 + $0x80] sm:$0xff] }
0x1036   :  { %v6416_v16 = vsub.f32 %v6301_v40, %v2784_v53  ;;  %5180 = vmatprep.subr.msk.mxu1 %vm91_vm0, %v6412_v1  ;;  %v6687_v53 = vld [vmem:[#allocation11_spill] sm:$0xff] }
0x1037   :  { %5181 = vmatpush3.msk.msra.mxu1 %vm91_vm0, %v6412_v1 }
0x1038   :  { %5182 = vmatprep.subr.mxu1 %v6416_v16 }
0x1039   :  { %5183 = vmatpush3.msra.mxu1 %v6416_v16 }
0x103a   :  { %5185 = vmatmul.mubr.msk.f32.vlgmr.msra.gmra.mxu1 %vm78_vm1, %v4523_v24 }
0x103b   :  { %5187 = vmatprep.mubr.msk.f32.mxu1 %vm78_vm1, %v4524_v23 }
0x103e   :  { %5188 = vmatmul.mubr.msk.f32.gmra.mxu1 %vm78_vm1, %v4525_v26  ;;  %v6688_v26 = vld [vmem:[#allocation13_spill] sm:$0xff] }
0x103f   :  { %5198 = vmatprep.mubr.msk.f32.mxu1 %vm212_vm2, %v4535_v32 }
0x10fa   :  { %v5186_v40 = vpop.f32.mrf.mxu1 }
0x10fb   :  { %v2994_v11 = vadd.f32 %v5186_v40, %v6113_v27  ;;  %v4538_v27 = vld [vmem:[%s6645_s3 + $0x98] sm:$0xff] }
0x10fc   :  { %v2988_v34 = vpop.f32.mrf.mxu1 }
0x10fd   :  { %v2989_v39 = vadd.f32 %v2988_v34, %v6115_v28  ;;  %v3008_v33 = vmax.f32 %v2994_v11, 0.0  ;;  %v4547_v28 = vld [vmem:[%s6647_s5 + $0x80] sm:$0xff]  ;;  %v6689_v34 = vld [vmem:[#allocation12_spill] sm:$0xff] }
0x10fe   :  { %v5189_v35 = vpop.f32.mrf.mxu1  ;;  %5212 = vmatprep.mubr.msk.f32.mxu0 %vm212_vm2, %v4547_v28  ;;  %v6691_v28 = vld [vmem:[#allocation15_spill] sm:$0xff] }
0x10ff   :  { %v3004_v9 = vadd.f32 %v5189_v35, %v6109_v0  ;;  %v3007_v2 = vmax.f32 %v2989_v39, 0.0  ;;  %v4536_v0 = vld [vmem:[%s6645_s3 + $0x88] sm:$0xff]  ;;  %v4577_v39 = vld [vmem:[%s6653_s11 + $0x20] sm:$0x1f] }
0x1100   :  { %v2998_v10 = vpop.f32.mrf.mxu1 }
0x1101   :  { %v3010_v12 = vmax.f32 %v3004_v9, 0.0  ;;  %v2999_v38 = vadd.f32 %v2998_v10, %v6111_v4  ;;  %v4537_v4 = vld [vmem:[%s6645_s3 + $0x90] sm:$0xff]  ;;  %v6690_v9 = vld [vmem:[#allocation14_spill] sm:$0xff] }
0x1103   :  { %v3009_v25 = vmax.f32 %v2999_v38, 0.0  ;;  %5190 = vmatprep.subr.mxu1 %v3010_v12 }
0x1104   :  { %5191 = vmatpush3.msra.mxu1 %v3010_v12 }
0x1105   :  { %5192 = vmatprep.subr.mxu1 %v3009_v25 }
0x1106   :  { %5193 = vmatpush3.msra.mxu1 %v3009_v25  ;;  %v4572_v25 = vld [vmem:[%s6651_s9 + $0x48] sm:$0x3] }
0x1107   :  { %5194 = vmatprep.subr.mxu1 %v3008_v33 }
0x1108   :  { %5195 = vmatpush3.msra.mxu1 %v3008_v33  ;;  %v4580_v33 = vld [vmem:[%s6643_s1 + $0xa0] sm:$0xff] }
0x1109   :  { %5196 = vmatprep.subr.mxu1 %v3007_v2 }
0x110a   :  { %5197 = vmatpush3.msra.mxu1 %v3007_v2  ;;  %v3510_v2 = vpop.permute.xlu0 %3509 }
0x110b   :  { %5199 = vmatmul.mubr.msk.f32.vlgmr.msra.gmra.mxu1 %vm212_vm2, %v4536_v0 }
0x110c   :  { %5201 = vmatprep.mubr.msk.f32.mxu1 %vm212_vm2, %v4537_v4 }
0x110f   :  { %5202 = vmatmul.mubr.msk.f32.gmra.mxu1 %vm212_vm2, %v4538_v27 }
0x11cb   :  { %v5200_v41 = vpop.f32.mrf.mxu1 }
0x11cc   :  { %v3125_v57 = vadd.f32 %v5200_v41, %v6121_v31  ;;  %v4550_v31 = vld [vmem:[%s6647_s5 + $0x98] sm:$0xff] }
0x11cd   :  { %v3119_v61 = vpop.f32.mrf.mxu1 }
0x11ce   :  { %v3120_v14 = vadd.f32 %v3119_v61, %v6123_v36  ;;  %v3139_v17 = vmax.f32 %v3125_v57, 0.0  ;;  %v4559_v36 = vld [vmem:[%s6649_s7 + $0x80] sm:$0xff]  ;;  %v6692_v57 = vld [vmem:[#allocation16_spill] sm:$0xff] }
0x11cf   :  { %v5203_v3 = vpop.f32.mrf.mxu1  ;;  %5226 = vmatprep.mubr.msk.f32.mxu1 %vm212_vm2, %v4559_v36  ;;  %v6694_v36 = vld [vmem:[#allocation19_spill] sm:$0xff] }
0x11d0   :  { %v3135_v52 = vadd.f32 %v5203_v3, %v6117_v29  ;;  %v3138_v42 = vmax.f32 %v3120_v14, 0.0  ;;  %v4548_v29 = vld [vmem:[%s6647_s5 + $0x88] sm:$0xff]  ;;  %v4593_v14 = vld [vmem:[%s6645_s3 + $0xa0] sm:$0xff] }
0x11d1   :  { %v3129_v56 = vpop.f32.mrf.mxu1 }
0x11d2   :  { %v3141_v59 = vmax.f32 %v3135_v52, 0.0  ;;  %v3130_v13 = vadd.f32 %v3129_v56, %v6119_v30  ;;  %v4549_v30 = vld [vmem:[%s6647_s5 + $0x90] sm:$0xff] }
0x11d4   :  { %v3140_v15 = vmax.f32 %v3130_v13, 0.0  ;;  %5204 = vmatprep.subr.mxu0 %v3141_v59 }
0x11d5   :  { %5205 = vmatpush3.msra.mxu0 %v3141_v59 }
0x11d6   :  { %5206 = vmatprep.subr.mxu0 %v3140_v15 }
0x11d7   :  { %5207 = vmatpush3.msra.mxu0 %v3140_v15 }
0x11d8   :  { %5208 = vmatprep.subr.mxu0 %v3139_v17 }
0x11d9   :  { %5209 = vmatpush3.msra.mxu0 %v3139_v17 }
0x11da   :  { %5210 = vmatprep.subr.mxu0 %v3138_v42 }
0x11db   :  { %5211 = vmatpush3.msra.mxu0 %v3138_v42 }
0x11dc   :  { %5213 = vmatmul.mubr.msk.f32.vlgmr.msra.gmra.mxu0 %vm212_vm2, %v4548_v29  ;;  %v6693_v29 = vld [vmem:[#allocation17_spill] sm:$0xff] }
0x11dd   :  { %5215 = vmatprep.mubr.msk.f32.mxu0 %vm212_vm2, %v4549_v30 }
0x11e0   :  { %5216 = vmatmul.mubr.msk.f32.gmra.mxu0 %vm212_vm2, %v4550_v31 }
0x11e1   :  { %5240 = vmatprep.mubr.msk.f32.mxu0 %vm212_vm2, %v4571_v55 }
0x129c   :  { %v5214_v43 = vpop.f32.mrf.mxu0 }
0x129d   :  { %v3256_v46 = vadd.f32 %v5214_v43, %v6684_v50 }
0x129e   :  { %v3250_v44 = vpop.f32.mrf.mxu0 }
0x129f   :  { %v3251_v19 = vadd.f32 %v3250_v44, %v6686_v18  ;;  %v3270_v22 = vmax.f32 %v3256_v46, 0.0  ;;  %v4595_v18 = vld [vmem:[%s6645_s3 + $0xb0] sm:$0xff] }
0x12a0   :  { %v5217_v45 = vpop.f32.mrf.mxu0 }
0x12a1   :  { %v3266_v47 = vadd.f32 %v5217_v45, %v6125_v37  ;;  %v3269_v8 = vmax.f32 %v3251_v19, 0.0  ;;  %v4560_v37 = vld [vmem:[%s6649_s7 + $0x88] sm:$0xff]  ;;  %v4596_v19 = vld [vmem:[%s6645_s3 + $0xb8] sm:$0xff] }
0x12a2   :  { %v3260_v48 = vpop.f32.mrf.mxu0  ;;  %v6695_v45 = vld [vmem:[#allocation18_spill] sm:$0xff] }
0x12a3   :  { %v3272_v5 = vmax.f32 %v3266_v47, 0.0  ;;  %v3261_v7 = vadd.f32 %v3260_v48, %v6685_v6  ;;  %v6696_v48 = vld [vmem:[#allocation20_spill] sm:$0xff] }
0x12a5   :  { %v3271_v21 = vmax.f32 %v3261_v7, 0.0  ;;  %5218 = vmatprep.subr.mxu1 %v3272_v5  ;;  %v4594_v7 = vld [vmem:[%s6645_s3 + $0xa8] sm:$0xff] }
0x12a6   :  { %5219 = vmatpush3.msra.mxu1 %v3272_v5 }
0x12a7   :  { %5220 = vmatprep.subr.mxu1 %v3271_v21 }
0x12a8   :  { %5221 = vmatpush3.msra.mxu1 %v3271_v21  ;;  %v4605_v21 = vld [vmem:[%s6647_s5 + $0xa0] sm:$0xff] }
0x12a9   :  { %5222 = vmatprep.subr.mxu1 %v3270_v22 }
0x12aa   :  { %5223 = vmatpush3.msra.mxu1 %v3270_v22 }
0x12ab   :  { %5224 = vmatprep.subr.mxu1 %v3269_v8 }
0x12ac   :  { %5225 = vmatpush3.msra.mxu1 %v3269_v8 }
0x12ad   :  { %5227 = vmatmul.mubr.msk.f32.vlgmr.msra.gmra.mxu1 %vm212_vm2, %v4560_v37  ;;  %5243 = vmatprep.subr.mxu1 %v6683_v58 }
0x12ae   :  { %5229 = vmatprep.mubr.msk.f32.mxu1 %vm212_vm2, %v4561_v49  ;;  %v6697_v49 = vld [vmem:[#allocation21_spill] sm:$0xff] }
0x12b1   :  { %5230 = vmatmul.mubr.msk.f32.gmra.mxu1 %vm212_vm2, %v4562_v54 }
0x12b2   :  { %5251 = vmatprep.mubr.msk.f32.mxu1 %vm5383_vm3, %v6683_v58 }
0x136d   :  { %v5228_v51 = vpop.f32.mrf.mxu1 }
0x136e   :  { %v3387_v32 = vadd.f32 %v5228_v51, %v6688_v26  ;;  %v6698_v51 = vld [vmem:[#allocation23_spill] sm:$0xff] }
0x136f   :  { %v3381_v60 = vpop.f32.mrf.mxu1 }
0x1370   :  { %v3382_v10 = vadd.f32 %v3381_v60, %v6690_v9  ;;  %v3401_v12 = vmax.f32 %v3387_v32, 0.0  ;;  %v4607_v9 = vld [vmem:[%s6647_s5 + $0xb0] sm:$0xff] }
0x1371   :  { %v5231_v63 = vpop.f32.mrf.mxu1 }
0x1372   :  { %v3397_v24 = vadd.f32 %v5231_v63, %v6687_v53  ;;  %v3400_v38 = vmax.f32 %v3382_v10, 0.0  ;;  %v6699_v53 = vld [vmem:[#allocation22_spill] sm:$0xff]  ;;  %v4608_v10 = vld [vmem:[%s6647_s5 + $0xb8] sm:$0xff] }
0x1373   :  { %v3391_v23 = vpop.f32.mrf.mxu1 }
0x1374   :  { %v3403_v40 = vmax.f32 %v3397_v24, 0.0  ;;  %v3392_v35 = vadd.f32 %v3391_v23, %v6689_v34  ;;  %v6700_v23 = vld [vmem:[#allocation24_spill] sm:$0xff] }
0x1376   :  { %v3402_v11 = vmax.f32 %v3392_v35, 0.0  ;;  %5232 = vmatprep.subr.mxu0 %v3403_v40  ;;  %5244 = vmatpush3.msra.mxu1 %v3403_v40  ;;  %v4606_v35 = vld [vmem:[%s6647_s5 + $0xa8] sm:$0xff] }
0x1377   :  { %5233 = vmatpush3.msra.mxu0 %v3403_v40  ;;  %5245 = vmatprep.subr.mxu1 %v6683_v58 }
0x1378   :  { %5234 = vmatprep.subr.mxu0 %v3402_v11  ;;  %5246 = vmatpush3.msra.mxu1 %v3402_v11 }
0x1379   :  { %5235 = vmatpush3.msra.mxu0 %v3402_v11  ;;  %5247 = vmatprep.subr.mxu1 %v6683_v58  ;;  %v4617_v11 = vld [vmem:[%s6649_s7 + $0xa0] sm:$0xff] }
0x137a   :  { %5236 = vmatprep.subr.mxu0 %v3401_v12  ;;  %5248 = vmatpush3.msra.mxu1 %v3401_v12 }
0x137b   :  { %5237 = vmatpush3.msra.mxu0 %v3401_v12  ;;  %5249 = vmatprep.subr.mxu1 %v6683_v58 }
0x137c   :  { %5238 = vmatprep.subr.mxu0 %v3400_v38  ;;  %5250 = vmatpush3.msra.mxu1 %v3400_v38 }
0x137d   :  { %5239 = vmatpush3.msra.mxu0 %v3400_v38  ;;  %5252 = vmatmul.mubr.msk.f32.vlgmr.msra.gmra.mxu1 %vm212_vm2, %v4577_v39 }
0x137e   :  { %5241 = vmatmul.mubr.msk.f32.vlgmr.msra.gmra.mxu0 %vm212_vm2, %v4572_v25  ;;  %5286 = vmatprep.mubr.msk.f32.mxu1 %vm212_vm2, %v4605_v21  ;;  %v6701_v25 = vld [vmem:[#allocation25_spill] sm:$0xff] }
0x137f   :  { %5258 = vmatprep.mubr.msk.f32.mxu0 %vm78_vm1, %v4580_v33 }
0x143d   :  { %v3581_v0 = vpop.f32.mrf.mxu1 }
0x143e   :  { %v3582_v4 = vadd.f32 %v3581_v0, %v3510_v2  ;;  %v5242_v27 = vpop.f32.mrf.mxu0  ;;  %v6702_v0 = vld [vmem:[#allocation27_spill] sm:$0xff] }
0x143f   :  { %v3498_v41 = vadd.f32 %v5242_v27, %v6691_v28  ;;  %v5253_v61 = vpop.f32.mrf.mxu1  ;;  %v6703_v28 = vld [vmem:[#allocation26_spill] sm:$0xff] }
0x1440   :  { %v6524_v3 = vadd.f32 %v3582_v4, %v6409_v62  ;;  %v3492_v52 = vpop.f32.mrf.mxu0  ;;  %v4581_v62 = vld [vmem:[%s6643_s1 + $0xa8] sm:$0xff]  ;;  %v6704_v61 = vld [vmem:[#allocation28_spill] sm:$0xff] }
0x1441   :  { %v6527_v56 = vsub.f32 %v6412_v1, %v3498_v41  ;;  %v3493_v59 = vadd.f32 %v3492_v52, %v6692_v57  ;;  %v4582_v1 = vld [vmem:[%s6643_s1 + $0xb0] sm:$0xff] }
0x1443   :  { %v6531_v13 = vsub.f32 %v6416_v16, %v3493_v59  ;;  %5254 = vmatprep.subr.msk.mxu0 %vm91_vm0, %v6527_v56  ;;  %v4583_v16 = vld [vmem:[%s6643_s1 + $0xb8] sm:$0xff] }
0x1444   :  { %5255 = vmatpush3.msk.msra.mxu0 %vm91_vm0, %v6527_v56 }
0x1445   :  { %5256 = vmatprep.subr.mxu0 %v6531_v13 }
0x1446   :  { %5257 = vmatpush3.msra.mxu0 %v6531_v13 }
0x1447   :  { %5259 = vmatmul.mubr.msk.f32.vlgmr.msra.gmra.mxu0 %vm78_vm1, %v4581_v62 }
0x1448   :  { %5261 = vmatprep.mubr.msk.f32.mxu0 %vm78_vm1, %v4582_v1  ;;  %v4618_v1 = vld [vmem:[%s6649_s7 + $0xa8] sm:$0xff] }
0x144b   :  { %5262 = vmatmul.mubr.msk.f32.gmra.mxu0 %vm78_vm1, %v4583_v16  ;;  %v4619_v16 = vld [vmem:[%s6649_s7 + $0xb0] sm:$0xff] }
0x144c   :  { %5272 = vmatprep.mubr.msk.f32.mxu0 %vm212_vm2, %v4593_v14  ;;  %v4620_v14 = vld [vmem:[%s6649_s7 + $0xb8] sm:$0xff] }
0x1507   :  { %v5260_v15 = vpop.f32.mrf.mxu0 }
0x1508   :  { %v3703_v43 = vadd.f32 %v5260_v15, %v6694_v36  ;;  %v4629_v15 = vld [vmem:[%s6651_s9 + $0x50] sm:$0xff] }
0x1509   :  { %v3697_v17 = vpop.f32.mrf.mxu0 }
0x150a   :  { %v3698_v50 = vadd.f32 %v3697_v17, %v6696_v48  ;;  %v3717_v5 = vmax.f32 %v3703_v43, 0.0  ;;  %v6707_v48 = vld [vmem:[#allocation31_spill] sm:$0xff] }
0x150b   :  { %v5263_v42 = vpop.f32.mrf.mxu0 }
0x150c   :  { %v3713_v30 = vadd.f32 %v5263_v42, %v6693_v29  ;;  %v3716_v6 = vmax.f32 %v3698_v50, 0.0 }
0x150d   :  { %v3707_v31 = vpop.f32.mrf.mxu0 }
0x150e   :  { %v3719_v44 = vmax.f32 %v3713_v30, 0.0  ;;  %v3708_v47 = vadd.f32 %v3707_v31, %v6695_v45  ;;  %v6705_v30 = vld [vmem:[#allocation29_spill] sm:$0xff]  ;;  %v6706_v45 = vld [vmem:[#allocation30_spill] sm:$0xff] }
0x1510   :  { %v3718_v46 = vmax.f32 %v3708_v47, 0.0  ;;  %5264 = vmatprep.subr.mxu0 %v3719_v44 }
0x1511   :  { %5265 = vmatpush3.msra.mxu0 %v3719_v44 }
0x1512   :  { %5266 = vmatprep.subr.mxu0 %v3718_v46 }
0x1513   :  { %5267 = vmatpush3.msra.mxu0 %v3718_v46 }
0x1514   :  { %5268 = vmatprep.subr.mxu0 %v3717_v5 }
0x1515   :  { %5269 = vmatpush3.msra.mxu0 %v3717_v5 }
0x1516   :  { %5270 = vmatprep.subr.mxu0 %v3716_v6 }
0x1517   :  { %5271 = vmatpush3.msra.mxu0 %v3716_v6 }
0x1518   :  { %5273 = vmatmul.mubr.msk.f32.vlgmr.msra.gmra.mxu0 %vm212_vm2, %v4594_v7  ;;  %v4630_v7 = vld [vmem:[%s6651_s9 + $0x58] sm:$0x3]  ;;  %s5337_s9 = scalar_lea.vmem %s4317_s2, 128 }
0x1519   :  { %5275 = vmatprep.mubr.msk.f32.mxu0 %vm212_vm2, %v4595_v18  ;;  %v4122_v18 = vpop.permute.xlu1 %4121  ;;  %p5338_p0 = scmp.ne.s32.totalorder %s4317_s2, %s5337_s9  ;;  %p5343_p2 = scmp.lt.s32.totalorder %s5337_s9, %s5337_s9 }
0x151b   :  { %p5344_p3 = por %p5343_p2, %p5342_p1 }
0x151c   :  { %5276 = vmatmul.mubr.msk.f32.gmra.mxu0 %vm212_vm2, %v4596_v19 }
0x151d   :  { %5300 = vmatprep.mubr.msk.f32.mxu0 %vm212_vm2, %v4617_v11  ;;  %v4219_v19 = vpop.permute.xlu1 %4218  ;;  %p5345_p4 = pnand %p5344_p3, %p5338_p0 }
0x15d8   :  { %v5274_v22 = vpop.f32.mrf.mxu0 }
0x15d9   :  { %v3834_v60 = vadd.f32 %v5274_v22, %v6698_v51  ;;  %v4127_v22 = vpop.permute.xlu0 %4126 }
0x15da   :  { %v3828_v8 = vpop.f32.mrf.mxu0 }
0x15db   :  { %v3829_v26 = vadd.f32 %v3828_v8, %v6700_v23  ;;  %v3848_v40 = vmax.f32 %v3834_v60, 0.0 }
0x15dc   :  { %v5277_v37 = vpop.f32.mrf.mxu0 }
0x15dd   :  { %v3844_v54 = vadd.f32 %v5277_v37, %v6697_v49  ;;  %v3847_v34 = vmax.f32 %v3829_v26, 0.0 }
0x15de   :  { %v3838_v55 = vpop.f32.mrf.mxu0 }
0x15df   :  { %v3850_v63 = vmax.f32 %v3844_v54, 0.0  ;;  %v3839_v24 = vadd.f32 %v3838_v55, %v6699_v53 }
0x15e1   :  { %v3849_v32 = vmax.f32 %v3839_v24, 0.0  ;;  %5278 = vmatprep.subr.mxu1 %v3850_v63 }
0x15e2   :  { %5279 = vmatpush3.msra.mxu1 %v3850_v63 }
0x15e3   :  { %5280 = vmatprep.subr.mxu1 %v3849_v32 }
0x15e4   :  { %5281 = vmatpush3.msra.mxu1 %v3849_v32 }
0x15e5   :  { %5282 = vmatprep.subr.mxu1 %v3848_v40 }
0x15e6   :  { %5283 = vmatpush3.msra.mxu1 %v3848_v40 }
0x15e7   :  { %5284 = vmatprep.subr.mxu1 %v3847_v34 }
0x15e8   :  { %5285 = vmatpush3.msra.mxu1 %v3847_v34 }
0x15e9   :  { %5287 = vmatmul.mubr.msk.f32.vlgmr.msra.gmra.mxu1 %vm212_vm2, %v4606_v35 }
0x15ea   :  { %5289 = vmatprep.mubr.msk.f32.mxu1 %vm212_vm2, %v4607_v9 }
0x15ed   :  { %5290 = vmatmul.mubr.msk.f32.gmra.mxu1 %vm212_vm2, %v4608_v10 }
0x15ee   :  { %5314 = vmatprep.mubr.msk.f32.mxu1 %vm212_vm2, %v4629_v15 }
0x16a9   :  { %v5288_v12 = vpop.f32.mrf.mxu1 }
0x16aa   :  { %v3965_v4 = vadd.f32 %v5288_v12, %v6702_v0 }
0x16ab   :  { %v3959_v38 = vpop.f32.mrf.mxu1 }
0x16ac   :  { %v3960_v52 = vadd.f32 %v3959_v38, %v6704_v61  ;;  %v3979_v59 = vmax.f32 %v3965_v4, 0.0 }
0x16ad   :  { %v5291_v39 = vpop.f32.mrf.mxu1 }
0x16ae   :  { %v3975_v33 = vadd.f32 %v5291_v39, %v6701_v25  ;;  %v3978_v62 = vmax.f32 %v3960_v52, 0.0 }
0x16af   :  { %v3969_v2 = vpop.f32.mrf.mxu1 }
0x16b0   :  { %v3981_v27 = vmax.f32 %v3975_v33, 0.0  ;;  %v3970_v41 = vadd.f32 %v3969_v2, %v6703_v28 }
0x16b2   :  { %v3980_v57 = vmax.f32 %v3970_v41, 0.0  ;;  %5292 = vmatprep.subr.mxu0 %v3981_v27 }
0x16b3   :  { %5293 = vmatpush3.msra.mxu0 %v3981_v27 }
0x16b4   :  { %5294 = vmatprep.subr.mxu0 %v3980_v57 }
0x16b5   :  { %5295 = vmatpush3.msra.mxu0 %v3980_v57 }
0x16b6   :  { %5296 = vmatprep.subr.mxu0 %v3979_v59 }
0x16b7   :  { %5297 = vmatpush3.msra.mxu0 %v3979_v59 }
0x16b8   :  { %5298 = vmatprep.subr.mxu0 %v3978_v62 }
0x16b9   :  { %5299 = vmatpush3.msra.mxu0 %v3978_v62 }
0x16ba   :  { %5301 = vmatmul.mubr.msk.f32.vlgmr.msra.gmra.mxu0 %vm212_vm2, %v4618_v1  ;;  %5317 = vmatprep.subr.mxu0 %v6683_v58 }
0x16bb   :  { %5303 = vmatprep.mubr.msk.f32.mxu0 %vm212_vm2, %v4619_v16 }
0x16be   :  { %5304 = vmatmul.mubr.msk.f32.gmra.mxu0 %vm212_vm2, %v4620_v14 }
0x16bf   :  { %5325 = vmatprep.mubr.msk.f32.mxu0 %vm5383_vm3, %v6683_v58 }
0x177a   :  { %v5302_v17 = vpop.f32.mrf.mxu0 }
0x177b   :  { %v4096_v43 = vadd.f32 %v5302_v17, %v6173_v20  ;;  %v4635_v20 = vld [vmem:[%s6653_s11 + $0x28] sm:$0x1f]  ;;  %s5385_s11 = smov [#allocation2]  }
0x177c   :  { %v4090_v42 = vpop.f32.mrf.mxu0  ;;  %s4303_s10 = sshll.u32 %s5385_s11, 4  ;;  %s4304_s10 = int_to_ptr.vmem [resolvable:$true] %s4303_s10 }
0x177d   :  { %v4091_v50 = vadd.f32 %v4090_v42, %v6707_v48  ;;  %v4110_v5 = vmax.f32 %v4096_v43, 0.0 }
0x177e   :  { %v5305_v29 = vpop.f32.mrf.mxu0 }
0x177f   :  { %v4106_v31 = vadd.f32 %v5305_v29, %v6705_v30  ;;  %v4109_v6 = vmax.f32 %v4091_v50, 0.0 }
0x1780   :  { %v4100_v36 = vpop.f32.mrf.mxu0 }
0x1781   :  { %v4112_v44 = vmax.f32 %v4106_v31, 0.0  ;;  %v4101_v47 = vadd.f32 %v4100_v36, %v6706_v45 }
0x1783   :  { %v4111_v46 = vmax.f32 %v4101_v47, 0.0  ;;  %5306 = vmatprep.subr.mxu1 %v4112_v44  ;;  %5318 = vmatpush3.msra.mxu0 %v4112_v44 }
0x1784   :  { %5307 = vmatpush3.msra.mxu1 %v4112_v44  ;;  %5319 = vmatprep.subr.mxu0 %v6683_v58 }
0x1785   :  { %5308 = vmatprep.subr.mxu1 %v4111_v46  ;;  %5320 = vmatpush3.msra.mxu0 %v4111_v46 }
0x1786   :  { %5309 = vmatpush3.msra.mxu1 %v4111_v46  ;;  %5321 = vmatprep.subr.mxu0 %v6683_v58 }
0x1787   :  { %5310 = vmatprep.subr.mxu1 %v4110_v5  ;;  %5322 = vmatpush3.msra.mxu0 %v4110_v5 }
0x1788   :  { %5311 = vmatpush3.msra.mxu1 %v4110_v5  ;;  %5323 = vmatprep.subr.mxu0 %v6683_v58 }
0x1789   :  { %5312 = vmatprep.subr.mxu1 %v4109_v6  ;;  %5324 = vmatpush3.msra.mxu0 %v4109_v6 }
0x178a   :  { %5313 = vmatpush3.msra.mxu1 %v4109_v6  ;;  %5326 = vmatmul.mubr.msk.f32.vlgmr.msra.gmra.mxu0 %vm212_vm2, %v4635_v20 }
0x178b   :  { %5315 = vmatmul.mubr.msk.f32.vlgmr.msra.gmra.mxu1 %vm212_vm2, %v4630_v7 }
0x184a   :  { %v4290_v21 = vpop.f32.mrf.mxu0 }
0x184b   :  { %v4291_v8 = vadd.f32 %v4290_v21, %v4219_v19  ;;  %v5316_v37 = vpop.f32.mrf.mxu1 }
0x184c   :  { %v4207_v58 = vadd.f32 %v5316_v37, %v4127_v22  ;;  %v5327_v49 = vpop.f32.mrf.mxu0 }
0x184d   :  { %v4201_v54 = vpop.f32.mrf.mxu1  ;;  %v4294_v55 = vadd.f32 %v4291_v8, %v6524_v3 }
0x184e   :  { %v4211_v51 = vsub.f32 %v6527_v56, %v4207_v58  ;;  %v4202_v60 = vadd.f32 %v4201_v54, %v4122_v18 }
0x184f   :  { %4297 = vst [vmem:[#allocation4] sm:$0x1f] %v4294_v55 }
0x1850   :  { %4296 = vst [vmem:[#allocation2 + $0x8] sm:$0x3] %v4211_v51  ;;  %v4210_v63 = vsub.f32 %v6531_v13, %v4202_v60 }
0x1851   :  { %5348 = shalt.err (!%p5345_p4)
}
0x1852   :  { %4319 = dma.vmem_to_hbm [thread:$0]  %s4317_s2, 128, %s6656_s14, [#allocation5]   ;;  %4295 = vst [vmem:[#allocation2] sm:$0xff] %v4210_v63 }
0x1853   :  { %s5357_s18 = scalar_lea.vmem %s4304_s10, 256  ;;  %p5362_p6 = scmp.lt.s32.totalorder %s4304_s10, %s4304_s10 }
0x1854   :  { %p5358_p5 = scmp.ne.s32.totalorder %s4304_s10, %s5357_s18  ;;  %p5363_p7 = scmp.lt.s32.totalorder %s5357_s18, %s5357_s18 }
0x1856   :  { %p5364_p8 = por %p5363_p7, %p5362_p6 }
0x1858   :  { %p5365_p9 = pnand %p5364_p8, %p5358_p5 }
0x185a   :  { %5368 = shalt.err (!%p5365_p9)
}
0x185b   :  { %s5386_s8 = smov 128   ;;  %s5387_s3 = smov 8  }
0x185c   :  { %4309 = dma.vmem_to_hbm [thread:$0]  %s4304_s10, 256, %s6655_s13, [#allocation3], %s5386_s8, %s5386_s8, %s5387_s3  }
0x185d   :  { %5377 = dma.done.wait [#allocation3], 256  }
0x185e   :  { %5378 = vsyncadd [#allocation3], 4294967040 }
0x185f   :  { %5379 = dma.done.wait [#allocation5], 128  }
0x1860   :  { %5380 = vsyncadd [#allocation5], 4294967168 }
0x1861   :  { %4326 = vsyncpa [#allocation3], 1 }
0x1862   :  { %4327 = vsyncpa [#allocation5], 1 }

</bundles_post_ra>
